<compile_context>
chip_gen: v6e
topology: v6e:2x2x1
jax: 0.10.0
libtpu: 0.0.40
codegen_flags: <defaults>
</compile_context>

<pallas_src>
import math
import functools

import jax
import jax.numpy as jnp
from jax import lax
from jax.experimental import pallas as pl
from jax.experimental.pallas import tpu as pltpu


# ----------------------------- tiling helpers ------------------------------

_MAX_ROWS = 512       # mem-bound row kernels: 512-row tiles ~85% of HBM roofline
_MAX_ROWS_FFN = 256   # keep headroom for resident wi/w2 weights (v7x 64 MiB VMEM)


def _grid_rows(n, max_rows):
    """Row tile + padded row count.  n <= max_rows -> single full block."""
    if n <= max_rows:
        return n, n
    rb = max_rows
    return rb, -(-n // rb) * rb


def _seq_tile(s, max_tile=_MAX_ROWS):
    """Per-batch sequence tile that divides S exactly (no seq padding, so the
    (B,H,S,d) -> (B*S, E) reinterpret of the attention output stays free)."""
    if s <= max_tile:
        return s
    for t in range(max_tile, 7, -8):          # multiples of 8
        if s % t == 0:
            return t
    return s                                   # fallback: whole sequence


def _pad_rows(x, rows, value=0.0):
    n = x.shape[0]
    if n == rows:
        return x
    pad = [(0, rows - n)] + [(0, 0)] * (x.ndim - 1)
    return jnp.pad(x, pad, constant_values=value)


# ----------------------------- Pallas kernels -----------------------------

def _qkv_stats_kernel(x_ref, w_ref, b_ref,
                      qkv_ref, gram_ref, sq_ref, sk_ref,
                      *, heads, d_k, n_valid, masked):
    # Fused q/k/v projection (single (rb,3E) MXU matmul, bf16 inputs / f32 acc,
    # 1/sqrt(d_k) folded into the q/k weight+bias columns) PLUS the
    # second-moment statistics as resident (d,d)/(1,d) accumulators, so q/k
    # are never re-read from HBM for the stats pass.
    @pl.when(pl.program_id(0) == 0)
    def _():
        gram_ref[...] = jnp.zeros_like(gram_ref)
        sq_ref[...] = jnp.zeros_like(sq_ref)
        sk_ref[...] = jnp.zeros_like(sk_ref)

    x = x_ref[...].astype(jnp.bfloat16)
    qkv = jnp.dot(x, w_ref[...], preferred_element_type=jnp.float32) + b_ref[...]
    qkv_ref[...] = qkv                                     # lane-dense store

    e = heads * d_k
    rows = x_ref.shape[0]
    if masked:
        # zero out padded rows for the statistics (bias makes them non-zero)
        row_ids = (pl.program_id(0) * rows
                   + lax.broadcasted_iota(jnp.int32, (rows, 1), 0))
        rmask = (row_ids < n_valid).astype(jnp.float32)
    else:
        rmask = None

    # Per-head grams / sums (slices, no in-kernel reshape).  Kept f32: this
    # statistic feeds the SVD that builds B, flagged as precision-sensitive.
    dn = (((0,), (0,)), ((), ()))                          # contract the row axis
    gram = jnp.zeros((d_k, d_k), jnp.float32)
    sq = jnp.zeros((1, d_k), jnp.float32)
    sk = jnp.zeros((1, d_k), jnp.float32)
    for h in range(heads):
        qh = qkv[:, h * d_k:(h + 1) * d_k]
        kh = qkv[:, e + h * d_k: e + (h + 1) * d_k]
        if rmask is not None:
            qh = qh * rmask
            kh = kh * rmask
        gram = gram + lax.dot_general(qh, qh, dn,
                                      preferred_element_type=jnp.float32)
        gram = gram + lax.dot_general(kh, kh, dn,
                                      preferred_element_type=jnp.float32)
        sq = sq + jnp.sum(qh, axis=0, keepdims=True)
        sk = sk + jnp.sum(kh, axis=0, keepdims=True)
    gram_ref[...] += gram
    sq_ref[...] += sq
    sk_ref[...] += sk


def _feat_attn_kernel(qkv_ref, bbd_ref, bias_ref, o_ref, *, heads, d_k, embed):
    # Fused random-feature map + per-token HxH attention.  qf/kf live only in
    # VMEM/vregs.  The feature matmul is a single lane-dense (T,E)@(E,E) with
    # the block-diagonal kron(I_H, B^T) (kept f32: exp amplifies bf16 error).
    # The tiny per-token HxH contractions are broadcast-multiply + lane
    # reductions (VPU/XLU), not per-token MXU matmuls.
    qkv = qkv_ref[...]                                     # (T, 3E) f32
    q = qkv[:, :embed]
    k = qkv[:, embed:2 * embed]
    bbd = bbd_ref[...]                                     # (E, E) f32 blockdiag B^T
    bias = bias_ref[...]                                   # (1, E) tiled bias

    qf = jnp.exp(jnp.dot(q, bbd, preferred_element_type=jnp.float32) + bias)
    kf = jnp.exp(jnp.dot(k, bbd, preferred_element_type=jnp.float32) + bias)

    qn, kn, vs = [], [], []
    for h in range(heads):
        lo, hi = h * d_k, (h + 1) * d_k
        qh = qf[:, lo:hi]
        kh = kf[:, lo:hi]
        qn.append(qh * lax.rsqrt(jnp.sum(qh * qh, axis=-1, keepdims=True)))
        kn.append(kh * lax.rsqrt(jnp.sum(kh * kh, axis=-1, keepdims=True)))
        vs.append(qkv[:, 2 * embed + lo: 2 * embed + hi])

    for h in range(heads):
        # scores of head h against every head g, softmax over g (per token)
        s = [jnp.sum(qn[h] * kn[g], axis=-1, keepdims=True)   # (T, 1)
             for g in range(heads)]
        m = s[0]
        for g in range(1, heads):
            m = jnp.maximum(m, s[g])
        ex = [jnp.exp(s[g] - m) for g in range(heads)]
        den = ex[0]
        for g in range(1, heads):
            den = den + ex[g]
        # approx reciprocal (EUP): ~1e-4 relative vs exact softmax denominator
        inv = pl.reciprocal(den, approx=True)
        ctx = (ex[0] * inv) * vs[0]
        for g in range(1, heads):
            ctx = ctx + (ex[g] * inv) * vs[g]
        # Write directly into the (B, H, S, d) layout: the reference's
        # transpose(1,2).view(B,S,E) then becomes a free reinterpret.
        o_ref[h, :, :] = ctx


def _post_kernel(ctx_ref, res_ref, wo_ref, bo_ref, wi_ref, bi_ref,
                 w2_ref, b2_ref, g_ref, beta_ref, o_ref, *, eps):
    # out_proj + residual + LN + FFN(wi->w2) + residual + LN, all fused: the
    # h1 activation and the (rows, intermediate) activation never touch HBM.
    a = jnp.dot(ctx_ref[...].astype(jnp.bfloat16), wo_ref[...],
                preferred_element_type=jnp.float32) + bo_ref[...]
    h = a + res_ref[...]
    mu = jnp.mean(h, axis=-1, keepdims=True)
    var = jnp.mean(jnp.square(h - mu), axis=-1, keepdims=True)
    h1 = (h - mu) * lax.rsqrt(var + eps) * g_ref[...] + beta_ref[...]

    inter = jnp.dot(h1.astype(jnp.bfloat16), wi_ref[...],
                    preferred_element_type=jnp.float32) + bi_ref[...]
    y = jnp.dot(inter.astype(jnp.bfloat16), w2_ref[...],
                preferred_element_type=jnp.float32) + b2_ref[...]
    h2 = y + h1                                            # dropout = identity
    mu2 = jnp.mean(h2, axis=-1, keepdims=True)
    var2 = jnp.mean(jnp.square(h2 - mu2), axis=-1, keepdims=True)
    o_ref[...] = (h2 - mu2) * lax.rsqrt(var2 + eps) * g_ref[...] + beta_ref[...]


# ----------------------------- kernel wrappers ------------------------------

def qkv_stats(x2, p, heads, d):
    n, e = x2.shape
    rb, n_pad = _grid_rows(n, _MAX_ROWS)
    xp = _pad_rows(x2, n_pad)
    kernel = functools.partial(_qkv_stats_kernel, heads=heads, d_k=d,
                               n_valid=n, masked=(n_pad != n))
    row_in = pl.BlockSpec((rb, e), lambda i: (i, 0))
    row_out = pl.BlockSpec((rb, 3 * e), lambda i: (i, 0))
    qkv, gram, sq, sk = pl.pallas_call(
        kernel,
        out_shape=(jax.ShapeDtypeStruct((n_pad, 3 * e), jnp.float32),
                   jax.ShapeDtypeStruct((d, d), jnp.float32),
                   jax.ShapeDtypeStruct((1, d), jnp.float32),
                   jax.ShapeDtypeStruct((1, d), jnp.float32)),
        grid=(n_pad // rb,),
        in_specs=[row_in,
                  pl.BlockSpec((e, 3 * e), lambda i: (0, 0)),
                  pl.BlockSpec((1, 3 * e), lambda i: (0, 0))],
        out_specs=(row_out,
                   pl.BlockSpec((d, d), lambda i: (0, 0)),
                   pl.BlockSpec((1, d), lambda i: (0, 0)),
                   pl.BlockSpec((1, d), lambda i: (0, 0))),
        # reduction accumulators are resident across the row axis
        # TODO(synk): on v7x, split into 2 partial accumulators (leading
        # parallel axis) to regain 2-TensorCore sharding for this kernel.
        compiler_params=pltpu.CompilerParams(
            dimension_semantics=("arbitrary",)),
    )(xp, p['w_qkv_t'], p['b_qkv'])
    if n_pad != n:
        qkv = qkv[:n]
    return qkv, gram, sq, sk


def feat_attention(qkv3, bbd, bias_tiled, heads, d):
    """qkv3: (B, S, 3E) -> context written in (B, H, S, d) layout."""
    B, S, e3 = qkv3.shape
    e = e3 // 3
    ts = _seq_tile(S)
    kernel = functools.partial(_feat_attn_kernel, heads=heads, d_k=d, embed=e)
    return pl.pallas_call(
        kernel,
        out_shape=jax.ShapeDtypeStruct((B, heads, S, d), jnp.float32),
        grid=(B, S // ts),
        in_specs=[pl.BlockSpec((None, ts, e3), lambda b, s: (b, s, 0)),
                  pl.BlockSpec((e, e), lambda b, s: (0, 0)),
                  pl.BlockSpec((1, e), lambda b, s: (0, 0))],
        out_specs=pl.BlockSpec((None, heads, ts, d), lambda b, s: (b, 0, s, 0)),
        compiler_params=pltpu.CompilerParams(
            dimension_semantics=("parallel", "parallel")),
    )(qkv3, bbd, bias_tiled)


def post_ffn_ln(ctx_flat, residual, p, eps):
    n, e = ctx_flat.shape
    inter = p['wi_t'].shape[1]
    rb, n_pad = _grid_rows(n, _MAX_ROWS_FFN)
    cp = _pad_rows(ctx_flat, n_pad)
    rp = _pad_rows(residual, n_pad)
    row = pl.BlockSpec((rb, e), lambda i: (i, 0))
    # TODO(synk): at BERT-base sizes on v5e, single-buffer the constant weight
    # blocks (pipeline_mode=pl.Buffered(1)) or K-tile wi/w2 with an inner grid
    # axis; vmem_limit_bytes is raised here to cover the resident weights.
    out = pl.pallas_call(
        functools.partial(_post_kernel, eps=eps),
        out_shape=jax.ShapeDtypeStruct((n_pad, e), jnp.float32),
        grid=(n_pad // rb,),
        in_specs=[row, row,
                  pl.BlockSpec((e, e), lambda i: (0, 0)),        # wo
                  pl.BlockSpec((1, e), lambda i: (0, 0)),        # bo
                  pl.BlockSpec((e, inter), lambda i: (0, 0)),    # wi
                  pl.BlockSpec((1, inter), lambda i: (0, 0)),    # bi
                  pl.BlockSpec((inter, e), lambda i: (0, 0)),    # w2
                  pl.BlockSpec((1, e), lambda i: (0, 0)),        # b2
                  pl.BlockSpec((1, e), lambda i: (0, 0)),        # ln gamma
                  pl.BlockSpec((1, e), lambda i: (0, 0))],       # ln beta
        out_specs=row,
        compiler_params=pltpu.CompilerParams(
            dimension_semantics=("parallel",),
            vmem_limit_bytes=64 * 1024 * 1024),
    )(cp, rp, p['wo_t'], p['bo'], p['wi_t'], p['bi'], p['w2_t'], p['b2'],
      p['ln_g'], p['ln_b'])
    return out[:n] if n_pad != n else out


# ----------------------------- parameters ---------------------------------

def init_params(key, hidden, heads, intermediate, num_random_features):
    d = hidden // heads
    scale = 1.0 / math.sqrt(d)
    ks = jax.random.split(key, 8)

    def lin(k, dout, din):
        kw, kb = jax.random.split(k)
        bound = 1.0 / math.sqrt(din)
        w = jax.random.uniform(kw, (dout, din), jnp.float32, -bound, bound)
        b = jax.random.uniform(kb, (dout,), jnp.float32, -bound, bound)
        return w, b

    mm = jnp.bfloat16   # MXU operand dtype (bf16 inputs, f32 accumulation)
    wq, bq = lin(ks[0], hidden, hidden)
    wk, bk = lin(ks[1], hidden, hidden)
    wv, bv = lin(ks[2], hidden, hidden)
    wo, bo = lin(ks[3], hidden, hidden)
    wi, bi = lin(ks[4], intermediate, hidden)
    w2, b2 = lin(ks[5], hidden, intermediate)

    p = {}
    # One concatenated (in, 3*out) weight, pre-transposed, bf16, with the
    # 1/sqrt(d_k) scale folded into the q/k columns + biases.
    p['w_qkv_t'] = jnp.concatenate(
        [wq.T * scale, wk.T * scale, wv.T], axis=1).astype(mm)
    p['b_qkv'] = jnp.concatenate(
        [bq * scale, bk * scale, bv]).reshape(1, 3 * hidden)
    p['wo_t'] = wo.T.astype(mm)
    p['bo'] = bo.reshape(1, hidden)
    p['wi_t'] = wi.T.astype(mm)
    p['bi'] = bi.reshape(1, intermediate)
    p['w2_t'] = w2.T.astype(mm)
    p['b2'] = b2.reshape(1, hidden)
    p['ln_g'] = jnp.ones((1, hidden), jnp.float32)
    p['ln_b'] = jnp.zeros((1, hidden), jnp.float32)
    # SymmetricRandomFeatures: random_matrix = eigenvectors of R R^T
    r = jax.random.normal(ks[6], (d, num_random_features), jnp.float32)
    _, eigvecs = jnp.linalg.eigh(r @ r.T)
    p['random_matrix'] = eigvecs                               # (d, d)
    # Deterministic stand-in for the per-forward torch.randn(M, d_k) draw.
    p['omega_draw'] = jax.random.normal(ks[7], (num_random_features, d),
                                        jnp.float32)
    return p


# ----------------------------- forward pass --------------------------------

def custom_bert_layer(x, p, *, num_heads, eps=1e-12):
    B, S, E = x.shape
    H = num_heads
    d = E // H
    n = B * S
    x2 = x.reshape(n, E)

    # Fused QKV projection + second-moment statistics (one HBM pass over x).
    qkv, gram, sq, sk = qkv_stats(x2, p, H, d)

    # --- SymmetricRandomFeatures: data-dependent B, D (tiny (d,d) glue) ---
    # TODO(synk): torch.linalg.svd has no Pallas equivalent; plain JAX here.
    inv = 1.0 / (n * H)
    mu_q = sq * inv
    mu_k = sk * inv
    matrix = gram * inv + mu_q.T @ mu_k + mu_k.T @ mu_q
    u, lam, _ = jnp.linalg.svd(matrix)
    a_diag = (1.0 / 16.0) * (1.0 - 2.0 * lam
                             - jnp.sqrt((2.0 * lam + 1.0) ** 2 + 8.0 * lam))
    eye = jnp.eye(d, dtype=jnp.float32)
    b_mat = jnp.sqrt(eye - 4.0 * jnp.diag(a_diag)) @ u.T   # elementwise sqrt (as ref)
    # det(I - 4A)^(1/4) in log space: no f32 overflow at d_k = 64.
    d_val = jnp.exp(0.25 * jnp.sum(jnp.log1p(-4.0 * a_diag)))
    omega = p['random_matrix'] @ p['omega_draw'].T          # (d, M)
    bias_vec = 0.5 * jnp.sum(omega ** 2, axis=0) + d_val    # (M,) == (d,)
    bias_tiled = jnp.tile(bias_vec, H).reshape(1, E)
    bbd = jnp.kron(jnp.eye(H, dtype=jnp.float32), b_mat.T)  # (E, E) blockdiag B^T

    # Fused feature map + attention, output written in (B, H, S, d) layout.
    ctx_bhsd = feat_attention(qkv.reshape(B, S, 3 * E), bbd, bias_tiled, H, d)

    # context.transpose(1,2).contiguous().view(B, S, E) — free reinterpret of
    # the (B,H,S,d) row-major order, exactly the reference semantics.
    ctx_flat = ctx_bhsd.reshape(n, E)

    # out_proj + residual + LN + FFN + residual + LN (single fused kernel).
    out = post_ffn_ln(ctx_flat, x2, p, eps)
    return out.reshape(B, S, E)


# ----------------------------- main -----------------------------------------

if __name__ == "__main__":
    HIDDEN, HEADS, INTER = 32, 4, 64
    D_K = HIDDEN // HEADS
    # TODO(synk): reference default num_random_features=64; it must equal d_k
    # for the reference broadcast to be well formed, so we use M = d_k.
    M = D_K
    B, S = 2, 8

    key = jax.random.PRNGKey(0)
    kx, kp = jax.random.split(key)
    x = jax.random.normal(kx, (B, S, HIDDEN), jnp.float32)
    params = init_params(kp, HIDDEN, HEADS, INTER, M)

    fwd = jax.jit(functools.partial(custom_bert_layer, num_heads=HEADS,
                                    eps=1e-12))
    out = fwd(x, params)
    out = jax.block_until_ready(out)

    assert out.shape == (B, S, HIDDEN)
    assert bool(jnp.all(jnp.isfinite(out)))
    print("KERNEL_OK")
</pallas_src>

<mosaic_0001>
module attributes {stable_mosaic.version = 11 : i64} {
  func.func @_qkv_stats_kernel(%arg0: i32, %arg1: memref<16x32xf32, #tpu.memory_space<vmem>>, %arg2: memref<32x96xbf16, #tpu.memory_space<vmem>>, %arg3: memref<1x96xf32, #tpu.memory_space<vmem>>, %arg4: memref<16x96xf32, #tpu.memory_space<vmem>>, %arg5: memref<8x8xf32, #tpu.memory_space<vmem>>, %arg6: memref<1x8xf32, #tpu.memory_space<vmem>>, %arg7: memref<1x8xf32, #tpu.memory_space<vmem>>) attributes {dimension_semantics = [#tpu.dimension_semantics<arbitrary>], iteration_bounds = array<i64: 1>, scalar_prefetch = 0 : i64, scratch_operands = 0 : i64, tpu.core_type = #tpu.core_type<tc>, window_params = [{transform_indices = @transform_0, window_bounds = array<i64: 16, 32>}, {pipeline_mode = #tpu.pipeline_mode<synchronous>, transform_indices = @transform_1, window_bounds = array<i64: 32, 96>}, {pipeline_mode = #tpu.pipeline_mode<synchronous>, transform_indices = @transform_2, window_bounds = array<i64: 1, 96>}, {transform_indices = @transform_3, window_bounds = array<i64: 16, 96>}, {pipeline_mode = #tpu.pipeline_mode<synchronous>, transform_indices = @transform_4, window_bounds = array<i64: 8, 8>}, {pipeline_mode = #tpu.pipeline_mode<synchronous>, transform_indices = @transform_5, window_bounds = array<i64: 1, 8>}, {pipeline_mode = #tpu.pipeline_mode<synchronous>, transform_indices = @transform_6, window_bounds = array<i64: 1, 8>}]} {
    %c0_i32 = arith.constant 0 : i32
    %0 = arith.cmpi eq, %arg0, %c0_i32 : i32
    %1 = arith.extui %0 : i1 to i32
    %c0_i32_0 = arith.constant 0 : i32
    %2 = arith.cmpi ne, %1, %c0_i32_0 : i32
    scf.if %2 {
      %cst_39 = arith.constant 0.000000e+00 : f32
      %71 = vector.broadcast %cst_39 : f32 to vector<8x8xf32>
      %c0_40 = arith.constant 0 : index
      %c0_41 = arith.constant 0 : index
      %72 = vector.load %arg5[%c0_40, %c0_41] : memref<8x8xf32, #tpu.memory_space<vmem>>, vector<8x8xf32>
      tpu.vector_store %arg5[%c0_40, %c0_41], %71 {strides = array<i32>} : memref<8x8xf32, #tpu.memory_space<vmem>>, vector<8x8xf32>,
      %cst_42 = arith.constant 0.000000e+00 : f32
      %73 = vector.broadcast %cst_42 : f32 to vector<1x8xf32>
      %c0_43 = arith.constant 0 : index
      %c0_44 = arith.constant 0 : index
      %74 = vector.load %arg6[%c0_43, %c0_44] : memref<1x8xf32, #tpu.memory_space<vmem>>, vector<1x8xf32>
      tpu.vector_store %arg6[%c0_43, %c0_44], %73 {strides = array<i32>} : memref<1x8xf32, #tpu.memory_space<vmem>>, vector<1x8xf32>,
      %cst_45 = arith.constant 0.000000e+00 : f32
      %75 = vector.broadcast %cst_45 : f32 to vector<1x8xf32>
      %c0_46 = arith.constant 0 : index
      %c0_47 = arith.constant 0 : index
      %76 = vector.load %arg7[%c0_46, %c0_47] : memref<1x8xf32, #tpu.memory_space<vmem>>, vector<1x8xf32>
      tpu.vector_store %arg7[%c0_46, %c0_47], %75 {strides = array<i32>} : memref<1x8xf32, #tpu.memory_space<vmem>>, vector<1x8xf32>,
    } else {
    }
    %c0 = arith.constant 0 : index
    %c0_1 = arith.constant 0 : index
    %3 = vector.load %arg1[%c0, %c0_1] : memref<16x32xf32, #tpu.memory_space<vmem>>, vector<16x32xf32>
    %4 = arith.truncf %3 : vector<16x32xf32> to vector<16x32xbf16>
    %c0_2 = arith.constant 0 : index
    %c0_3 = arith.constant 0 : index
    %5 = vector.load %arg2[%c0_2, %c0_3] : memref<32x96xbf16, #tpu.memory_space<vmem>>, vector<32x96xbf16>
    %cst = arith.constant dense<0.000000e+00> : vector<16x96xf32>
    %6 = tpu.matmul %4, %5, %cst {dimension_numbers = #tpu.dot_dimension_numbers<[1], [0], [0], [1], [0, 0, 1, 1], [], []>} : vector<16x32xbf16>, vector<32x96xbf16>, vector<16x96xf32> -> vector<16x96xf32>
    %c0_4 = arith.constant 0 : index
    %c0_5 = arith.constant 0 : index
    %7 = vector.load %arg3[%c0_4, %c0_5] : memref<1x96xf32, #tpu.memory_space<vmem>>, vector<1x96xf32>
    %8 = vector.broadcast %7 : vector<1x96xf32> to vector<16x96xf32>
    %9 = arith.addf %6, %8 : vector<16x96xf32>
    %c0_6 = arith.constant 0 : index
    %c0_7 = arith.constant 0 : index
    %10 = vector.load %arg4[%c0_6, %c0_7] : memref<16x96xf32, #tpu.memory_space<vmem>>, vector<16x96xf32>
    tpu.vector_store %arg4[%c0_6, %c0_7], %9 {strides = array<i32>} : memref<16x96xf32, #tpu.memory_space<vmem>>, vector<16x96xf32>,
    %cst_8 = arith.constant 0.000000e+00 : f32
    %11 = vector.broadcast %cst_8 : f32 to vector<8x8xf32>
    %cst_9 = arith.constant 0.000000e+00 : f32
    %12 = vector.broadcast %cst_9 : f32 to vector<1x8xf32>
    %cst_10 = arith.constant 0.000000e+00 : f32
    %13 = vector.broadcast %cst_10 : f32 to vector<1x8xf32>
    %14 = vector.extract_strided_slice %9 {offsets = [0, 0], sizes = [16, 8], strides = [1, 1]} : vector<16x96xf32> to vector<16x8xf32>
    %15 = vector.extract_strided_slice %9 {offsets = [0, 32], sizes = [16, 8], strides = [1, 1]} : vector<16x96xf32> to vector<16x8xf32>
    %cst_11 = arith.constant dense<0.000000e+00> : vector<8x8xf32>
    %16 = tpu.matmul %14, %14, %cst_11 {dimension_numbers = #tpu.dot_dimension_numbers<[0], [0], [1], [1], [0, 1, 1, 1], [], []>} : vector<16x8xf32>, vector<16x8xf32>, vector<8x8xf32> -> vector<8x8xf32>
    %17 = arith.addf %11, %16 : vector<8x8xf32>
    %cst_12 = arith.constant dense<0.000000e+00> : vector<8x8xf32>
    %18 = tpu.matmul %15, %15, %cst_12 {dimension_numbers = #tpu.dot_dimension_numbers<[0], [0], [1], [1], [0, 1, 1, 1], [], []>} : vector<16x8xf32>, vector<16x8xf32>, vector<8x8xf32> -> vector<8x8xf32>
    %19 = arith.addf %17, %18 : vector<8x8xf32>
    %cst_13 = arith.constant dense<0.000000e+00> : vector<8xf32>
    %20 = vector.multi_reduction <add>, %14, %cst_13 [0] : vector<16x8xf32> to vector<8xf32>
    %21 = vector.shape_cast %20 : vector<8xf32> to vector<1x8xf32>
    %22 = arith.addf %12, %21 : vector<1x8xf32>
    %cst_14 = arith.constant dense<0.000000e+00> : vector<8xf32>
    %23 = vector.multi_reduction <add>, %15, %cst_14 [0] : vector<16x8xf32> to vector<8xf32>
    %24 = vector.shape_cast %23 : vector<8xf32> to vector<1x8xf32>
    %25 = arith.addf %13, %24 : vector<1x8xf32>
    %26 = vector.extract_strided_slice %9 {offsets = [0, 8], sizes = [16, 8], strides = [1, 1]} : vector<16x96xf32> to vector<16x8xf32>
    %27 = vector.extract_strided_slice %9 {offsets = [0, 40], sizes = [16, 8], strides = [1, 1]} : vector<16x96xf32> to vector<16x8xf32>
    %cst_15 = arith.constant dense<0.000000e+00> : vector<8x8xf32>
    %28 = tpu.matmul %26, %26, %cst_15 {dimension_numbers = #tpu.dot_dimension_numbers<[0], [0], [1], [1], [0, 1, 1, 1], [], []>} : vector<16x8xf32>, vector<16x8xf32>, vector<8x8xf32> -> vector<8x8xf32>
    %29 = arith.addf %19, %28 : vector<8x8xf32>
    %cst_16 = arith.constant dense<0.000000e+00> : vector<8x8xf32>
    %30 = tpu.matmul %27, %27, %cst_16 {dimension_numbers = #tpu.dot_dimension_numbers<[0], [0], [1], [1], [0, 1, 1, 1], [], []>} : vector<16x8xf32>, vector<16x8xf32>, vector<8x8xf32> -> vector<8x8xf32>
    %31 = arith.addf %29, %30 : vector<8x8xf32>
    %cst_17 = arith.constant dense<0.000000e+00> : vector<8xf32>
    %32 = vector.multi_reduction <add>, %26, %cst_17 [0] : vector<16x8xf32> to vector<8xf32>
    %33 = vector.shape_cast %32 : vector<8xf32> to vector<1x8xf32>
    %34 = arith.addf %22, %33 : vector<1x8xf32>
    %cst_18 = arith.constant dense<0.000000e+00> : vector<8xf32>
    %35 = vector.multi_reduction <add>, %27, %cst_18 [0] : vector<16x8xf32> to vector<8xf32>
    %36 = vector.shape_cast %35 : vector<8xf32> to vector<1x8xf32>
    %37 = arith.addf %25, %36 : vector<1x8xf32>
    %38 = vector.extract_strided_slice %9 {offsets = [0, 16], sizes = [16, 8], strides = [1, 1]} : vector<16x96xf32> to vector<16x8xf32>
    %39 = vector.extract_strided_slice %9 {offsets = [0, 48], sizes = [16, 8], strides = [1, 1]} : vector<16x96xf32> to vector<16x8xf32>
    %cst_19 = arith.constant dense<0.000000e+00> : vector<8x8xf32>
    %40 = tpu.matmul %38, %38, %cst_19 {dimension_numbers = #tpu.dot_dimension_numbers<[0], [0], [1], [1], [0, 1, 1, 1], [], []>} : vector<16x8xf32>, vector<16x8xf32>, vector<8x8xf32> -> vector<8x8xf32>
    %41 = arith.addf %31, %40 : vector<8x8xf32>
    %cst_20 = arith.constant dense<0.000000e+00> : vector<8x8xf32>
    %42 = tpu.matmul %39, %39, %cst_20 {dimension_numbers = #tpu.dot_dimension_numbers<[0], [0], [1], [1], [0, 1, 1, 1], [], []>} : vector<16x8xf32>, vector<16x8xf32>, vector<8x8xf32> -> vector<8x8xf32>
    %43 = arith.addf %41, %42 : vector<8x8xf32>
    %cst_21 = arith.constant dense<0.000000e+00> : vector<8xf32>
    %44 = vector.multi_reduction <add>, %38, %cst_21 [0] : vector<16x8xf32> to vector<8xf32>
    %45 = vector.shape_cast %44 : vector<8xf32> to vector<1x8xf32>
    %46 = arith.addf %34, %45 : vector<1x8xf32>
    %cst_22 = arith.constant dense<0.000000e+00> : vector<8xf32>
    %47 = vector.multi_reduction <add>, %39, %cst_22 [0] : vector<16x8xf32> to vector<8xf32>
    %48 = vector.shape_cast %47 : vector<8xf32> to vector<1x8xf32>
    %49 = arith.addf %37, %48 : vector<1x8xf32>
    %50 = vector.extract_strided_slice %9 {offsets = [0, 24], sizes = [16, 8], strides = [1, 1]} : vector<16x96xf32> to vector<16x8xf32>
    %51 = vector.extract_strided_slice %9 {offsets = [0, 56], sizes = [16, 8], strides = [1, 1]} : vector<16x96xf32> to vector<16x8xf32>
    %cst_23 = arith.constant dense<0.000000e+00> : vector<8x8xf32>
    %52 = tpu.matmul %50, %50, %cst_23 {dimension_numbers = #tpu.dot_dimension_numbers<[0], [0], [1], [1], [0, 1, 1, 1], [], []>} : vector<16x8xf32>, vector<16x8xf32>, vector<8x8xf32> -> vector<8x8xf32>
    %53 = arith.addf %43, %52 : vector<8x8xf32>
    %cst_24 = arith.constant dense<0.000000e+00> : vector<8x8xf32>
    %54 = tpu.matmul %51, %51, %cst_24 {dimension_numbers = #tpu.dot_dimension_numbers<[0], [0], [1], [1], [0, 1, 1, 1], [], []>} : vector<16x8xf32>, vector<16x8xf32>, vector<8x8xf32> -> vector<8x8xf32>
    %55 = arith.addf %53, %54 : vector<8x8xf32>
    %cst_25 = arith.constant dense<0.000000e+00> : vector<8xf32>
    %56 = vector.multi_reduction <add>, %50, %cst_25 [0] : vector<16x8xf32> to vector<8xf32>
    %57 = vector.shape_cast %56 : vector<8xf32> to vector<1x8xf32>
    %58 = arith.addf %46, %57 : vector<1x8xf32>
    %cst_26 = arith.constant dense<0.000000e+00> : vector<8xf32>
    %59 = vector.multi_reduction <add>, %51, %cst_26 [0] : vector<16x8xf32> to vector<8xf32>
    %60 = vector.shape_cast %59 : vector<8xf32> to vector<1x8xf32>
    %61 = arith.addf %49, %60 : vector<1x8xf32>
    %c0_27 = arith.constant 0 : index
    %c0_28 = arith.constant 0 : index
    %62 = vector.load %arg5[%c0_27, %c0_28] : memref<8x8xf32, #tpu.memory_space<vmem>>, vector<8x8xf32>
    %63 = arith.addf %62, %55 : vector<8x8xf32>
    %c0_29 = arith.constant 0 : index
    %c0_30 = arith.constant 0 : index
    %64 = vector.load %arg5[%c0_29, %c0_30] : memref<8x8xf32, #tpu.memory_space<vmem>>, vector<8x8xf32>
    tpu.vector_store %arg5[%c0_29, %c0_30], %63 {strides = array<i32>} : memref<8x8xf32, #tpu.memory_space<vmem>>, vector<8x8xf32>,
    %c0_31 = arith.constant 0 : index
    %c0_32 = arith.constant 0 : index
    %65 = vector.load %arg6[%c0_31, %c0_32] : memref<1x8xf32, #tpu.memory_space<vmem>>, vector<1x8xf32>
    %66 = arith.addf %65, %58 : vector<1x8xf32>
    %c0_33 = arith.constant 0 : index
    %c0_34 = arith.constant 0 : index
    %67 = vector.load %arg6[%c0_33, %c0_34] : memref<1x8xf32, #tpu.memory_space<vmem>>, vector<1x8xf32>
    tpu.vector_store %arg6[%c0_33, %c0_34], %66 {strides = array<i32>} : memref<1x8xf32, #tpu.memory_space<vmem>>, vector<1x8xf32>,
    %c0_35 = arith.constant 0 : index
    %c0_36 = arith.constant 0 : index
    %68 = vector.load %arg7[%c0_35, %c0_36] : memref<1x8xf32, #tpu.memory_space<vmem>>, vector<1x8xf32>
    %69 = arith.addf %68, %61 : vector<1x8xf32>
    %c0_37 = arith.constant 0 : index
    %c0_38 = arith.constant 0 : index
    %70 = vector.load %arg7[%c0_37, %c0_38] : memref<1x8xf32, #tpu.memory_space<vmem>>, vector<1x8xf32>
    tpu.vector_store %arg7[%c0_37, %c0_38], %69 {strides = array<i32>} : memref<1x8xf32, #tpu.memory_space<vmem>>, vector<1x8xf32>,
    return
  }
  func.func @transform_0(%arg0: i32) -> (i32, i32) {
    %c0_i32 = arith.constant 0 : i32
    %c0_i32_0 = arith.constant 0 : i32
    return %arg0, %c0_i32 : i32, i32
  }
  func.func @transform_1(%arg0: i32) -> (i32, i32) {
    %c0_i32 = arith.constant 0 : i32
    %c0_i32_0 = arith.constant 0 : i32
    %c0_i32_1 = arith.constant 0 : i32
    return %c0_i32, %c0_i32_0 : i32, i32
  }
  func.func @transform_2(%arg0: i32) -> (i32, i32) {
    %c0_i32 = arith.constant 0 : i32
    %c0_i32_0 = arith.constant 0 : i32
    %c0_i32_1 = arith.constant 0 : i32
    return %c0_i32, %c0_i32_0 : i32, i32
  }
  func.func @transform_3(%arg0: i32) -> (i32, i32) {
    %c0_i32 = arith.constant 0 : i32
    %c0_i32_0 = arith.constant 0 : i32
    return %arg0, %c0_i32 : i32, i32
  }
  func.func @transform_4(%arg0: i32) -> (i32, i32) {
    %c0_i32 = arith.constant 0 : i32
    %c0_i32_0 = arith.constant 0 : i32
    %c0_i32_1 = arith.constant 0 : i32
    return %c0_i32, %c0_i32_0 : i32, i32
  }
  func.func @transform_5(%arg0: i32) -> (i32, i32) {
    %c0_i32 = arith.constant 0 : i32
    %c0_i32_0 = arith.constant 0 : i32
    %c0_i32_1 = arith.constant 0 : i32
    return %c0_i32, %c0_i32_0 : i32, i32
  }
  func.func @transform_6(%arg0: i32) -> (i32, i32) {
    %c0_i32 = arith.constant 0 : i32
    %c0_i32_0 = arith.constant 0 : i32
    %c0_i32_1 = arith.constant 0 : i32
    return %c0_i32, %c0_i32_0 : i32, i32
  }
}

module attributes {stable_mosaic.version = 11 : i64} {
  func.func @_post_kernel(%arg0: i32, %arg1: memref<16x32xf32, #tpu.memory_space<vmem>>, %arg2: memref<16x32xf32, #tpu.memory_space<vmem>>, %arg3: memref<32x32xbf16, #tpu.memory_space<vmem>>, %arg4: memref<1x32xf32, #tpu.memory_space<vmem>>, %arg5: memref<32x64xbf16, #tpu.memory_space<vmem>>, %arg6: memref<1x64xf32, #tpu.memory_space<vmem>>, %arg7: memref<64x32xbf16, #tpu.memory_space<vmem>>, %arg8: memref<1x32xf32, #tpu.memory_space<vmem>>, %arg9: memref<1x32xf32, #tpu.memory_space<vmem>>, %arg10: memref<1x32xf32, #tpu.memory_space<vmem>>, %arg11: memref<16x32xf32, #tpu.memory_space<vmem>>) attributes {dimension_semantics = [#tpu.dimension_semantics<parallel>], iteration_bounds = array<i64: 1>, scalar_prefetch = 0 : i64, scratch_operands = 0 : i64, tpu.core_type = #tpu.core_type<tc>, window_params = [{transform_indices = @transform_0, window_bounds = array<i64: 16, 32>}, {transform_indices = @transform_1, window_bounds = array<i64: 16, 32>}, {pipeline_mode = #tpu.pipeline_mode<synchronous>, transform_indices = @transform_2, window_bounds = array<i64: 32, 32>}, {pipeline_mode = #tpu.pipeline_mode<synchronous>, transform_indices = @transform_3, window_bounds = array<i64: 1, 32>}, {pipeline_mode = #tpu.pipeline_mode<synchronous>, transform_indices = @transform_4, window_bounds = array<i64: 32, 64>}, {pipeline_mode = #tpu.pipeline_mode<synchronous>, transform_indices = @transform_5, window_bounds = array<i64: 1, 64>}, {pipeline_mode = #tpu.pipeline_mode<synchronous>, transform_indices = @transform_6, window_bounds = array<i64: 64, 32>}, {pipeline_mode = #tpu.pipeline_mode<synchronous>, transform_indices = @transform_7, window_bounds = array<i64: 1, 32>}, {pipeline_mode = #tpu.pipeline_mode<synchronous>, transform_indices = @transform_8, window_bounds = array<i64: 1, 32>}, {pipeline_mode = #tpu.pipeline_mode<synchronous>, transform_indices = @transform_9, window_bounds = array<i64: 1, 32>}, {transform_indices = @transform_10, window_bounds = array<i64: 16, 32>}]} {
    %c0 = arith.constant 0 : index
    %c0_0 = arith.constant 0 : index
    %0 = vector.load %arg1[%c0, %c0_0] : memref<16x32xf32, #tpu.memory_space<vmem>>, vector<16x32xf32>
    %1 = arith.truncf %0 : vector<16x32xf32> to vector<16x32xbf16>
    %c0_1 = arith.constant 0 : index
    %c0_2 = arith.constant 0 : index
    %2 = vector.load %arg3[%c0_1, %c0_2] : memref<32x32xbf16, #tpu.memory_space<vmem>>, vector<32x32xbf16>
    %cst = arith.constant dense<0.000000e+00> : vector<16x32xf32>
    %3 = tpu.matmul %1, %2, %cst {dimension_numbers = #tpu.dot_dimension_numbers<[1], [0], [0], [1], [0, 0, 1, 1], [], []>} : vector<16x32xbf16>, vector<32x32xbf16>, vector<16x32xf32> -> vector<16x32xf32>
    %c0_3 = arith.constant 0 : index
    %c0_4 = arith.constant 0 : index
    %4 = vector.load %arg4[%c0_3, %c0_4] : memref<1x32xf32, #tpu.memory_space<vmem>>, vector<1x32xf32>
    %5 = vector.broadcast %4 : vector<1x32xf32> to vector<16x32xf32>
    %6 = arith.addf %3, %5 : vector<16x32xf32>
    %c0_5 = arith.constant 0 : index
    %c0_6 = arith.constant 0 : index
    %7 = vector.load %arg2[%c0_5, %c0_6] : memref<16x32xf32, #tpu.memory_space<vmem>>, vector<16x32xf32>
    %8 = arith.addf %6, %7 : vector<16x32xf32>
    %cst_7 = arith.constant dense<0.000000e+00> : vector<16xf32>
    %9 = vector.multi_reduction <add>, %8, %cst_7 [1] : vector<16x32xf32> to vector<16xf32>
    %10 = vector.shape_cast %9 : vector<16xf32> to vector<16x1xf32>
    %cst_8 = arith.constant 3.200000e+01 : f32
    %11 = vector.broadcast %cst_8 : f32 to vector<16x1xf32>
    %12 = arith.divf %10, %11 : vector<16x1xf32>
    %13 = vector.broadcast %12 : vector<16x1xf32> to vector<16x32xf32>
    %14 = arith.subf %8, %13 : vector<16x32xf32>
    %15 = arith.mulf %14, %14 : vector<16x32xf32>
    %cst_9 = arith.constant dense<0.000000e+00> : vector<16xf32>
    %16 = vector.multi_reduction <add>, %15, %cst_9 [1] : vector<16x32xf32> to vector<16xf32>
    %17 = vector.shape_cast %16 : vector<16xf32> to vector<16x1xf32>
    %cst_10 = arith.constant 3.200000e+01 : f32
    %18 = vector.broadcast %cst_10 : f32 to vector<16x1xf32>
    %19 = arith.divf %17, %18 : vector<16x1xf32>
    %20 = vector.broadcast %12 : vector<16x1xf32> to vector<16x32xf32>
    %21 = arith.subf %8, %20 : vector<16x32xf32>
    %cst_11 = arith.constant 9.99999996E-13 : f32
    %22 = vector.broadcast %cst_11 : f32 to vector<16x1xf32>
    %23 = arith.addf %19, %22 : vector<16x1xf32>
    %24 = math.rsqrt %23 : vector<16x1xf32>
    %25 = vector.broadcast %24 : vector<16x1xf32> to vector<16x32xf32>
    %26 = arith.mulf %21, %25 : vector<16x32xf32>
    %c0_12 = arith.constant 0 : index
    %c0_13 = arith.constant 0 : index
    %27 = vector.load %arg9[%c0_12, %c0_13] : memref<1x32xf32, #tpu.memory_space<vmem>>, vector<1x32xf32>
    %28 = vector.broadcast %27 : vector<1x32xf32> to vector<16x32xf32>
    %29 = arith.mulf %26, %28 : vector<16x32xf32>
    %c0_14 = arith.constant 0 : index
    %c0_15 = arith.constant 0 : index
    %30 = vector.load %arg10[%c0_14, %c0_15] : memref<1x32xf32, #tpu.memory_space<vmem>>, vector<1x32xf32>
    %31 = vector.broadcast %30 : vector<1x32xf32> to vector<16x32xf32>
    %32 = arith.addf %29, %31 : vector<16x32xf32>
    %33 = arith.truncf %32 : vector<16x32xf32> to vector<16x32xbf16>
    %c0_16 = arith.constant 0 : index
    %c0_17 = arith.constant 0 : index
    %34 = vector.load %arg5[%c0_16, %c0_17] : memref<32x64xbf16, #tpu.memory_space<vmem>>, vector<32x64xbf16>
    %cst_18 = arith.constant dense<0.000000e+00> : vector<16x64xf32>
    %35 = tpu.matmul %33, %34, %cst_18 {dimension_numbers = #tpu.dot_dimension_numbers<[1], [0], [0], [1], [0, 0, 1, 1], [], []>} : vector<16x32xbf16>, vector<32x64xbf16>, vector<16x64xf32> -> vector<16x64xf32>
    %c0_19 = arith.constant 0 : index
    %c0_20 = arith.constant 0 : index
    %36 = vector.load %arg6[%c0_19, %c0_20] : memref<1x64xf32, #tpu.memory_space<vmem>>, vector<1x64xf32>
    %37 = vector.broadcast %36 : vector<1x64xf32> to vector<16x64xf32>
    %38 = arith.addf %35, %37 : vector<16x64xf32>
    %39 = arith.truncf %38 : vector<16x64xf32> to vector<16x64xbf16>
    %c0_21 = arith.constant 0 : index
    %c0_22 = arith.constant 0 : index
    %40 = vector.load %arg7[%c0_21, %c0_22] : memref<64x32xbf16, #tpu.memory_space<vmem>>, vector<64x32xbf16>
    %cst_23 = arith.constant dense<0.000000e+00> : vector<16x32xf32>
    %41 = tpu.matmul %39, %40, %cst_23 {dimension_numbers = #tpu.dot_dimension_numbers<[1], [0], [0], [1], [0, 0, 1, 1], [], []>} : vector<16x64xbf16>, vector<64x32xbf16>, vector<16x32xf32> -> vector<16x32xf32>
    %c0_24 = arith.constant 0 : index
    %c0_25 = arith.constant 0 : index
    %42 = vector.load %arg8[%c0_24, %c0_25] : memref<1x32xf32, #tpu.memory_space<vmem>>, vector<1x32xf32>
    %43 = vector.broadcast %42 : vector<1x32xf32> to vector<16x32xf32>
    %44 = arith.addf %41, %43 : vector<16x32xf32>
    %45 = arith.addf %44, %32 : vector<16x32xf32>
    %cst_26 = arith.constant dense<0.000000e+00> : vector<16xf32>
    %46 = vector.multi_reduction <add>, %45, %cst_26 [1] : vector<16x32xf32> to vector<16xf32>
    %47 = vector.shape_cast %46 : vector<16xf32> to vector<16x1xf32>
    %cst_27 = arith.constant 3.200000e+01 : f32
    %48 = vector.broadcast %cst_27 : f32 to vector<16x1xf32>
    %49 = arith.divf %47, %48 : vector<16x1xf32>
    %50 = vector.broadcast %49 : vector<16x1xf32> to vector<16x32xf32>
    %51 = arith.subf %45, %50 : vector<16x32xf32>
    %52 = arith.mulf %51, %51 : vector<16x32xf32>
    %cst_28 = arith.constant dense<0.000000e+00> : vector<16xf32>
    %53 = vector.multi_reduction <add>, %52, %cst_28 [1] : vector<16x32xf32> to vector<16xf32>
    %54 = vector.shape_cast %53 : vector<16xf32> to vector<16x1xf32>
    %cst_29 = arith.constant 3.200000e+01 : f32
    %55 = vector.broadcast %cst_29 : f32 to vector<16x1xf32>
    %56 = arith.divf %54, %55 : vector<16x1xf32>
    %57 = vector.broadcast %49 : vector<16x1xf32> to vector<16x32xf32>
    %58 = arith.subf %45, %57 : vector<16x32xf32>
    %cst_30 = arith.constant 9.99999996E-13 : f32
    %59 = vector.broadcast %cst_30 : f32 to vector<16x1xf32>
    %60 = arith.addf %56, %59 : vector<16x1xf32>
    %61 = math.rsqrt %60 : vector<16x1xf32>
    %62 = vector.broadcast %61 : vector<16x1xf32> to vector<16x32xf32>
    %63 = arith.mulf %58, %62 : vector<16x32xf32>
    %c0_31 = arith.constant 0 : index
    %c0_32 = arith.constant 0 : index
    %64 = vector.load %arg9[%c0_31, %c0_32] : memref<1x32xf32, #tpu.memory_space<vmem>>, vector<1x32xf32>
    %65 = vector.broadcast %64 : vector<1x32xf32> to vector<16x32xf32>
    %66 = arith.mulf %63, %65 : vector<16x32xf32>
    %c0_33 = arith.constant 0 : index
    %c0_34 = arith.constant 0 : index
    %67 = vector.load %arg10[%c0_33, %c0_34] : memref<1x32xf32, #tpu.memory_space<vmem>>, vector<1x32xf32>
    %68 = vector.broadcast %67 : vector<1x32xf32> to vector<16x32xf32>
    %69 = arith.addf %66, %68 : vector<16x32xf32>
    %c0_35 = arith.constant 0 : index
    %c0_36 = arith.constant 0 : index
    %70 = vector.load %arg11[%c0_35, %c0_36] : memref<16x32xf32, #tpu.memory_space<vmem>>, vector<16x32xf32>
    tpu.vector_store %arg11[%c0_35, %c0_36], %69 {strides = array<i32>} : memref<16x32xf32, #tpu.memory_space<vmem>>, vector<16x32xf32>,
    return
  }
  func.func @transform_0(%arg0: i32) -> (i32, i32) {
    %c0_i32 = arith.constant 0 : i32
    %c0_i32_0 = arith.constant 0 : i32
    return %arg0, %c0_i32 : i32, i32
  }
  func.func @transform_1(%arg0: i32) -> (i32, i32) {
    %c0_i32 = arith.constant 0 : i32
    %c0_i32_0 = arith.constant 0 : i32
    return %arg0, %c0_i32 : i32, i32
  }
  func.func @transform_2(%arg0: i32) -> (i32, i32) {
    %c0_i32 = arith.constant 0 : i32
    %c0_i32_0 = arith.constant 0 : i32
    %c0_i32_1 = arith.constant 0 : i32
    return %c0_i32, %c0_i32_0 : i32, i32
  }
  func.func @transform_3(%arg0: i32) -> (i32, i32) {
    %c0_i32 = arith.constant 0 : i32
    %c0_i32_0 = arith.constant 0 : i32
    %c0_i32_1 = arith.constant 0 : i32
    return %c0_i32, %c0_i32_0 : i32, i32
  }
  func.func @transform_4(%arg0: i32) -> (i32, i32) {
    %c0_i32 = arith.constant 0 : i32
    %c0_i32_0 = arith.constant 0 : i32
    %c0_i32_1 = arith.constant 0 : i32
    return %c0_i32, %c0_i32_0 : i32, i32
  }
  func.func @transform_5(%arg0: i32) -> (i32, i32) {
    %c0_i32 = arith.constant 0 : i32
    %c0_i32_0 = arith.constant 0 : i32
    %c0_i32_1 = arith.constant 0 : i32
    return %c0_i32, %c0_i32_0 : i32, i32
  }
  func.func @transform_6(%arg0: i32) -> (i32, i32) {
    %c0_i32 = arith.constant 0 : i32
    %c0_i32_0 = arith.constant 0 : i32
    %c0_i32_1 = arith.constant 0 : i32
    return %c0_i32, %c0_i32_0 : i32, i32
  }
  func.func @transform_7(%arg0: i32) -> (i32, i32) {
    %c0_i32 = arith.constant 0 : i32
    %c0_i32_0 = arith.constant 0 : i32
    %c0_i32_1 = arith.constant 0 : i32
    return %c0_i32, %c0_i32_0 : i32, i32
  }
  func.func @transform_8(%arg0: i32) -> (i32, i32) {
    %c0_i32 = arith.constant 0 : i32
    %c0_i32_0 = arith.constant 0 : i32
    %c0_i32_1 = arith.constant 0 : i32
    return %c0_i32, %c0_i32_0 : i32, i32
  }
  func.func @transform_9(%arg0: i32) -> (i32, i32) {
    %c0_i32 = arith.constant 0 : i32
    %c0_i32_0 = arith.constant 0 : i32
    %c0_i32_1 = arith.constant 0 : i32
    return %c0_i32, %c0_i32_0 : i32, i32
  }
  func.func @transform_10(%arg0: i32) -> (i32, i32) {
    %c0_i32 = arith.constant 0 : i32
    %c0_i32_0 = arith.constant 0 : i32
    return %arg0, %c0_i32 : i32, i32
  }
}

module attributes {stable_mosaic.version = 11 : i64} {
  func.func @_feat_attn_kernel(%arg0: i32, %arg1: i32, %arg2: memref<1x8x96xf32, #tpu.memory_space<vmem>>, %arg3: memref<32x32xf32, #tpu.memory_space<vmem>>, %arg4: memref<1x32xf32, #tpu.memory_space<vmem>>, %arg5: memref<1x4x8x8xf32, #tpu.memory_space<vmem>>) attributes {dimension_semantics = [#tpu.dimension_semantics<parallel>, #tpu.dimension_semantics<parallel>], iteration_bounds = array<i64: 2, 1>, scalar_prefetch = 0 : i64, scratch_operands = 0 : i64, tpu.core_type = #tpu.core_type<tc>, window_params = [{transform_indices = @transform_0, window_bounds = array<i64: 1, 8, 96>}, {pipeline_mode = #tpu.pipeline_mode<synchronous>, transform_indices = @transform_1, window_bounds = array<i64: 32, 32>}, {pipeline_mode = #tpu.pipeline_mode<synchronous>, transform_indices = @transform_2, window_bounds = array<i64: 1, 32>}, {transform_indices = @transform_3, window_bounds = array<i64: 1, 4, 8, 8>}]} {
    %c0 = arith.constant 0 : index
    %c0_0 = arith.constant 0 : index
    %c0_1 = arith.constant 0 : index
    %0 = vector.load %arg2[%c0, %c0_0, %c0_1] : memref<1x8x96xf32, #tpu.memory_space<vmem>>, vector<1x8x96xf32>
    %1 = vector.shape_cast %0 : vector<1x8x96xf32> to vector<8x96xf32>
    %2 = vector.extract_strided_slice %1 {offsets = [0, 0], sizes = [8, 32], strides = [1, 1]} : vector<8x96xf32> to vector<8x32xf32>
    %3 = vector.extract_strided_slice %1 {offsets = [0, 32], sizes = [8, 32], strides = [1, 1]} : vector<8x96xf32> to vector<8x32xf32>
    %c0_2 = arith.constant 0 : index
    %c0_3 = arith.constant 0 : index
    %4 = vector.load %arg3[%c0_2, %c0_3] : memref<32x32xf32, #tpu.memory_space<vmem>>, vector<32x32xf32>
    %c0_4 = arith.constant 0 : index
    %c0_5 = arith.constant 0 : index
    %5 = vector.load %arg4[%c0_4, %c0_5] : memref<1x32xf32, #tpu.memory_space<vmem>>, vector<1x32xf32>
    %cst = arith.constant dense<0.000000e+00> : vector<8x32xf32>
    %6 = tpu.matmul %2, %4, %cst {dimension_numbers = #tpu.dot_dimension_numbers<[1], [0], [0], [1], [0, 0, 1, 1], [], []>} : vector<8x32xf32>, vector<32x32xf32>, vector<8x32xf32> -> vector<8x32xf32>
    %7 = vector.broadcast %5 : vector<1x32xf32> to vector<8x32xf32>
    %8 = arith.addf %6, %7 : vector<8x32xf32>
    %9 = math.exp %8 : vector<8x32xf32>
    %cst_6 = arith.constant dense<0.000000e+00> : vector<8x32xf32>
    %10 = tpu.matmul %3, %4, %cst_6 {dimension_numbers = #tpu.dot_dimension_numbers<[1], [0], [0], [1], [0, 0, 1, 1], [], []>} : vector<8x32xf32>, vector<32x32xf32>, vector<8x32xf32> -> vector<8x32xf32>
    %11 = vector.broadcast %5 : vector<1x32xf32> to vector<8x32xf32>
    %12 = arith.addf %10, %11 : vector<8x32xf32>
    %13 = math.exp %12 : vector<8x32xf32>
    %14 = vector.extract_strided_slice %9 {offsets = [0, 0], sizes = [8, 8], strides = [1, 1]} : vector<8x32xf32> to vector<8x8xf32>
    %15 = vector.extract_strided_slice %13 {offsets = [0, 0], sizes = [8, 8], strides = [1, 1]} : vector<8x32xf32> to vector<8x8xf32>
    %16 = arith.mulf %14, %14 : vector<8x8xf32>
    %cst_7 = arith.constant dense<0.000000e+00> : vector<8xf32>
    %17 = vector.multi_reduction <add>, %16, %cst_7 [1] : vector<8x8xf32> to vector<8xf32>
    %18 = vector.shape_cast %17 : vector<8xf32> to vector<8x1xf32>
    %19 = math.rsqrt %18 : vector<8x1xf32>
    %20 = vector.broadcast %19 : vector<8x1xf32> to vector<8x8xf32>
    %21 = arith.mulf %14, %20 : vector<8x8xf32>
    %22 = arith.mulf %15, %15 : vector<8x8xf32>
    %cst_8 = arith.constant dense<0.000000e+00> : vector<8xf32>
    %23 = vector.multi_reduction <add>, %22, %cst_8 [1] : vector<8x8xf32> to vector<8xf32>
    %24 = vector.shape_cast %23 : vector<8xf32> to vector<8x1xf32>
    %25 = math.rsqrt %24 : vector<8x1xf32>
    %26 = vector.broadcast %25 : vector<8x1xf32> to vector<8x8xf32>
    %27 = arith.mulf %15, %26 : vector<8x8xf32>
    %28 = vector.extract_strided_slice %1 {offsets = [0, 64], sizes = [8, 8], strides = [1, 1]} : vector<8x96xf32> to vector<8x8xf32>
    %29 = vector.extract_strided_slice %9 {offsets = [0, 8], sizes = [8, 8], strides = [1, 1]} : vector<8x32xf32> to vector<8x8xf32>
    %30 = vector.extract_strided_slice %13 {offsets = [0, 8], sizes = [8, 8], strides = [1, 1]} : vector<8x32xf32> to vector<8x8xf32>
    %31 = arith.mulf %29, %29 : vector<8x8xf32>
    %cst_9 = arith.constant dense<0.000000e+00> : vector<8xf32>
    %32 = vector.multi_reduction <add>, %31, %cst_9 [1] : vector<8x8xf32> to vector<8xf32>
    %33 = vector.shape_cast %32 : vector<8xf32> to vector<8x1xf32>
    %34 = math.rsqrt %33 : vector<8x1xf32>
    %35 = vector.broadcast %34 : vector<8x1xf32> to vector<8x8xf32>
    %36 = arith.mulf %29, %35 : vector<8x8xf32>
    %37 = arith.mulf %30, %30 : vector<8x8xf32>
    %cst_10 = arith.constant dense<0.000000e+00> : vector<8xf32>
    %38 = vector.multi_reduction <add>, %37, %cst_10 [1] : vector<8x8xf32> to vector<8xf32>
    %39 = vector.shape_cast %38 : vector<8xf32> to vector<8x1xf32>
    %40 = math.rsqrt %39 : vector<8x1xf32>
    %41 = vector.broadcast %40 : vector<8x1xf32> to vector<8x8xf32>
    %42 = arith.mulf %30, %41 : vector<8x8xf32>
    %43 = vector.extract_strided_slice %1 {offsets = [0, 72], sizes = [8, 8], strides = [1, 1]} : vector<8x96xf32> to vector<8x8xf32>
    %44 = vector.extract_strided_slice %9 {offsets = [0, 16], sizes = [8, 8], strides = [1, 1]} : vector<8x32xf32> to vector<8x8xf32>
    %45 = vector.extract_strided_slice %13 {offsets = [0, 16], sizes = [8, 8], strides = [1, 1]} : vector<8x32xf32> to vector<8x8xf32>
    %46 = arith.mulf %44, %44 : vector<8x8xf32>
    %cst_11 = arith.constant dense<0.000000e+00> : vector<8xf32>
    %47 = vector.multi_reduction <add>, %46, %cst_11 [1] : vector<8x8xf32> to vector<8xf32>
    %48 = vector.shape_cast %47 : vector<8xf32> to vector<8x1xf32>
    %49 = math.rsqrt %48 : vector<8x1xf32>
    %50 = vector.broadcast %49 : vector<8x1xf32> to vector<8x8xf32>
    %51 = arith.mulf %44, %50 : vector<8x8xf32>
    %52 = arith.mulf %45, %45 : vector<8x8xf32>
    %cst_12 = arith.constant dense<0.000000e+00> : vector<8xf32>
    %53 = vector.multi_reduction <add>, %52, %cst_12 [1] : vector<8x8xf32> to vector<8xf32>
    %54 = vector.shape_cast %53 : vector<8xf32> to vector<8x1xf32>
    %55 = math.rsqrt %54 : vector<8x1xf32>
    %56 = vector.broadcast %55 : vector<8x1xf32> to vector<8x8xf32>
    %57 = arith.mulf %45, %56 : vector<8x8xf32>
    %58 = vector.extract_strided_slice %1 {offsets = [0, 80], sizes = [8, 8], strides = [1, 1]} : vector<8x96xf32> to vector<8x8xf32>
    %59 = vector.extract_strided_slice %9 {offsets = [0, 24], sizes = [8, 8], strides = [1, 1]} : vector<8x32xf32> to vector<8x8xf32>
    %60 = vector.extract_strided_slice %13 {offsets = [0, 24], sizes = [8, 8], strides = [1, 1]} : vector<8x32xf32> to vector<8x8xf32>
    %61 = arith.mulf %59, %59 : vector<8x8xf32>
    %cst_13 = arith.constant dense<0.000000e+00> : vector<8xf32>
    %62 = vector.multi_reduction <add>, %61, %cst_13 [1] : vector<8x8xf32> to vector<8xf32>
    %63 = vector.shape_cast %62 : vector<8xf32> to vector<8x1xf32>
    %64 = math.rsqrt %63 : vector<8x1xf32>
    %65 = vector.broadcast %64 : vector<8x1xf32> to vector<8x8xf32>
    %66 = arith.mulf %59, %65 : vector<8x8xf32>
    %67 = arith.mulf %60, %60 : vector<8x8xf32>
    %cst_14 = arith.constant dense<0.000000e+00> : vector<8xf32>
    %68 = vector.multi_reduction <add>, %67, %cst_14 [1] : vector<8x8xf32> to vector<8xf32>
    %69 = vector.shape_cast %68 : vector<8xf32> to vector<8x1xf32>
    %70 = math.rsqrt %69 : vector<8x1xf32>
    %71 = vector.broadcast %70 : vector<8x1xf32> to vector<8x8xf32>
    %72 = arith.mulf %60, %71 : vector<8x8xf32>
    %73 = vector.extract_strided_slice %1 {offsets = [0, 88], sizes = [8, 8], strides = [1, 1]} : vector<8x96xf32> to vector<8x8xf32>
    %74 = arith.mulf %21, %27 : vector<8x8xf32>
    %cst_15 = arith.constant dense<0.000000e+00> : vector<8xf32>
    %75 = vector.multi_reduction <add>, %74, %cst_15 [1] : vector<8x8xf32> to vector<8xf32>
    %76 = vector.shape_cast %75 : vector<8xf32> to vector<8x1xf32>
    %77 = arith.mulf %21, %42 : vector<8x8xf32>
    %cst_16 = arith.constant dense<0.000000e+00> : vector<8xf32>
    %78 = vector.multi_reduction <add>, %77, %cst_16 [1] : vector<8x8xf32> to vector<8xf32>
    %79 = vector.shape_cast %78 : vector<8xf32> to vector<8x1xf32>
    %80 = arith.mulf %21, %57 : vector<8x8xf32>
    %cst_17 = arith.constant dense<0.000000e+00> : vector<8xf32>
    %81 = vector.multi_reduction <add>, %80, %cst_17 [1] : vector<8x8xf32> to vector<8xf32>
    %82 = vector.shape_cast %81 : vector<8xf32> to vector<8x1xf32>
    %83 = arith.mulf %21, %72 : vector<8x8xf32>
    %cst_18 = arith.constant dense<0.000000e+00> : vector<8xf32>
    %84 = vector.multi_reduction <add>, %83, %cst_18 [1] : vector<8x8xf32> to vector<8xf32>
    %85 = vector.shape_cast %84 : vector<8xf32> to vector<8x1xf32>
    %86 = arith.maximumf %76, %79 : vector<8x1xf32>
    %87 = arith.maximumf %86, %82 : vector<8x1xf32>
    %88 = arith.maximumf %87, %85 : vector<8x1xf32>
    %89 = arith.subf %76, %88 : vector<8x1xf32>
    %90 = math.exp %89 : vector<8x1xf32>
    %91 = arith.subf %79, %88 : vector<8x1xf32>
    %92 = math.exp %91 : vector<8x1xf32>
    %93 = arith.subf %82, %88 : vector<8x1xf32>
    %94 = math.exp %93 : vector<8x1xf32>
    %95 = arith.subf %85, %88 : vector<8x1xf32>
    %96 = math.exp %95 : vector<8x1xf32>
    %97 = arith.addf %90, %92 : vector<8x1xf32>
    %98 = arith.addf %97, %94 : vector<8x1xf32>
    %99 = arith.addf %98, %96 : vector<8x1xf32>
    %100 = tpu.reciprocal %99 {approx = true} : vector<8x1xf32> -> vector<8x1xf32>
    %101 = arith.mulf %90, %100 : vector<8x1xf32>
    %102 = vector.broadcast %101 : vector<8x1xf32> to vector<8x8xf32>
    %103 = arith.mulf %102, %28 : vector<8x8xf32>
    %104 = arith.mulf %92, %100 : vector<8x1xf32>
    %105 = vector.broadcast %104 : vector<8x1xf32> to vector<8x8xf32>
    %106 = arith.mulf %105, %43 : vector<8x8xf32>
    %107 = arith.addf %103, %106 : vector<8x8xf32>
    %108 = arith.mulf %94, %100 : vector<8x1xf32>
    %109 = vector.broadcast %108 : vector<8x1xf32> to vector<8x8xf32>
    %110 = arith.mulf %109, %58 : vector<8x8xf32>
    %111 = arith.addf %107, %110 : vector<8x8xf32>
    %112 = arith.mulf %96, %100 : vector<8x1xf32>
    %113 = vector.broadcast %112 : vector<8x1xf32> to vector<8x8xf32>
    %114 = arith.mulf %113, %73 : vector<8x8xf32>
    %115 = arith.addf %111, %114 : vector<8x8xf32>
    %c0_19 = arith.constant 0 : index
    %c0_20 = arith.constant 0 : index
    %c0_21 = arith.constant 0 : index
    %c0_22 = arith.constant 0 : index
    %116 = vector.load %arg5[%c0_19, %c0_20, %c0_21, %c0_22] : memref<1x4x8x8xf32, #tpu.memory_space<vmem>>, vector<1x1x8x8xf32>
    %117 = vector.shape_cast %116 : vector<1x1x8x8xf32> to vector<8x8xf32>
    %118 = vector.shape_cast %115 : vector<8x8xf32> to vector<1x1x8x8xf32>
    tpu.vector_store %arg5[%c0_19, %c0_20, %c0_21, %c0_22], %118 {strides = array<i32>} : memref<1x4x8x8xf32, #tpu.memory_space<vmem>>, vector<1x1x8x8xf32>,
    %119 = arith.mulf %36, %27 : vector<8x8xf32>
    %cst_23 = arith.constant dense<0.000000e+00> : vector<8xf32>
    %120 = vector.multi_reduction <add>, %119, %cst_23 [1] : vector<8x8xf32> to vector<8xf32>
    %121 = vector.shape_cast %120 : vector<8xf32> to vector<8x1xf32>
    %122 = arith.mulf %36, %42 : vector<8x8xf32>
    %cst_24 = arith.constant dense<0.000000e+00> : vector<8xf32>
    %123 = vector.multi_reduction <add>, %122, %cst_24 [1] : vector<8x8xf32> to vector<8xf32>
    %124 = vector.shape_cast %123 : vector<8xf32> to vector<8x1xf32>
    %125 = arith.mulf %36, %57 : vector<8x8xf32>
    %cst_25 = arith.constant dense<0.000000e+00> : vector<8xf32>
    %126 = vector.multi_reduction <add>, %125, %cst_25 [1] : vector<8x8xf32> to vector<8xf32>
    %127 = vector.shape_cast %126 : vector<8xf32> to vector<8x1xf32>
    %128 = arith.mulf %36, %72 : vector<8x8xf32>
    %cst_26 = arith.constant dense<0.000000e+00> : vector<8xf32>
    %129 = vector.multi_reduction <add>, %128, %cst_26 [1] : vector<8x8xf32> to vector<8xf32>
    %130 = vector.shape_cast %129 : vector<8xf32> to vector<8x1xf32>
    %131 = arith.maximumf %121, %124 : vector<8x1xf32>
    %132 = arith.maximumf %131, %127 : vector<8x1xf32>
    %133 = arith.maximumf %132, %130 : vector<8x1xf32>
    %134 = arith.subf %121, %133 : vector<8x1xf32>
    %135 = math.exp %134 : vector<8x1xf32>
    %136 = arith.subf %124, %133 : vector<8x1xf32>
    %137 = math.exp %136 : vector<8x1xf32>
    %138 = arith.subf %127, %133 : vector<8x1xf32>
    %139 = math.exp %138 : vector<8x1xf32>
    %140 = arith.subf %130, %133 : vector<8x1xf32>
    %141 = math.exp %140 : vector<8x1xf32>
    %142 = arith.addf %135, %137 : vector<8x1xf32>
    %143 = arith.addf %142, %139 : vector<8x1xf32>
    %144 = arith.addf %143, %141 : vector<8x1xf32>
    %145 = tpu.reciprocal %144 {approx = true} : vector<8x1xf32> -> vector<8x1xf32>
    %146 = arith.mulf %135, %145 : vector<8x1xf32>
    %147 = vector.broadcast %146 : vector<8x1xf32> to vector<8x8xf32>
    %148 = arith.mulf %147, %28 : vector<8x8xf32>
    %149 = arith.mulf %137, %145 : vector<8x1xf32>
    %150 = vector.broadcast %149 : vector<8x1xf32> to vector<8x8xf32>
    %151 = arith.mulf %150, %43 : vector<8x8xf32>
    %152 = arith.addf %148, %151 : vector<8x8xf32>
    %153 = arith.mulf %139, %145 : vector<8x1xf32>
    %154 = vector.broadcast %153 : vector<8x1xf32> to vector<8x8xf32>
    %155 = arith.mulf %154, %58 : vector<8x8xf32>
    %156 = arith.addf %152, %155 : vector<8x8xf32>
    %157 = arith.mulf %141, %145 : vector<8x1xf32>
    %158 = vector.broadcast %157 : vector<8x1xf32> to vector<8x8xf32>
    %159 = arith.mulf %158, %73 : vector<8x8xf32>
    %160 = arith.addf %156, %159 : vector<8x8xf32>
    %c0_27 = arith.constant 0 : index
    %c1 = arith.constant 1 : index
    %c0_28 = arith.constant 0 : index
    %c0_29 = arith.constant 0 : index
    %161 = vector.load %arg5[%c0_27, %c1, %c0_28, %c0_29] : memref<1x4x8x8xf32, #tpu.memory_space<vmem>>, vector<1x1x8x8xf32>
    %162 = vector.shape_cast %161 : vector<1x1x8x8xf32> to vector<8x8xf32>
    %163 = vector.shape_cast %160 : vector<8x8xf32> to vector<1x1x8x8xf32>
    tpu.vector_store %arg5[%c0_27, %c1, %c0_28, %c0_29], %163 {strides = array<i32>} : memref<1x4x8x8xf32, #tpu.memory_space<vmem>>, vector<1x1x8x8xf32>,
    %164 = arith.mulf %51, %27 : vector<8x8xf32>
    %cst_30 = arith.constant dense<0.000000e+00> : vector<8xf32>
    %165 = vector.multi_reduction <add>, %164, %cst_30 [1] : vector<8x8xf32> to vector<8xf32>
    %166 = vector.shape_cast %165 : vector<8xf32> to vector<8x1xf32>
    %167 = arith.mulf %51, %42 : vector<8x8xf32>
    %cst_31 = arith.constant dense<0.000000e+00> : vector<8xf32>
    %168 = vector.multi_reduction <add>, %167, %cst_31 [1] : vector<8x8xf32> to vector<8xf32>
    %169 = vector.shape_cast %168 : vector<8xf32> to vector<8x1xf32>
    %170 = arith.mulf %51, %57 : vector<8x8xf32>
    %cst_32 = arith.constant dense<0.000000e+00> : vector<8xf32>
    %171 = vector.multi_reduction <add>, %170, %cst_32 [1] : vector<8x8xf32> to vector<8xf32>
    %172 = vector.shape_cast %171 : vector<8xf32> to vector<8x1xf32>
    %173 = arith.mulf %51, %72 : vector<8x8xf32>
    %cst_33 = arith.constant dense<0.000000e+00> : vector<8xf32>
    %174 = vector.multi_reduction <add>, %173, %cst_33 [1] : vector<8x8xf32> to vector<8xf32>
    %175 = vector.shape_cast %174 : vector<8xf32> to vector<8x1xf32>
    %176 = arith.maximumf %166, %169 : vector<8x1xf32>
    %177 = arith.maximumf %176, %172 : vector<8x1xf32>
    %178 = arith.maximumf %177, %175 : vector<8x1xf32>
    %179 = arith.subf %166, %178 : vector<8x1xf32>
    %180 = math.exp %179 : vector<8x1xf32>
    %181 = arith.subf %169, %178 : vector<8x1xf32>
    %182 = math.exp %181 : vector<8x1xf32>
    %183 = arith.subf %172, %178 : vector<8x1xf32>
    %184 = math.exp %183 : vector<8x1xf32>
    %185 = arith.subf %175, %178 : vector<8x1xf32>
    %186 = math.exp %185 : vector<8x1xf32>
    %187 = arith.addf %180, %182 : vector<8x1xf32>
    %188 = arith.addf %187, %184 : vector<8x1xf32>
    %189 = arith.addf %188, %186 : vector<8x1xf32>
    %190 = tpu.reciprocal %189 {approx = true} : vector<8x1xf32> -> vector<8x1xf32>
    %191 = arith.mulf %180, %190 : vector<8x1xf32>
    %192 = vector.broadcast %191 : vector<8x1xf32> to vector<8x8xf32>
    %193 = arith.mulf %192, %28 : vector<8x8xf32>
    %194 = arith.mulf %182, %190 : vector<8x1xf32>
    %195 = vector.broadcast %194 : vector<8x1xf32> to vector<8x8xf32>
    %196 = arith.mulf %195, %43 : vector<8x8xf32>
    %197 = arith.addf %193, %196 : vector<8x8xf32>
    %198 = arith.mulf %184, %190 : vector<8x1xf32>
    %199 = vector.broadcast %198 : vector<8x1xf32> to vector<8x8xf32>
    %200 = arith.mulf %199, %58 : vector<8x8xf32>
    %201 = arith.addf %197, %200 : vector<8x8xf32>
    %202 = arith.mulf %186, %190 : vector<8x1xf32>
    %203 = vector.broadcast %202 : vector<8x1xf32> to vector<8x8xf32>
    %204 = arith.mulf %203, %73 : vector<8x8xf32>
    %205 = arith.addf %201, %204 : vector<8x8xf32>
    %c0_34 = arith.constant 0 : index
    %c2 = arith.constant 2 : index
    %c0_35 = arith.constant 0 : index
    %c0_36 = arith.constant 0 : index
    %206 = vector.load %arg5[%c0_34, %c2, %c0_35, %c0_36] : memref<1x4x8x8xf32, #tpu.memory_space<vmem>>, vector<1x1x8x8xf32>
    %207 = vector.shape_cast %206 : vector<1x1x8x8xf32> to vector<8x8xf32>
    %208 = vector.shape_cast %205 : vector<8x8xf32> to vector<1x1x8x8xf32>
    tpu.vector_store %arg5[%c0_34, %c2, %c0_35, %c0_36], %208 {strides = array<i32>} : memref<1x4x8x8xf32, #tpu.memory_space<vmem>>, vector<1x1x8x8xf32>,
    %209 = arith.mulf %66, %27 : vector<8x8xf32>
    %cst_37 = arith.constant dense<0.000000e+00> : vector<8xf32>
    %210 = vector.multi_reduction <add>, %209, %cst_37 [1] : vector<8x8xf32> to vector<8xf32>
    %211 = vector.shape_cast %210 : vector<8xf32> to vector<8x1xf32>
    %212 = arith.mulf %66, %42 : vector<8x8xf32>
    %cst_38 = arith.constant dense<0.000000e+00> : vector<8xf32>
    %213 = vector.multi_reduction <add>, %212, %cst_38 [1] : vector<8x8xf32> to vector<8xf32>
    %214 = vector.shape_cast %213 : vector<8xf32> to vector<8x1xf32>
    %215 = arith.mulf %66, %57 : vector<8x8xf32>
    %cst_39 = arith.constant dense<0.000000e+00> : vector<8xf32>
    %216 = vector.multi_reduction <add>, %215, %cst_39 [1] : vector<8x8xf32> to vector<8xf32>
    %217 = vector.shape_cast %216 : vector<8xf32> to vector<8x1xf32>
    %218 = arith.mulf %66, %72 : vector<8x8xf32>
    %cst_40 = arith.constant dense<0.000000e+00> : vector<8xf32>
    %219 = vector.multi_reduction <add>, %218, %cst_40 [1] : vector<8x8xf32> to vector<8xf32>
    %220 = vector.shape_cast %219 : vector<8xf32> to vector<8x1xf32>
    %221 = arith.maximumf %211, %214 : vector<8x1xf32>
    %222 = arith.maximumf %221, %217 : vector<8x1xf32>
    %223 = arith.maximumf %222, %220 : vector<8x1xf32>
    %224 = arith.subf %211, %223 : vector<8x1xf32>
    %225 = math.exp %224 : vector<8x1xf32>
    %226 = arith.subf %214, %223 : vector<8x1xf32>
    %227 = math.exp %226 : vector<8x1xf32>
    %228 = arith.subf %217, %223 : vector<8x1xf32>
    %229 = math.exp %228 : vector<8x1xf32>
    %230 = arith.subf %220, %223 : vector<8x1xf32>
    %231 = math.exp %230 : vector<8x1xf32>
    %232 = arith.addf %225, %227 : vector<8x1xf32>
    %233 = arith.addf %232, %229 : vector<8x1xf32>
    %234 = arith.addf %233, %231 : vector<8x1xf32>
    %235 = tpu.reciprocal %234 {approx = true} : vector<8x1xf32> -> vector<8x1xf32>
    %236 = arith.mulf %225, %235 : vector<8x1xf32>
    %237 = vector.broadcast %236 : vector<8x1xf32> to vector<8x8xf32>
    %238 = arith.mulf %237, %28 : vector<8x8xf32>
    %239 = arith.mulf %227, %235 : vector<8x1xf32>
    %240 = vector.broadcast %239 : vector<8x1xf32> to vector<8x8xf32>
    %241 = arith.mulf %240, %43 : vector<8x8xf32>
    %242 = arith.addf %238, %241 : vector<8x8xf32>
    %243 = arith.mulf %229, %235 : vector<8x1xf32>
    %244 = vector.broadcast %243 : vector<8x1xf32> to vector<8x8xf32>
    %245 = arith.mulf %244, %58 : vector<8x8xf32>
    %246 = arith.addf %242, %245 : vector<8x8xf32>
    %247 = arith.mulf %231, %235 : vector<8x1xf32>
    %248 = vector.broadcast %247 : vector<8x1xf32> to vector<8x8xf32>
    %249 = arith.mulf %248, %73 : vector<8x8xf32>
    %250 = arith.addf %246, %249 : vector<8x8xf32>
    %c0_41 = arith.constant 0 : index
    %c3 = arith.constant 3 : index
    %c0_42 = arith.constant 0 : index
    %c0_43 = arith.constant 0 : index
    %251 = vector.load %arg5[%c0_41, %c3, %c0_42, %c0_43] : memref<1x4x8x8xf32, #tpu.memory_space<vmem>>, vector<1x1x8x8xf32>
    %252 = vector.shape_cast %251 : vector<1x1x8x8xf32> to vector<8x8xf32>
    %253 = vector.shape_cast %250 : vector<8x8xf32> to vector<1x1x8x8xf32>
    tpu.vector_store %arg5[%c0_41, %c3, %c0_42, %c0_43], %253 {strides = array<i32>} : memref<1x4x8x8xf32, #tpu.memory_space<vmem>>, vector<1x1x8x8xf32>,
    return
  }
  func.func @transform_0(%arg0: i32, %arg1: i32) -> (i32, i32, i32) {
    %c0_i32 = arith.constant 0 : i32
    %c0_i32_0 = arith.constant 0 : i32
    return %arg0, %arg1, %c0_i32 : i32, i32, i32
  }
  func.func @transform_1(%arg0: i32, %arg1: i32) -> (i32, i32) {
    %c0_i32 = arith.constant 0 : i32
    %c0_i32_0 = arith.constant 0 : i32
    %c0_i32_1 = arith.constant 0 : i32
    return %c0_i32, %c0_i32_0 : i32, i32
  }
  func.func @transform_2(%arg0: i32, %arg1: i32) -> (i32, i32) {
    %c0_i32 = arith.constant 0 : i32
    %c0_i32_0 = arith.constant 0 : i32
    %c0_i32_1 = arith.constant 0 : i32
    return %c0_i32, %c0_i32_0 : i32, i32
  }
  func.func @transform_3(%arg0: i32, %arg1: i32) -> (i32, i32, i32, i32) {
    %c0_i32 = arith.constant 0 : i32
    %c0_i32_0 = arith.constant 0 : i32
    %c0_i32_1 = arith.constant 0 : i32
    return %arg0, %c0_i32, %arg1, %c0_i32_0 : i32, i32, i32, i32
  }
}

</mosaic_0001>

<bundles_post_ra>
// kernel: custom-call.60
= control target key start
LH: loop header
LB: loop body
LE: loop exit
PB: predicated region body
PF: predicated region fallthrough
CT: control target
= control target key end

     0   :  { %v401_v2 = vmov 0.0   ;;  %s424_s13 = smov 0   ;;  %s508_s0 = inlined_call_operand.vmem [shape: f32[16,8], index: 0, kind: input, shape index: {}]   ;;  %s509_s1 = inlined_call_operand.vmem [shape: f32[16,8], index: 1, kind: output, shape index: {0}]   ;;  %s510_s2 = inlined_call_operand.vmem [shape: f32[8], index: 2, kind: output, shape index: {1}]  }
   0x1   :  { %v34_v0 = vld [vmem:[%s508_s0] sm:$0xff]  ;;  %v36_v1 = vld [vmem:[%s508_s0 + $0x8] sm:$0xff]  ;;  %47 = vst [vmem:[#allocation2] sm:$0x1] %v401_v2 }
   0x2   :  { %42 = vst [vmem:[#allocation1] sm:$0xff] %v34_v0  ;;  %46 = vst [vmem:[#allocation1 + $0x8] sm:$0xff] %v36_v1 }
   0x3 LB: > { %v55_v3 = vlaneseq  ;;  %v433_v6 = vstv %s399_s13  ;;  %s92_s0 = scalar_lea.vmem [#allocation1], %s399_s13  ;;  %s128_s14 = smov [#allocation1]  ;;  %s399_s13 = sphi %s424_s13, %s53_s13  }
   0x4   : > { %s168_s15 = scalar_lea.vmem [#allocation4], %s399_s13  ;;  %s184_s16 = smov [#allocation1] }
   0x5   : > { %v430_v5 = vshrl.u32 %v55_v3, 7  ;;  %v459_v54 = vand.u32 127, %v55_v3  ;;  %s185_s17 = smov [#allocation4] }
   0x7   : > { %vm59_vm0 = vcmp.gt.s32.totalorder %v430_v5, %v433_v6  ;;  %v66_v8 = vadd.s32 8, %v430_v5  ;;  %v131_v5 = vmov %v430_v5  ;;  %vm463_vm12 = vcmp.eq.s32.totalorder %v459_v54, %v433_v6 }
   0x8   : > { %v150_v50 = vadd.s32 8, %v131_v5  ;;  %vm135_vm10 = vcmp.gt.s32.totalorder %v131_v5, %v433_v6  ;;  %v188_v5 = vmov %v430_v5 }
   0x9   : > { %v54_v4 = vld [vmem:[#allocation1] sm:$0xff]  ;;  %v63_v7 = vld [vmem:[#allocation1 + $0x8] sm:$0xff]  ;;  %vm68_vm1 = vcmp.gt.s32.totalorder %v66_v8, %v433_v6 }
   0xa   : > { %v60_v9 = vsel %vm59_vm0, %v54_v4, 0.0  ;;  %v71_v11 = vsel %vm68_vm1, %v63_v7, 0.0  ;;  %v93_v20 = vld [vmem:[%s92_s0] ss:$0 sm:$0xff]  ;;  %vm152_vm8 = vcmp.gt.s32.totalorder %v150_v50, %v433_v6  ;;  %vm153_vm9 = vcmp.lt.s32.totalorder %v150_v50, 16  ;;  %v367_v53 = vld [vmem:[%s128_s14 + $0x8] sm:$0xff] }
   0xb   : > { %v61_v10 = vmul.f32 %v60_v9, %v60_v9  ;;  %v72_v12 = vmul.f32 %v71_v11, %v71_v11  ;;  %v94_v21 = vand.u32 2147483647, %v93_v20  ;;  %vm119_vm7 = vcmp.lt.f32.partialorder %v93_v20, 0.0  ;;  %v132_v52 = vld [vmem:[%s128_s14] sm:$0xff]  ;;  %vm154_vm11 = vmand %vm152_vm8, %vm153_vm9  ;;  %v181_v7 = vld [vmem:[#allocation2] ss:$0 sm:$0xff] }
   0xc   : > { %v136_v56 = vsel %vm135_vm10, %v132_v52, 0.0  ;;  %v155_v57 = vsel %vm154_vm11, %v367_v53, 0.0  ;;  %vm221_vm0 = vcmp.gt.s32.totalorder %v459_v54, %v433_v6 }
   0xd   : > { %v73_v13 = vadd.f32 %v72_v12, %v61_v10  ;;  %v95_v26 = vmax.f32 %v94_v21, 0.0  ;;  %v402_v12 = vmov 1.0  }
   0xf   : > { %v74_v14 = vrot.slane %v73_v13, 4 }
  0x11   : > { %v75_v15 = vadd.f32 %v74_v14, %v73_v13  ;;  %v193_v13 = vadd.s32 8, %v188_v5  ;;  %v191_v14 = vld [vmem:[%s184_s16] sm:$0xff]  ;;  %v212_v5 = vmov %v430_v5 }
  0x12   : > { %vm229_vm14 = vcmp.ge.s32.totalorder %v212_v5, %v433_v6 }
  0x13   : > { %v76_v16 = vrot.slane %v75_v15, 2  ;;  %vm199_vm13 = vcmp.lt.s32.totalorder %v193_v13, 16  ;;  %vm230_vm1 = vmand %vm463_vm12, %vm229_vm14 }
  0x15   : > { %v77_v17 = vadd.f32 %v76_v16, %v75_v15  ;;  %v369_v15 = vld [vmem:[%s184_s16 + $0x8] sm:$0xff]  ;;  %s208_s16 = smov %s184_s16 }
  0x16   : > { %s254_s18 = scalar_lea.vmem %s208_s16, %s399_s13  ;;  %s53_s13 = sadd.s32 1, %s399_s13  }
  0x17   : > { %v78_v18 = vrot.slane %v77_v17, 1  ;;  %p50_p0 = scmp.ge.s32.totalorder %s53_s13, 8  }
  0x19   : > { %v439_v19 = vadd.f32 %v78_v18, %v77_v17 }
  0x1b   : > { %383 = vrsqrt.f32 %v439_v19  ;;  %vm82_vm2 = vcmp.eq.f32.partialorder %v439_v19, inf  ;;  %v85_v23 = vand.u32 2147483648, %v439_v19  ;;  %vm84_vm3 = vcmp.eq.f32.partialorder %v439_v19, 0.0 }
  0x28   : > { %v384_v22 = vpop.eup %383 }
  0x29   : > { %v81_v24 = vmul.f32 %v384_v22, %v439_v19 }
  0x2b   : > { %v83_v25 = vsel %vm82_vm2, %v439_v19, %v81_v24 }
  0x2c   : > { %v86_v27 = vsel %vm84_vm3, %v85_v23, %v83_v25 }
  0x2d   : > { %v96_v28 = vand.u32 2147483647, %v86_v27  ;;  %v233_v27 = vadd.s32 8, %v212_v5 }
  0x2f   : > { %v97_v29 = vmax.f32 %v95_v26, %v96_v28  ;;  %vm250_vm15 = vcmp.ge.s32.totalorder %v233_v27, %v433_v6 }
  0x30   : > { %vm251_vm2 = vmand %vm463_vm12, %vm250_vm15 }
  0x31   : > { %385 = vrcp.f32 %v97_v29  ;;  %vm109_vm6 = vcmp.eq.f32.partialorder %v97_v29, 0.0 }
  0x3e   : > { %v386_v30 = vpop.eup %385 }
  0x3f   : > { %v99_v31 = vmul.f32 %v386_v30, %v94_v21  ;;  %v102_v32 = vmul.f32 0.0, %v386_v30  ;;  %v106_v33 = vmul.f32 %v386_v30, %v96_v28 }
  0x41   : > { %v100_v34 = vmul.f32 %v99_v31, %v99_v31  ;;  %v103_v35 = vmul.f32 %v102_v32, %v102_v32  ;;  %v107_v36 = vmul.f32 %v106_v33, %v106_v33  ;;  %v371_v33 = vld [vmem:[%s208_s16 + $0x8] sm:$0xff] }
  0x43   : > { %v104_v37 = vadd.f32 %v103_v35, %v100_v34 }
  0x45   : > { %v108_v38 = vadd.f32 %v107_v36, %v104_v37 }
  0x47   : > { %387 = vrsqrt.f32 %v108_v38  ;;  %vm112_vm4 = vcmp.eq.f32.partialorder %v108_v38, inf  ;;  %v115_v40 = vand.u32 2147483648, %v108_v38  ;;  %vm114_vm5 = vcmp.eq.f32.partialorder %v108_v38, 0.0 }
  0x54   : > { %v388_v39 = vpop.eup %387 }
  0x55   : > { %v111_v41 = vmul.f32 %v388_v39, %v108_v38 }
  0x57   : > { %v113_v42 = vsel %vm112_vm4, %v108_v38, %v111_v41 }
  0x58   : > { %v116_v43 = vsel %vm114_vm5, %v115_v40, %v113_v42 }
  0x59   : > { %v117_v44 = vmul.f32 %v116_v43, %v97_v29  ;;  %v219_v29 = vld [vmem:[%s208_s16] sm:$0xff] }
  0x5b   : > { %v118_v45 = vsel %vm109_vm6, 0.0, %v117_v44 }
  0x5c   : > { %v120_v46 = vxor.u32 2147483648, %v118_v45 }
  0x5e   : > { %v121_v47 = vsel %vm119_vm7, %v118_v45, %v120_v46 }
  0x5f   : > { %v452_v48 = vsel %vm84_vm3, %v93_v20, %v121_v47  ;;  %389 = vrcp.f32 %v121_v47  ;;  %v122_v51 = vsub.f32 %v121_v47, %v93_v20 }
  0x60   : > { %v127_v49 = vsub.f32 %v93_v20, %v452_v48 }
  0x62   : > { %391 = vrcp.f32 %v127_v49 }
  0x6c   : > { %v390_v55 = vpop.eup %389 }
  0x6d   : > { %v124_v58 = vmul.f32 %v390_v55, %v122_v51 }
  0x6f   : > { %v392_v59 = vpop.eup %391  ;;  %v126_v61 = vsel %vm84_vm3, 0.0, %v124_v58 }
  0x70   : > { %v138_v62 = vmul.f32 %v392_v59, %v136_v56  ;;  %v157_v63 = vmul.f32 %v392_v59, %v155_v57  ;;  %v174_v0 = vsel %vm463_vm12, %v126_v61, 0.0 }
  0x71   : > { %175 = vadd.xlane.f32.xlu1 %v174_v0 }
  0x72   : > { %v139_v1 = vsel %vm84_vm3, 0.0, %v138_v62  ;;  %v158_v2 = vsel %vm84_vm3, 0.0, %v157_v63 }
  0x73   : > { %v144_v3 = vsel %vm463_vm12, %v139_v1, 0.0  ;;  %v163_v4 = vsel %vm463_vm12, %v158_v2, 0.0 }
  0x74   : > { %145 = vadd.xlane.f32.xlu0 %v144_v3 }
  0x78   : > { %164 = vadd.xlane.f32.xlu0 %v163_v4 }
  0xfa   : > { %v176_v8 = vpop.xlane.xlu1 %175 }
  0xfb   : > { %v182_v9 = vsel %vm463_vm12, %v176_v8, %v181_v7 }
  0xfc   : > { %183 = vst [vmem:[#allocation2] sm:$0x1] %v182_v9 }
  0xfd   : > { %v146_v10 = vpop.xlane.xlu0 %145 }
  0xfe   : > { %147 = vst [vmem:[#allocation4] sm:$0xff] %v146_v10 }
 0x101   : > { %v165_v11 = vpop.xlane.xlu0 %164 }
 0x102   : > { %167 = vst [vmem:[#allocation4 + $0x8] sm:$0xff] %v165_v11 }
 0x103   : > { %169 = vst [vmem:[%s168_s15] sm:$0x1] %v402_v12  ;;  %v266_v42 = vld [vmem:[#allocation2] sm:$0x1] (%p50_p0) }
 0x104   :  { %269 = vst [vmem:[#allocation3] sm:$0x1] (%p50_p0), %v266_v42 }
 0x10a   : > { %v190_v16 = vld [vmem:[%s185_s17] sm:$0xff]  ;;  %v368_v17 = vld [vmem:[%s185_s17 + $0x8] sm:$0xff]  ;;  %s209_s17 = smov %s185_s17 }
 0x10b   : > { %v192_v18 = vmul.f32 %v191_v14, %v190_v16  ;;  %v198_v19 = vmul.f32 %v369_v15, %v368_v17  ;;  %v217_v31 = vld [vmem:[%s209_s17] sm:$0xff]  ;;  %v370_v32 = vld [vmem:[%s209_s17 + $0x8] sm:$0xff]  ;;  %v325_v45 = vld [vmem:[#allocation3] sm:$0x1] (%p50_p0) }
 0x10c   :  { %326 = vst [vmem:[%s510_s2] sm:$0x1] (%p50_p0), %v325_v45 }
 0x10d   : > { %v200_v20 = vsel %vm199_vm13, %v198_v19, 0.0 }
 0x10e   : > { %v201_v21 = vadd.f32 %v200_v20, %v192_v18 }
 0x110   : > { %v202_v22 = vrot.slane %v201_v21, 4 }
 0x112   : > { %v203_v23 = vadd.f32 %v202_v22, %v201_v21 }
 0x114   : > { %v204_v24 = vrot.slane %v203_v23, 2 }
 0x116   : > { %v205_v25 = vadd.f32 %v204_v24, %v203_v23 }
 0x118   : > { %v206_v26 = vrot.slane %v205_v25, 1 }
 0x11a   : > { %v207_v28 = vadd.f32 %v206_v26, %v205_v25 }
 0x11c   : > { %v213_v30 = vmul.f32 %v207_v28, %v176_v8 }
 0x11e   : > { %v218_v34 = vmul.f32 %v217_v31, %v213_v30  ;;  %v238_v35 = vmul.f32 %v370_v32, %v213_v30 }
 0x120   : > { %v222_v36 = vsub.f32 %v219_v29, %v218_v34  ;;  %v243_v5 = vsub.f32 %v371_v33, %v238_v35 }
 0x122   : > { %v223_v37 = vsel %vm221_vm0, %v222_v36, %v219_v29  ;;  %v244_v38 = vsel %vm221_vm0, %v243_v5, %v371_v33 }
 0x123   : > { %v231_v39 = vsel %vm230_vm1, %v217_v31, %v223_v37  ;;  %v252_v40 = vsel %vm251_vm2, %v370_v32, %v244_v38 }
 0x124   : > { %232 = vst [vmem:[%s208_s16] sm:$0xff] %v231_v39  ;;  %372 = vst [vmem:[%s208_s16 + $0x8] sm:$0xff] %v252_v40 }
 0x129   :  { %52 = sbr.rel (!%p50_p0) target bundleno = 3 (0x3), region = 148 }
 0x12b   : > { %v255_v41 = vld [vmem:[%s254_s18] ss:$0 sm:$0xff] }
 0x12c   : > { %v260_v6 = vsel %vm463_vm12, %v452_v48, %v255_v41 }
 0x12d   : > { %261 = vst [vmem:[%s254_s18] sm:$0x1] %v260_v6 }
 0x134   :  { %v300_v43 = vld [vmem:[#allocation1] sm:$0xff]  ;;  %v302_v44 = vld [vmem:[#allocation1 + $0x8] sm:$0xff] }
 0x135   :  { %301 = vst [vmem:[%s509_s1] sm:$0xff] %v300_v43  ;;  %303 = vst [vmem:[%s509_s1 + $0x8] sm:$0xff] %v302_v44 }

// kernel: custom-call.61
= control target key start
LH: loop header
LB: loop body
LE: loop exit
PB: predicated region body
PF: predicated region fallthrough
CT: control target
= control target key end

     0   :  { %s439_s6 = smov [#allocation0]   ;;  %s481_s0 = inlined_call_operand.vmem [shape: f32[8,8], index: 0, kind: input, shape index: {}]   ;;  %s482_s1 = inlined_call_operand.vmem [shape: f32[8,8], index: 1, kind: output, shape index: {}]  }
   0x1   :  { %s443_s9 = smov %s481_s0  }
   0x2 LB: > { %v49_v0 = vld [vmem:[%s445_s9] sm:$0xff]  ;;  %s51_s9 = scalar_lea.vmem %s445_s9, 8   ;;  %s445_s9 = sphi %s443_s9, %s51_s9   ;;  %s441_s6 = sphi %s439_s6, %s52_s6  }
   0x3   : > { %50 = vst [vmem:[%s441_s6] sm:$0xff] %v49_v0  ;;  %s52_s6 = scalar_lea.vmem %s441_s6, 8   ;;  %p46_p0 = scmp.gt.s32.totalorder %s51_s9, %s481_s0 }
   0x4   :  { %v65_v1 = vlaneseq (%p46_p0)  ;;  %vm79_vm0 = vcmask (%p46_p0), 64512   ;;  %s447_s13 = smov (%p46_p0), %s482_s1   ;;  %s451_s14 = smov (%p46_p0), [#allocation1]  }
   0x5   :  { %48 = sbr.rel (!%p46_p0) target bundleno = 2 (0x2), region = 87 }
   0x6   :  { %v66_v3 = vand.u32 (%p46_p0), 127, %v65_v1  ;;  %v68_v4 = vshrl.u32 (%p46_p0), %v65_v1, 7 }
   0x8   :  { %vm70_vm1 = vcmp.eq.s32.totalorder (%p46_p0), %v66_v3, %v68_v4  ;;  %vm74_vm2 = vcmp.eq.s32.totalorder (%p46_p0), %v66_v3, 0  ;;  %vm83_vm3 = vcmp.eq.s32.totalorder (%p46_p0), %v66_v3, 1  ;;  %vm94_vm4 = vcmp.eq.s32.totalorder (%p46_p0), %v66_v3, 2 }
   0x9   :  { %vm105_vm5 = vcmp.eq.s32.totalorder (%p46_p0), %v66_v3, 3  ;;  %vm116_vm6 = vcmp.eq.s32.totalorder (%p46_p0), %v66_v3, 4  ;;  %vm127_vm7 = vcmp.eq.s32.totalorder (%p46_p0), %v66_v3, 5  ;;  %vm138_vm8 = vcmp.eq.s32.totalorder (%p46_p0), %v66_v3, 6 }
   0xa   :  { %v78_v2 = vld [vmem:[#allocation0 + $0x1] ss:$0 sm:$0xff]  ;;  %v89_v10 = vld [vmem:[#allocation0 + $0x2] ss:$0 sm:$0xff]  ;;  %v100_v15 = vld [vmem:[#allocation0 + $0x3] ss:$0 sm:$0xff] }
   0xb   :  { %v71_v5 = vld [vmem:[#allocation0] sm:$0xff]  ;;  %v80_v6 = vsel %vm79_vm0, %v78_v2, 0.0  ;;  %v91_v11 = vsel %vm79_vm0, %v89_v10, 0.0  ;;  %v102_v16 = vsel %vm79_vm0, %v100_v15, 0.0  ;;  %vm149_vm9 = vcmp.eq.s32.totalorder %v66_v3, 7 }
   0xc   :  { %v75_v7 = vsel %vm74_vm2, %v71_v5, 1.0  ;;  %v111_v20 = vld [vmem:[#allocation0 + $0x4] ss:$0 sm:$0xff]  ;;  %v122_v25 = vld [vmem:[#allocation0 + $0x5] ss:$0 sm:$0xff] }
   0xd   :  { %v76_v8 = vsel %vm70_vm1, %v75_v7, 0.0  ;;  %v113_v21 = vsel %vm79_vm0, %v111_v20, 0.0  ;;  %v124_v26 = vsel %vm79_vm0, %v122_v25, 0.0  ;;  %v133_v30 = vld [vmem:[#allocation0 + $0x6] ss:$0 sm:$0xff] }
   0xe   :  { %v84_v9 = vmul.f32 %v80_v6, %v76_v8  ;;  %v135_v31 = vsel %vm79_vm0, %v133_v30, 0.0  ;;  %v144_v35 = vld [vmem:[#allocation0 + $0x7] ss:$0 sm:$0xff] }
   0xf   :  { %v146_v36 = vsel %vm79_vm0, %v144_v35, 0.0 }
  0x10   :  { %85 = vadd.xlane.f32.xlu0 %v84_v9 }
  0x99   :  { %v86_v12 = vpop.xlane.xlu0 %85 }
  0x9a   :  { %v87_v13 = vsel %vm83_vm3, %v86_v12, %v76_v8 }
  0x9b   :  { %v95_v14 = vmul.f32 %v91_v11, %v87_v13 }
  0x9d   :  { %96 = vadd.xlane.f32.xlu0 %v95_v14 }
 0x126   :  { %v97_v17 = vpop.xlane.xlu0 %96 }
 0x127   :  { %v98_v18 = vsel %vm94_vm4, %v97_v17, %v87_v13 }
 0x128   :  { %v106_v19 = vmul.f32 %v102_v16, %v98_v18 }
 0x12a   :  { %107 = vadd.xlane.f32.xlu1 %v106_v19 }
 0x1b3   :  { %v108_v22 = vpop.xlane.xlu1 %107 }
 0x1b4   :  { %v109_v23 = vsel %vm105_vm5, %v108_v22, %v98_v18 }
 0x1b5   :  { %v117_v24 = vmul.f32 %v113_v21, %v109_v23 }
 0x1b7   :  { %118 = vadd.xlane.f32.xlu1 %v117_v24 }
 0x240   :  { %v119_v27 = vpop.xlane.xlu1 %118 }
 0x241   :  { %v120_v28 = vsel %vm116_vm6, %v119_v27, %v109_v23 }
 0x242   :  { %v128_v29 = vmul.f32 %v124_v26, %v120_v28 }
 0x244   :  { %129 = vadd.xlane.f32.xlu0 %v128_v29 }
 0x2cd   :  { %v130_v32 = vpop.xlane.xlu0 %129 }
 0x2ce   :  { %v131_v33 = vsel %vm127_vm7, %v130_v32, %v120_v28 }
 0x2cf   :  { %v139_v34 = vmul.f32 %v135_v31, %v131_v33 }
 0x2d1   :  { %140 = vadd.xlane.f32.xlu1 %v139_v34 }
 0x35a   :  { %v141_v37 = vpop.xlane.xlu1 %140 }
 0x35b   :  { %v142_v38 = vsel %vm138_vm8, %v141_v37, %v131_v33 }
 0x35c   :  { %v150_v39 = vmul.f32 %v146_v36, %v142_v38 }
 0x35e   :  { %151 = vadd.xlane.f32.xlu0 %v150_v39 }
 0x3e7   :  { %v152_v40 = vpop.xlane.xlu0 %151 }
 0x3e8   :  { %v153_v41 = vsel %vm149_vm9, %v152_v40, %v142_v38  }
 0x3e9   :  { %154 = vst [vmem:[#allocation1] sm:$0xff] %v153_v41 }
 0x3ea LB:  { %s453_s14 = sphi %s451_s14, %s204_s14   ;;  %s449_s13 = sphi %s447_s13, %s205_s13  }
 0x3f0   : > { %v202_v42 = vld [vmem:[%s453_s14] sm:$0xff]  ;;  %s204_s14 = scalar_lea.vmem %s453_s14, 8  }
 0x3f1   : > { %203 = vst [vmem:[%s449_s13] sm:$0xff] %v202_v42  ;;  %s205_s13 = scalar_lea.vmem %s449_s13, 8   ;;  %p199_p1 = scmp.gt.s32.totalorder %s204_s14, [#allocation1] }
 0x3f3   :  { %201 = sbr.rel (!%p199_p1) target bundleno = 1002 (0x3ea), region = 109 }

// kernel: custom-call.58
= control target key start
LH: loop header
LB: loop body
LE: loop exit
PB: predicated region body
PF: predicated region fallthrough
CT: control target
= control target key end

     0   :  { %v266_v0 = vmov 0.0   ;;  %vm36_vm0 = vcmask 7168   ;;  %vm54_vm1 = vcmask 15368   ;;  %vm71_vm2 = vcmask 1047553   ;;  %s294_s0 = inlined_call_operand.vmem [shape: f32[8,8], index: 0, kind: input, shape index: {}]   ;;  %s295_s1 = inlined_call_operand.vmem [shape: f32[8,8], index: 1, kind: output, shape index: {}]  }
   0x1   :  { %35 = vst [vmem:[#allocation1] sm:$0xff] %v266_v0  ;;  %v280_v4 = vld [vmem:[%s294_s0] sm:$0xff]  ;;  %vm72_vm3 = vmand %vm54_vm1, %vm71_vm2  ;;  %vm76_vm4 = vcmask 23568   ;;  %vm93_vm5 = vcmask 1047554   ;;  %vm98_vm7 = vcmask 31768   ;;  %vm115_vm8 = vcmask 1047555  }
   0x2   :  { %31 = vst [vmem:[#allocation0] sm:$0xff] %v280_v4  ;;  %vm94_vm6 = vmand %vm76_vm4, %vm93_vm5  ;;  %vm120_vm10 = vcmask 39968   ;;  %vm137_vm11 = vcmask 1047556   ;;  %vm142_vm13 = vcmask 48168   ;;  %vm159_vm14 = vcmask 1047557  }
   0x3   :  { %vm116_vm9 = vmand %vm98_vm7, %vm115_vm8  ;;  %vm181_vm1 = vcmask 1047558   ;;  %vm203_vm4 = vcmask 1047559  }
   0x4   :  { %vm138_vm12 = vmand %vm120_vm10, %vm137_vm11 }
   0x5   :  { %vm160_vm15 = vmand %vm142_vm13, %vm159_vm14 }
   0x8   :  { %v37_v1 = vld [vmem:[#allocation1] ss:$0 sm:$0xff] }
   0x9   :  { %v39_v2 = vmul.f32 %v37_v1, %v37_v1  ;;  %v46_v3 = vmul.f32 0.0, %v37_v1  ;;  %v38_v5 = vld [vmem:[#allocation0] ss:$0 sm:$0xff]  ;;  %v58_v16 = vld [vmem:[#allocation0 + $0x1] ss:$0 sm:$0xff] }
   0xa   :  { %v80_v28 = vld [vmem:[#allocation0 + $0x2] ss:$0 sm:$0xff]  ;;  %v102_v40 = vld [vmem:[#allocation0 + $0x3] ss:$0 sm:$0xff]  ;;  %v124_v52 = vld [vmem:[#allocation0 + $0x4] ss:$0 sm:$0xff] }
   0xb   :  { %40 = vadd.xlane.f32.xlu0 %v39_v2  ;;  %v146_v0 = vld [vmem:[#allocation0 + $0x5] ss:$0 sm:$0xff] }
   0xf   :  { %47 = vadd.xlane.f32.xlu0 %v46_v3 }
  0x94   :  { %v41_v6 = vpop.xlane.xlu0 %40 }
  0x95   :  { %v42_v7 = vsub.f32 %v38_v5, %v41_v6 }
  0x97   :  { %250 = vrsqrt.f32 %v42_v7 }
  0x98   :  { %v48_v8 = vpop.xlane.xlu0 %47 }
  0x99   :  { %v49_v9 = vsub.f32 %v280_v4, %v48_v8 }
  0xa4   :  { %v251_v10 = vpop.eup %250 }
  0xa5   :  { %v50_v11 = vmul.f32 %v251_v10, %v49_v9 }
  0xa7   :  { %v51_v12 = vsel %vm36_vm0, %v50_v11, 0.0  ;;  %vm164_vm0 = vcmask 56368  }
  0xa8   :  { %53 = vst [vmem:[#allocation1] sm:$0xff] %v51_v12  ;;  %vm182_vm2 = vmand %vm164_vm0, %vm181_vm1 }
  0xaf   :  { %v56_v13 = vld [vmem:[#allocation1 + $0x1] ss:$0 sm:$0xff] }
  0xb0   :  { %v59_v14 = vmul.f32 %v56_v13, %v56_v13  ;;  %v66_v15 = vmul.f32 %v56_v13, %v51_v12  ;;  %v168_v13 = vld [vmem:[#allocation0 + $0x6] ss:$0 sm:$0xff] }
  0xb2   :  { %60 = vadd.xlane.f32.xlu1 %v59_v14 }
  0xb6   :  { %67 = vadd.xlane.f32.xlu1 %v66_v15 }
 0x13b   :  { %v61_v17 = vpop.xlane.xlu1 %60 }
 0x13c   :  { %v62_v18 = vsub.f32 %v58_v16, %v61_v17 }
 0x13e   :  { %252 = vrsqrt.f32 %v62_v18 }
 0x13f   :  { %v68_v19 = vpop.xlane.xlu1 %67 }
 0x140   :  { %v69_v20 = vsub.f32 %v280_v4, %v68_v19 }
 0x14b   :  { %v253_v21 = vpop.eup %252 }
 0x14c   :  { %v70_v22 = vmul.f32 %v253_v21, %v69_v20 }
 0x14e   :  { %v73_v23 = vsel %vm72_vm3, %v70_v22, 0.0  ;;  %vm186_vm3 = vcmask 64568  }
 0x14f   :  { %v74_v24 = vadd.f32 %v73_v23, %v51_v12  ;;  %vm204_vm5 = vmand %vm186_vm3, %vm203_vm4 }
 0x151   :  { %75 = vst [vmem:[#allocation1] sm:$0xff] %v74_v24 }
 0x158   :  { %v78_v25 = vld [vmem:[#allocation1 + $0x2] ss:$0 sm:$0xff] }
 0x159   :  { %v88_v26 = vmul.f32 %v78_v25, %v74_v24  ;;  %v81_v27 = vmul.f32 %v78_v25, %v78_v25  ;;  %v190_v25 = vld [vmem:[#allocation0 + $0x7] ss:$0 sm:$0xff] }
 0x15b   :  { %89 = vadd.xlane.f32.xlu1 %v88_v26  ;;  %82 = vadd.xlane.f32.xlu0 %v81_v27 }
 0x1e4   :  { %v83_v29 = vpop.xlane.xlu0 %82  ;;  %v90_v31 = vpop.xlane.xlu1 %89 }
 0x1e5   :  { %v84_v30 = vsub.f32 %v80_v28, %v83_v29  ;;  %v91_v32 = vsub.f32 %v280_v4, %v90_v31 }
 0x1e7   :  { %254 = vrsqrt.f32 %v84_v30 }
 0x1f4   :  { %v255_v33 = vpop.eup %254 }
 0x1f5   :  { %v92_v34 = vmul.f32 %v255_v33, %v91_v32 }
 0x1f7   :  { %v95_v35 = vsel %vm94_vm6, %v92_v34, 0.0 }
 0x1f8   :  { %v96_v36 = vadd.f32 %v95_v35, %v74_v24 }
 0x1fa   :  { %97 = vst [vmem:[#allocation1] sm:$0xff] %v96_v36 }
 0x201   :  { %v100_v37 = vld [vmem:[#allocation1 + $0x3] ss:$0 sm:$0xff] }
 0x202   :  { %v110_v38 = vmul.f32 %v100_v37, %v96_v36  ;;  %v103_v39 = vmul.f32 %v100_v37, %v100_v37 }
 0x204   :  { %111 = vadd.xlane.f32.xlu1 %v110_v38  ;;  %104 = vadd.xlane.f32.xlu0 %v103_v39 }
 0x28d   :  { %v105_v41 = vpop.xlane.xlu0 %104  ;;  %v112_v43 = vpop.xlane.xlu1 %111 }
 0x28e   :  { %v106_v42 = vsub.f32 %v102_v40, %v105_v41  ;;  %v113_v44 = vsub.f32 %v280_v4, %v112_v43 }
 0x290   :  { %256 = vrsqrt.f32 %v106_v42 }
 0x29d   :  { %v257_v45 = vpop.eup %256 }
 0x29e   :  { %v114_v46 = vmul.f32 %v257_v45, %v113_v44 }
 0x2a0   :  { %v117_v47 = vsel %vm116_vm9, %v114_v46, 0.0 }
 0x2a1   :  { %v118_v48 = vadd.f32 %v117_v47, %v96_v36 }
 0x2a3   :  { %119 = vst [vmem:[#allocation1] sm:$0xff] %v118_v48 }
 0x2aa   :  { %v122_v49 = vld [vmem:[#allocation1 + $0x4] ss:$0 sm:$0xff] }
 0x2ab   :  { %v132_v50 = vmul.f32 %v122_v49, %v118_v48  ;;  %v125_v51 = vmul.f32 %v122_v49, %v122_v49 }
 0x2ad   :  { %133 = vadd.xlane.f32.xlu1 %v132_v50  ;;  %126 = vadd.xlane.f32.xlu0 %v125_v51 }
 0x336   :  { %v127_v53 = vpop.xlane.xlu0 %126  ;;  %v134_v55 = vpop.xlane.xlu1 %133 }
 0x337   :  { %v128_v54 = vsub.f32 %v124_v52, %v127_v53  ;;  %v135_v56 = vsub.f32 %v280_v4, %v134_v55 }
 0x339   :  { %258 = vrsqrt.f32 %v128_v54 }
 0x346   :  { %v259_v57 = vpop.eup %258 }
 0x347   :  { %v136_v58 = vmul.f32 %v259_v57, %v135_v56 }
 0x349   :  { %v139_v59 = vsel %vm138_vm12, %v136_v58, 0.0 }
 0x34a   :  { %v140_v60 = vadd.f32 %v139_v59, %v118_v48 }
 0x34c   :  { %141 = vst [vmem:[#allocation1] sm:$0xff] %v140_v60 }
 0x353   :  { %v144_v61 = vld [vmem:[#allocation1 + $0x5] ss:$0 sm:$0xff] }
 0x354   :  { %v154_v62 = vmul.f32 %v144_v61, %v140_v60  ;;  %v147_v63 = vmul.f32 %v144_v61, %v144_v61 }
 0x356   :  { %155 = vadd.xlane.f32.xlu1 %v154_v62  ;;  %148 = vadd.xlane.f32.xlu0 %v147_v63 }
 0x3df   :  { %v149_v1 = vpop.xlane.xlu0 %148  ;;  %v156_v3 = vpop.xlane.xlu1 %155 }
 0x3e0   :  { %v150_v2 = vsub.f32 %v146_v0, %v149_v1  ;;  %v157_v5 = vsub.f32 %v280_v4, %v156_v3 }
 0x3e2   :  { %260 = vrsqrt.f32 %v150_v2 }
 0x3ef   :  { %v261_v6 = vpop.eup %260 }
 0x3f0   :  { %v158_v7 = vmul.f32 %v261_v6, %v157_v5 }
 0x3f2   :  { %v161_v8 = vsel %vm160_vm15, %v158_v7, 0.0 }
 0x3f3   :  { %v162_v9 = vadd.f32 %v161_v8, %v140_v60 }
 0x3f5   :  { %163 = vst [vmem:[#allocation1] sm:$0xff] %v162_v9 }
 0x3fc   :  { %v166_v10 = vld [vmem:[#allocation1 + $0x6] ss:$0 sm:$0xff] }
 0x3fd   :  { %v176_v11 = vmul.f32 %v166_v10, %v162_v9  ;;  %v169_v12 = vmul.f32 %v166_v10, %v166_v10 }
 0x3ff   :  { %177 = vadd.xlane.f32.xlu1 %v176_v11  ;;  %170 = vadd.xlane.f32.xlu0 %v169_v12 }
 0x488   :  { %v171_v14 = vpop.xlane.xlu0 %170  ;;  %v178_v16 = vpop.xlane.xlu1 %177 }
 0x489   :  { %v172_v15 = vsub.f32 %v168_v13, %v171_v14  ;;  %v179_v17 = vsub.f32 %v280_v4, %v178_v16 }
 0x48b   :  { %262 = vrsqrt.f32 %v172_v15 }
 0x498   :  { %v263_v18 = vpop.eup %262 }
 0x499   :  { %v180_v19 = vmul.f32 %v263_v18, %v179_v17 }
 0x49b   :  { %v183_v20 = vsel %vm182_vm2, %v180_v19, 0.0 }
 0x49c   :  { %v184_v21 = vadd.f32 %v183_v20, %v162_v9 }
 0x49e   :  { %185 = vst [vmem:[#allocation1] sm:$0xff] %v184_v21 }
 0x4a5   :  { %v188_v22 = vld [vmem:[#allocation1 + $0x7] ss:$0 sm:$0xff] }
 0x4a6   :  { %v198_v23 = vmul.f32 %v188_v22, %v184_v21  ;;  %v191_v24 = vmul.f32 %v188_v22, %v188_v22 }
 0x4a8   :  { %199 = vadd.xlane.f32.xlu1 %v198_v23  ;;  %192 = vadd.xlane.f32.xlu0 %v191_v24 }
 0x531   :  { %v193_v26 = vpop.xlane.xlu0 %192  ;;  %v200_v28 = vpop.xlane.xlu1 %199 }
 0x532   :  { %v194_v27 = vsub.f32 %v190_v25, %v193_v26  ;;  %v201_v29 = vsub.f32 %v280_v4, %v200_v28 }
 0x534   :  { %264 = vrsqrt.f32 %v194_v27 }
 0x541   :  { %v265_v30 = vpop.eup %264 }
 0x542   :  { %v202_v31 = vmul.f32 %v265_v30, %v201_v29 }
 0x544   :  { %v205_v32 = vsel %vm204_vm5, %v202_v31, 0.0 }
 0x545   :  { %v206_v33 = vadd.f32 %v205_v32, %v184_v21 }
 0x547   :  { %207 = vst [vmem:[#allocation1] sm:$0xff] %v206_v33  ;;  %237 = vst [vmem:[%s295_s1] sm:$0xff] %v206_v33 }

// kernel: custom-call.59
= control target key start
LH: loop header
LB: loop body
LE: loop exit
PB: predicated region body
PF: predicated region fallthrough
CT: control target
= control target key end

     0   :  { %v35_v0 = vlaneseq  ;;  %v182_v9 = vmov -1.0   ;;  %s217_s0 = inlined_call_operand.vmem [shape: f32[1,8,8], index: 0, kind: input, shape index: {}]   ;;  %s218_s1 = inlined_call_operand.vmem [shape: f32[1,8,8], index: 1, kind: output, shape index: {}]  }
   0x1   :  { %v30_v1 = vld [vmem:[%s217_s0] sm:$0xff] }
   0x2   :  { %v196_v2 = vand.u32 127, %v35_v0  ;;  %v39_v3 = vshrl.u32 %v35_v0, 7 }
   0x4   :  { %vm37_vm0 = vcmp.lt.s32.totalorder %v196_v2, 8  ;;  %vm41_vm1 = vcmp.eq.s32.totalorder %v39_v3, %v196_v2  ;;  %vm46_vm2 = vcmp.ge.s32.totalorder %v39_v3, %v196_v2  ;;  %vm60_vm4 = vcmp.eq.s32.totalorder %v196_v2, 0 }
   0x5   :  { %v43_v4 = vsel %vm41_vm1, %v30_v1, 0.0  ;;  %vm47_vm3 = vmand %vm46_vm2, %vm37_vm0  ;;  %vm57_vm5 = vcmp.eq.s32.totalorder %v196_v2, %v39_v3  ;;  %v61_v10 = vsel %vm60_vm4, 1.0, %v182_v9  ;;  %vm68_vm6 = vcmp.eq.s32.totalorder %v196_v2, 1 }
   0x6   :  { %v48_v5 = vsel %vm47_vm3, %v30_v1, 0.0  ;;  %44 = vadd.xlane.f32.xlu0 %v43_v4  ;;  %v62_v11 = vsel %vm57_vm5, %v61_v10, 0.0  ;;  %vm78_vm7 = vcmp.eq.s32.totalorder %v196_v2, 2  ;;  %vm88_vm8 = vcmp.eq.s32.totalorder %v196_v2, 3 }
   0x7   :  { %vm98_vm9 = vcmp.eq.s32.totalorder %v196_v2, 4  ;;  %vm108_vm10 = vcmp.eq.s32.totalorder %v196_v2, 5  ;;  %vm118_vm11 = vcmp.eq.s32.totalorder %v196_v2, 6  ;;  %vm128_vm12 = vcmp.eq.s32.totalorder %v196_v2, 7 }
  0x8f   :  { %v201_v6 = vpop.xlane.xlu0 %44 }
  0x90   :  { %180 = vrcp.f32 %v201_v6  ;;  %vm135_vm13 = vweird.f32 %v201_v6 }
  0x9d   :  { %v181_v7 = vpop.eup %180 }
  0x9e   :  { %v50_v8 = vmul.f32 %v181_v7, %v48_v5 }
  0xa0   :  { %51 = vst [vmem:[#allocation2] sm:$0xff] %v50_v8 }
  0xa7   :  { %v64_v12 = vld [vmem:[#allocation2 + $0x1] ss:$0 sm:$0xff]  ;;  %v74_v15 = vld [vmem:[#allocation2 + $0x2] ss:$0 sm:$0xff]  ;;  %v84_v20 = vld [vmem:[#allocation2 + $0x3] ss:$0 sm:$0xff] }
  0xa8   :  { %v65_v13 = vxor.u32 2147483648, %v64_v12  ;;  %v75_v17 = vxor.u32 2147483648, %v74_v15  ;;  %v85_v22 = vxor.u32 2147483648, %v84_v20  ;;  %v94_v25 = vld [vmem:[#allocation2 + $0x4] ss:$0 sm:$0xff] }
  0xa9   :  { %v95_v27 = vxor.u32 2147483648, %v94_v25  ;;  %v104_v30 = vld [vmem:[#allocation2 + $0x5] ss:$0 sm:$0xff]  ;;  %v114_v35 = vld [vmem:[#allocation2 + $0x6] ss:$0 sm:$0xff] }
  0xaa   :  { %v69_v14 = vmul.f32 %v65_v13, %v62_v11  ;;  %v105_v32 = vxor.u32 2147483648, %v104_v30  ;;  %v115_v37 = vxor.u32 2147483648, %v114_v35  ;;  %v124_v40 = vld [vmem:[#allocation2 + $0x7] ss:$0 sm:$0xff] }
  0xab   :  { %v125_v42 = vxor.u32 2147483648, %v124_v40 }
  0xac   :  { %70 = vadd.xlane.f32.xlu0 %v69_v14 }
 0x135   :  { %v71_v16 = vpop.xlane.xlu0 %70 }
 0x136   :  { %v72_v18 = vsel %vm68_vm6, %v71_v16, %v62_v11 }
 0x137   :  { %v79_v19 = vmul.f32 %v75_v17, %v72_v18 }
 0x139   :  { %80 = vadd.xlane.f32.xlu1 %v79_v19 }
 0x1c2   :  { %v81_v21 = vpop.xlane.xlu1 %80 }
 0x1c3   :  { %v82_v23 = vsel %vm78_vm7, %v81_v21, %v72_v18 }
 0x1c4   :  { %v89_v24 = vmul.f32 %v85_v22, %v82_v23 }
 0x1c6   :  { %90 = vadd.xlane.f32.xlu1 %v89_v24 }
 0x24f   :  { %v91_v26 = vpop.xlane.xlu1 %90 }
 0x250   :  { %v92_v28 = vsel %vm88_vm8, %v91_v26, %v82_v23 }
 0x251   :  { %v99_v29 = vmul.f32 %v95_v27, %v92_v28 }
 0x253   :  { %100 = vadd.xlane.f32.xlu0 %v99_v29 }
 0x2dc   :  { %v101_v31 = vpop.xlane.xlu0 %100 }
 0x2dd   :  { %v102_v33 = vsel %vm98_vm9, %v101_v31, %v92_v28 }
 0x2de   :  { %v109_v34 = vmul.f32 %v105_v32, %v102_v33 }
 0x2e0   :  { %110 = vadd.xlane.f32.xlu1 %v109_v34 }
 0x369   :  { %v111_v36 = vpop.xlane.xlu1 %110 }
 0x36a   :  { %v112_v38 = vsel %vm108_vm10, %v111_v36, %v102_v33 }
 0x36b   :  { %v119_v39 = vmul.f32 %v115_v37, %v112_v38 }
 0x36d   :  { %120 = vadd.xlane.f32.xlu0 %v119_v39 }
 0x3f6   :  { %v121_v41 = vpop.xlane.xlu0 %120 }
 0x3f7   :  { %v122_v43 = vsel %vm118_vm11, %v121_v41, %v112_v38 }
 0x3f8   :  { %v129_v44 = vmul.f32 %v125_v42, %v122_v43 }
 0x3fa   :  { %130 = vadd.xlane.f32.xlu1 %v129_v44 }
 0x483   :  { %v131_v45 = vpop.xlane.xlu1 %130 }
 0x484   :  { %v132_v46 = vsel %vm128_vm12, %v131_v45, %v122_v43 }
 0x485   :  { %v134_v47 = vmul.f32 %v181_v7, %v132_v46 }
 0x487   :  { %v136_v48 = vsel %vm135_vm13, %v132_v46, %v134_v47 }
 0x488   :  { %167 = vst [vmem:[%s218_s1] sm:$0xff] %v136_v48 }

// kernel: custom-call.22
= control target key start
LH: loop header
LB: loop body
LE: loop exit
PB: predicated region body
PF: predicated region fallthrough
CT: control target
= control target key end

     0   :  { %v300_v3 = vlaneseq  ;;  %v1769_v5 = vmov 0.0   ;;  %s289_s17 = smov [#allocation22]  ;;  %s292_s18 = smov [#allocation23]  ;;  %s2052_s0 = inlined_call_operand.vmem [shape: f32[4,4], index: 0, kind: input, shape index: {}]   ;;  %s2053_s1 = inlined_call_operand.vmem [shape: f32[4,4], index: 1, kind: input, shape index: {}]   ;;  %s2054_s2 = inlined_call_operand.vmem [shape: f32[4,4], index: 2, kind: input, shape index: {}]   ;;  %s2055_s3 = inlined_call_operand.vmem [shape: f32[4,4], index: 3, kind: input, shape index: {}]   ;;  %s2056_s4 = inlined_call_operand.vmem [shape: f32[4], index: 4, kind: output, shape index: {0}]   ;;  %s2057_s5 = inlined_call_operand.vmem [shape: f32[4], index: 5, kind: output, shape index: {1}]   ;;  %s2058_s6 = inlined_call_operand.vmem [shape: f32[4,4], index: 6, kind: output, shape index: {2}]   ;;  %s2059_s7 = inlined_call_operand.vmem [shape: f32[4,4], index: 7, kind: output, shape index: {3}]   ;;  %s2060_s8 = inlined_call_operand.vmem [shape: f32[4,4], index: 8, kind: output, shape index: {4}]   ;;  %s2061_s9 = inlined_call_operand.vmem [shape: f32[4,4], index: 9, kind: output, shape index: {5}]  }
   0x1   :  { %v72_v0 = vld [vmem:[%s2052_s0] sm:$0xf]  ;;  %295 = vst [vmem:[#allocation12] sm:$0xff] %v1769_v5  ;;  %296 = vst [vmem:[#allocation14] sm:$0xff] %v1769_v5  ;;  %s299_s0 = smov [#allocation12]  ;;  %s1467_s19 = smov [#allocation20] }
   0x2   :  { %v135_v1 = vld [vmem:[%s2053_s1] sm:$0xf]  ;;  %73 = vst [vmem:[#allocation1] sm:$0xf] %v72_v0  ;;  %297 = vst [vmem:[#allocation16] sm:$0xff] %v1769_v5  ;;  %v1834_v6 = vand.u32 127, %v300_v3 }
   0x3   :  { %v198_v2 = vld [vmem:[%s2054_s2] sm:$0xf]  ;;  %136 = vst [vmem:[#allocation3] sm:$0xf] %v135_v1  ;;  %298 = vst [vmem:[#allocation18] sm:$0xff] %v1769_v5  ;;  %v1836_v7 = vshrl.u32 %v300_v3, 7 }
   0x4   :  { %199 = vst [vmem:[#allocation5] sm:$0xf] %v198_v2  ;;  %v261_v4 = vld [vmem:[%s2055_s3] sm:$0xf]  ;;  %v302_v6 = vmov %v1834_v6  ;;  %s312_s1 = smov [#allocation18]  ;;  %s283_s2 = smov [#allocation20] }
   0x5   :  { %262 = vst [vmem:[#allocation7] sm:$0xf] %v261_v4  ;;  %v305_v7 = vmov %v1836_v7  ;;  %v315_v6 = vmov %v1834_v6  ;;  %s286_s3 = smov [#allocation21]  ;;  %vm1471_vm2 = vcmp.lt.s32.totalorder %v1834_v6, 4  ;;  %s1484_s20 = smov [#allocation21] }
   0x6   :  { %v318_v7 = vmov %v1836_v7  ;;  %vm309_vm0 = vcmp.eq.s32.totalorder %v305_v7, %v302_v6  ;;  %s1501_s21 = smov [#allocation22]  ;;  %s1518_s22 = smov [#allocation23] }
   0x7   :  { %vm322_vm1 = vcmp.eq.s32.totalorder %v318_v7, %v315_v6  ;;  %v1463_v6 = vmov %v1834_v6  ;;  %v1466_v7 = vmov %v1836_v7 }
   0x8   :  { %v306_v12 = vld [vmem:[%s299_s0] sm:$0xf]  ;;  %vm1476_vm3 = vcmp.eq.s32.totalorder %v1466_v7, %v1463_v6  ;;  %v1514_v6 = vmov %v1834_v6  ;;  %v1483_v7 = vmov %v1836_v7 }
   0x9   :  { %v266_v8 = vld [vmem:[#allocation1] sm:$0xf]  ;;  %v310_v14 = vsel %vm309_vm0, 1.0, %v306_v12  ;;  %v1480_v6 = vmov %v1834_v6  ;;  %v1517_v7 = vmov %v1836_v7 }
   0xa   :  { %v271_v9 = vld [vmem:[#allocation3] sm:$0xf]  ;;  %267 = vst [vmem:[#allocation0] sm:$0xf] %v266_v8  ;;  %v319_v13 = vld [vmem:[%s312_s1] sm:$0xf]  ;;  %v1497_v6 = vmov %v1834_v6  ;;  %v1500_v7 = vmov %v1836_v7  ;;  %vm1527_vm4 = vcmp.eq.s32.totalorder %v1517_v7, %v1514_v6 }
   0xb   :  { %v276_v10 = vld [vmem:[#allocation5] sm:$0xf]  ;;  %272 = vst [vmem:[#allocation2] sm:$0xf] %v271_v9  ;;  %v323_v15 = vsel %vm322_vm1, 1.0, %v319_v13  ;;  %311 = vst [vmem:[%s299_s0] sm:$0xf] %v310_v14 }
   0xc   :  { %277 = vst [vmem:[#allocation4] sm:$0xf] %v276_v10  ;;  %v281_v11 = vld [vmem:[#allocation7] sm:$0xf]  ;;  %324 = vst [vmem:[%s312_s1] sm:$0xf] %v323_v15 }
   0xd   :  { %282 = vst [vmem:[#allocation6] sm:$0xf] %v281_v11 }
  0x11   :  { %v284_v16 = vld [vmem:[#allocation0] sm:$0xff] }
  0x12   :  { %v287_v17 = vld [vmem:[#allocation2] sm:$0xff]  ;;  %285 = vst [vmem:[%s283_s2] sm:$0xff] %v284_v16 }
  0x13   :  { %v290_v18 = vld [vmem:[#allocation4] sm:$0xff]  ;;  %288 = vst [vmem:[%s286_s3] sm:$0xff] %v287_v17 }
  0x14   :  { %291 = vst [vmem:[%s289_s17] sm:$0xff] %v290_v18  ;;  %v293_v19 = vld [vmem:[#allocation6] sm:$0xff] }
  0x15   :  { %294 = vst [vmem:[%s292_s18] sm:$0xff] %v293_v19 }
  0x19   :  { %v1473_v20 = vld [vmem:[%s1467_s19] sm:$0xf] }
  0x1a   :  { %v1490_v21 = vld [vmem:[%s1484_s20] sm:$0xf]  ;;  %v1474_v22 = vsel %vm1471_vm2, %v1473_v20, 0.0 }
  0x1b   :  { %v1491_v23 = vsel %vm1471_vm2, %v1490_v21, 0.0  ;;  %v1507_v24 = vld [vmem:[%s1501_s21] sm:$0xf]  ;;  %v1475_v26 = vmul.f32 %v1474_v22, %v1474_v22 }
  0x1c   :  { %v1524_v25 = vld [vmem:[%s1518_s22] sm:$0xf]  ;;  %v1492_v27 = vmul.f32 %v1491_v23, %v1491_v23  ;;  %v1508_v28 = vsel %vm1471_vm2, %v1507_v24, 0.0 }
  0x1d   :  { %v1525_v29 = vsel %vm1471_vm2, %v1524_v25, 0.0  ;;  %v1509_v30 = vmul.f32 %v1508_v28, %v1508_v28  ;;  %v1477_v33 = vsel %vm1476_vm3, 0.0, %v1475_v26 }
  0x1e   :  { %v1494_v31 = vadd.f32 %v1492_v27, %v1475_v26  ;;  %v1526_v32 = vmul.f32 %v1525_v29, %v1525_v29  ;;  %v1493_v34 = vadd.f32 %v1492_v27, %v1477_v33 }
  0x20   :  { %v1511_v35 = vadd.f32 %v1509_v30, %v1494_v31  ;;  %v1510_v36 = vadd.f32 %v1509_v30, %v1493_v34  ;;  %v1528_v37 = vsel %vm1527_vm4, 0.0, %v1526_v32 }
  0x22   :  { %v1530_v38 = vadd.f32 %v1526_v32, %v1511_v35  ;;  %v1529_v39 = vadd.f32 %v1528_v37, %v1510_v36 }
  0x24   :  { %1531 = vadd.xlane.f32.xlu0 %v1530_v38 }
  0x28   :  { %1539 = vadd.xlane.f32.xlu0 %v1529_v39 }
  0xad   :  { %v1532_v40 = vpop.xlane.xlu0 %1531 }
  0xae   :  { %v1533_v41 = vrot.slane %v1532_v40, 4 }
  0xb0   :  { %v1534_v42 = vadd.f32 %v1533_v41, %v1532_v40 }
  0xb1   :  { %v1540_v43 = vpop.xlane.xlu0 %1539 }
  0xb2   :  { %v1535_v44 = vrot.slane %v1534_v42, 2  ;;  %v1541_v45 = vrot.slane %v1540_v43, 4 }
  0xb4   :  { %v1542_v46 = vadd.f32 %v1541_v45, %v1540_v43  ;;  %v1536_v47 = vadd.f32 %v1535_v44, %v1534_v42 }
  0xb6   :  { %v1543_v48 = vrot.slane %v1542_v46, 2  ;;  %v1537_v50 = vrot.slane %v1536_v47, 1 }
  0xb8   :  { %v1544_v49 = vadd.f32 %v1543_v48, %v1542_v46  ;;  %v1538_v53 = vadd.f32 %v1537_v50, %v1536_v47 }
  0xba   :  { %v1545_v51 = vrot.slane %v1544_v49, 1 }
  0xbc   :  { %v1546_v52 = vadd.f32 %v1545_v51, %v1544_v49 }
  0xbe   :  { %1718 = vpush %v1546_v52 }
  0xbf   :  { %1720 = vpush %v1538_v53 }
  0xef   :  { %s1719_s23 = spop %1718 }
  0xf0   :  { %s1721_s24 = spop %1720 }
  0xf1   :  { %s1549_s25 = smul.f32 1e-10, %s1721_s24 }
  0xf3   :  { %p1550_p0 = scmp.le.f32.partialorder %s1719_s23, %s1549_s25 }
  0xf4   :  { %s1860_s26 = smov (!%p1550_p0), 0  }
  0xf5   :  { %1553 = sbr.rel (%p1550_p0) target bundleno = 927 (0x39f), region = 440 }
  0xfa LB: > { %s1865_s27 = smov 0   ;;  %s1763_s26 = sphi %s1860_s26, %s2062_s26  }
  0xfb LB: >> { %s429_s28 = smov [#allocation20]  ;;  %v433_v6 = vmov %v1834_v6  ;;  %v436_v7 = vmov %v1836_v7  ;;  %s449_s29 = smov [#allocation21]  ;;  %vm752_vm14 = vcmp.eq.s32.totalorder %v1836_v7, 0  ;;  %vm764_vm15 = vcmp.eq.s32.totalorder %v1836_v7, 3  ;;  %s1767_s27 = sphi %s1865_s27, %s428_s27  }
  0xfc   : >> { %v453_v6 = vmov %v1834_v6  ;;  %v456_v7 = vmov %v1836_v7  ;;  %v437_v54 = vld [vmem:[%s429_s28] sm:$0xf]  ;;  %vm440_vm5 = vcmp.eq.s32.totalorder %v436_v7, %v433_v6  ;;  %s469_s30 = smov [#allocation23]  ;;  %s430_s10 = smov [#allocation24] }
  0xfd   : >> { %vm460_vm6 = vcmp.eq.s32.totalorder %v456_v7, %v453_v6  ;;  %v473_v6 = vmov %v1834_v6  ;;  %v476_v7 = vmov %v1836_v7  ;;  %v441_v55 = vsel %vm440_vm5, %v437_v54, 0.0  ;;  %v457_v56 = vld [vmem:[%s449_s29] sm:$0xf]  ;;  %s450_s11 = smov [#allocation25]  ;;  %s470_s12 = smov [#allocation26] }
  0xfe   : >> { %vm480_vm7 = vcmp.eq.s32.totalorder %v476_v7, %v473_v6  ;;  %v442_v57 = vrot.slane %v441_v55, 4  ;;  %v461_v58 = vsel %vm460_vm6, %v457_v56, 0.0  ;;  %v477_v59 = vld [vmem:[%s469_s30] sm:$0xf]  ;;  %s493_s13 = smov [#allocation25]  ;;  %s491_s14 = smov [#allocation24]  ;;  %v542_v6 = vmov %v1834_v6 }
  0xff   : >> { %v462_v60 = vrot.slane %v461_v58, 4  ;;  %v481_v61 = vsel %vm480_vm7, %v477_v59, 0.0  ;;  %s495_s15 = smov [#allocation26]  ;;  %s530_s16 = smov [#allocation27]  ;;  %v545_v7 = vmov %v1836_v7  ;;  %v557_v6 = vmov %v1834_v6 }
 0x100   : >> { %v443_v62 = vadd.f32 %v442_v57, %v441_v55  ;;  %v482_v63 = vrot.slane %v481_v61, 4  ;;  %s532_s0 = smov [#allocation28]  ;;  %s489_s1 = smov [#allocation29]  ;;  %v560_v7 = vmov %v1836_v7  ;;  %vm547_vm12 = vcmp.eq.s32.totalorder %v545_v7, %v542_v6 }
 0x101   : >> { %v463_v0 = vadd.f32 %v462_v60, %v461_v58  ;;  %s490_s2 = smov [#allocation30]  ;;  %s534_s1 = smov %s489_s1  ;;  %vm562_vm13 = vcmp.eq.s32.totalorder %v560_v7, %v557_v6  ;;  %v655_v6 = vmov %v1834_v6  ;;  %v658_v7 = vmov %v1836_v7 }
 0x102   : >> { %v444_v1 = vrot.slane %v443_v62, 2  ;;  %v483_v2 = vadd.f32 %v482_v63, %v481_v61  ;;  %s536_s2 = smov %s490_s2  ;;  %s538_s3 = smov [#allocation29]  ;;  %v669_v6 = vmov %v1834_v6  ;;  %v672_v7 = vmov %v1836_v7 }
 0x103   : >> { %v464_v3 = vrot.slane %v463_v0, 2  ;;  %s553_s17 = smov [#allocation30]  ;;  %s551_s18 = smov [#allocation31]  ;;  %vm662_vm0 = vcmp.eq.s32.totalorder %v658_v7, %v655_v6  ;;  %v628_v6 = vmov %v1834_v6  ;;  %v631_v7 = vmov %v1836_v7 }
 0x104   : >> { %v445_v4 = vadd.f32 %v444_v1, %v443_v62  ;;  %v484_v5 = vrot.slane %v483_v2, 2  ;;  %s568_s19 = smov [#allocation31]  ;;  %s1880_s20 = smov [#allocation20]  ;;  %v642_v6 = vmov %v1834_v6  ;;  %v645_v7 = vmov %v1836_v7 }
 0x105   : >> { %v465_v8 = vadd.f32 %v464_v3, %v463_v0  ;;  %s566_s21 = smov [#allocation32]  ;;  %s1882_s22 = smov [#allocation21]  ;;  %v576_v53 = vld [vmem:[%s1880_s20] sm:$0xf]  ;;  %vm677_vm1 = vcmp.eq.s32.totalorder %v672_v7, %v669_v6  ;;  %vm636_vm3 = vcmp.eq.s32.totalorder %v631_v7, %v628_v6  ;;  %vm649_vm4 = vcmp.eq.s32.totalorder %v645_v7, %v642_v6 }
 0x106   : >> { %v446_v9 = vrot.slane %v445_v4, 1  ;;  %v485_v10 = vadd.f32 %v484_v5, %v483_v2  ;;  %s1884_s23 = smov [#allocation22]  ;;  %s1886_s24 = smov [#allocation23]  ;;  %v577_v54 = vld [vmem:[%s1882_s22] sm:$0xf]  ;;  %vm691_vm5 = vcmp.eq.s32.totalorder %v1834_v6, 0 }
 0x107   : >> { %v466_v11 = vrot.slane %v465_v8, 1  ;;  %s1888_s25 = smov [#allocation12]  ;;  %s1890_s28 = smov [#allocation14]  ;;  %v578_v55 = vld [vmem:[%s1884_s23] sm:$0xf]  ;;  %vm695_vm6 = vcmp.eq.s32.totalorder %v1834_v6, 1 }
 0x108   : >> { %v447_v12 = vadd.f32 %v446_v9, %v445_v4  ;;  %v486_v13 = vrot.slane %v485_v10, 1  ;;  %s1892_s29 = smov [#allocation16]  ;;  %s792_s30 = smov [#allocation31]  ;;  %v579_v56 = vld [vmem:[%s1886_s24] sm:$0xf]  ;;  %vm708_vm7 = vcmp.eq.s32.totalorder %v1834_v6, 3 }
 0x109   : >> { %v467_v14 = vadd.f32 %v466_v11, %v465_v8  ;;  %v800_v57 = vld [vmem:[%s1888_s25] sm:$0xf]  ;;  %s428_s27 = sadd.s32 1, %s1767_s27  }
 0x10a   : >> { %448 = vst [vmem:[%s430_s10] sm:$0x1] %v447_v12  ;;  %v487_v15 = vadd.f32 %v486_v13, %v485_v10  ;;  %s1896_s10 = smov [#allocation18]  ;;  %v801_v58 = vld [vmem:[%s1890_s28] sm:$0xf]  ;;  %p425_p1 = scmp.ge.s32.totalorder %s428_s27, 7  }
 0x10b   : >> { %468 = vst [vmem:[%s450_s11] sm:$0x1] %v467_v14  ;;  %v802_v59 = vld [vmem:[%s1892_s29] sm:$0xf]  ;;  %s570_s11 = smov [#allocation32]  ;;  %v329_v6 = vmov (%p425_p1), %v1834_v6  ;;  %v332_v7 = vmov (%p425_p1), %v1836_v7 }
 0x10c   : >> { %488 = vst [vmem:[%s470_s12] sm:$0x1] %v487_v15  ;;  %v803_v61 = vld [vmem:[%s1896_s10] sm:$0xf]  ;;  %s794_s12 = smov [#allocation32]  ;;  %v382_v6 = vmov (%p425_p1), %v1834_v6 }
 0x111   : >> { %v492_v18 = vld [vmem:[%s491_s14] sm:$0xff]  ;;  %s598_s14 = smov [#allocation30] }
 0x112   : >> { %v494_v16 = vld [vmem:[%s493_s13] sm:$0xff]  ;;  %v515_v33 = vand.u32 2147483647, %v492_v18  ;;  %s596_s13 = smov [#allocation29] }
 0x113   : >> { %v498_v17 = vmul.f32 2.0, %v494_v16  ;;  %v496_v19 = vld [vmem:[%s495_s15] sm:$0xff]  ;;  %v516_v36 = vand.u32 2147483647, %v494_v16  ;;  %s1912_s15 = smov [#allocation12] }
 0x114   : >> { %v497_v20 = vsub.f32 %v496_v19, %v492_v18  ;;  %v517_v34 = vand.u32 2147483647, %v496_v19 }
 0x115   : >> { %1745 = vrcp.f32 %v498_v17 }
 0x116   : >> { %v518_v35 = vmin.f32 %v515_v33, %v517_v34 }
 0x118   : >> { %v519_v37 = vmul.f32 1.1920929e-08, %v518_v35 }
 0x11a   : >> { %vm520_vm11 = vcmp.le.f32.partialorder %v516_v36, %v519_v37 }
 0x122   : >> { %v1746_v21 = vpop.eup %1745 }
 0x123   : >> { %v500_v22 = vmul.f32 %v1746_v21, %v497_v20 }
 0x125   : >> { %v502_v23 = vmul.f32 %v500_v22, %v500_v22  ;;  %vm501_vm10 = vcmp.ge.f32.partialorder %v500_v22, 0.0 }
 0x127   : >> { %v503_v24 = vadd.f32 1.0, %v502_v23 }
 0x129   : >> { %1747 = vrsqrt.f32 %v503_v24  ;;  %vm506_vm8 = vcmp.eq.f32.partialorder %v503_v24, inf  ;;  %v509_v26 = vand.u32 2147483648, %v503_v24  ;;  %vm508_vm9 = vcmp.eq.f32.partialorder %v503_v24, 0.0 }
 0x136   : >> { %v1748_v25 = vpop.eup %1747 }
 0x137   : >> { %v505_v27 = vmul.f32 %v1748_v25, %v503_v24 }
 0x139   : >> { %v507_v28 = vsel %vm506_vm8, %v503_v24, %v505_v27  ;;  %vm344_vm8 = vcmp.eq.s32.totalorder (%p425_p1), %v332_v7, %v329_v6  ;;  %v385_v7 = vmov (%p425_p1), %v1836_v7  ;;  %v348_v6 = vmov (%p425_p1), %v1834_v6 }
 0x13a   : >> { %v510_v29 = vsel %vm508_vm9, %v509_v26, %v507_v28  ;;  %v351_v7 = vmov (%p425_p1), %v1836_v7  ;;  %v365_v6 = vmov (%p425_p1), %v1834_v6  ;;  %vm397_vm9 = vcmp.eq.s32.totalorder (%p425_p1), %v385_v7, %v382_v6 }
 0x13b   : >> { %v511_v30 = vxor.u32 2147483648, %v510_v29  ;;  %v368_v7 = vmov (%p425_p1), %v1836_v7 }
 0x13d   : >> { %v512_v31 = vsel %vm501_vm10, %v510_v29, %v511_v30 }
 0x13e   : >> { %v513_v32 = vadd.f32 %v512_v31, %v500_v22 }
 0x140   : >> { %1749 = vrcp.f32 %v513_v32 }
 0x14d   : >> { %v1750_v38 = vpop.eup %1749 }
 0x14e   : >> { %v521_v39 = vsel %vm520_vm11, 0.0, %v1750_v38 }
 0x14f   : >> { %v522_v40 = vmul.f32 %v521_v39, %v521_v39  ;;  %v526_v41 = vmul.f32 %v521_v39, %v494_v16 }
 0x151   : >> { %v523_v42 = vadd.f32 1.0, %v522_v40  ;;  %v527_v43 = vsub.f32 %v492_v18, %v526_v41  ;;  %v529_v44 = vadd.f32 %v526_v41, %v496_v19 }
 0x153   : >> { %1751 = vrsqrt.f32 %v523_v42  ;;  %531 = vst [vmem:[%s530_s16] sm:$0xff] %v527_v43  ;;  %533 = vst [vmem:[%s532_s0] sm:$0xff] %v529_v44  ;;  %s1914_s16 = smov [#allocation22]  ;;  %s1916_s0 = smov [#allocation23] }
 0x160   : >> { %v1752_v45 = vpop.eup %1751 }
 0x161   : >> { %535 = vst [vmem:[%s534_s1] sm:$0xff] %v1752_v45  ;;  %v525_v46 = vmul.f32 %v1752_v45, %v521_v39  ;;  %s1918_s1 = smov [#allocation20] }
 0x163   : >> { %537 = vst [vmem:[%s536_s2] sm:$0xff] %v525_v46  ;;  %s1920_s2 = smov [#allocation16] }
 0x168   : >> { %v539_v47 = vld [vmem:[%s538_s3] ss:$0 sm:$0xff]  ;;  %s1922_s3 = smov [#allocation14] }
 0x169   : >> { %v548_v48 = vsel %vm547_vm12, %v539_v47, 0.0  ;;  %v597_v27 = vld [vmem:[%s596_s13] ss:$0 sm:$0xff]  ;;  %s768_s13 = smov [#allocation21] }
 0x16a   : >> { %549 = vadd.xlane.f32.xlu0 %v548_v48  ;;  %v554_v49 = vld [vmem:[%s553_s17] ss:$0 sm:$0xff]  ;;  %s1926_s17 = smov [#allocation18] }
 0x16b   : >> { %v563_v50 = vsel %vm562_vm13, %v554_v49, 0.0  ;;  %v599_v28 = vld [vmem:[%s598_s14] ss:$0 sm:$0xff]  ;;  %s745_s14 = smov [#allocation22] }
 0x16e   : >> { %564 = vadd.xlane.f32.xlu0 %v563_v50 }
 0x1f3   : >> { %v550_v51 = vpop.xlane.xlu0 %549 }
 0x1f4   : >> { %552 = vst [vmem:[%s551_s18] sm:$0xff] %v550_v51  ;;  %s1928_s18 = smov [#allocation21] }
 0x1f7   : >> { %v565_v52 = vpop.xlane.xlu0 %564 }
 0x1f8   : >> { %567 = vst [vmem:[%s566_s21] sm:$0xff] %v565_v52  ;;  %s665_s21 = smov [#allocation23] }
 0x1fb   : >> { %v569_v60 = vld [vmem:[%s568_s19] sm:$0xff]  ;;  %s666_s19 = smov [#allocation28] }
 0x1fc   : >> { %v793_v62 = vld [vmem:[%s792_s30] sm:$0xff]  ;;  %v580_v63 = vmul.f32 %v576_v53, %v569_v60  ;;  %v583_v0 = vmul.f32 %v577_v54, %v569_v60  ;;  %v587_v1 = vmul.f32 %v578_v55, %v569_v60  ;;  %v590_v2 = vmul.f32 %v579_v56, %v569_v60  ;;  %s681_s30 = smov [#allocation21] }
 0x1fd   : >> { %v804_v3 = vmul.f32 %v800_v57, %v793_v62  ;;  %v807_v4 = vmul.f32 %v801_v58, %v793_v62  ;;  %v811_v5 = vmul.f32 %v802_v59, %v793_v62  ;;  %v814_v8 = vmul.f32 %v803_v61, %v793_v62 }
 0x1ff   : >> { %v571_v9 = vld [vmem:[%s570_s11] sm:$0xff]  ;;  %s1973_s11 = smov [#allocation23] }
 0x200   : >> { %v795_v10 = vld [vmem:[%s794_s12] sm:$0xff]  ;;  %v581_v11 = vmul.f32 %v578_v55, %v571_v9  ;;  %v584_v12 = vmul.f32 %v579_v56, %v571_v9  ;;  %v586_v13 = vmul.f32 %v576_v53, %v571_v9  ;;  %v589_v14 = vmul.f32 %v577_v54, %v571_v9  ;;  %s744_s12 = smov [#allocation20] }
 0x201   : >> { %v805_v15 = vmul.f32 %v802_v59, %v795_v10  ;;  %v808_v16 = vmul.f32 %v803_v61, %v795_v10  ;;  %v810_v17 = vmul.f32 %v800_v57, %v795_v10  ;;  %v813_v18 = vmul.f32 %v801_v58, %v795_v10  ;;  %v673_v59 = vld [vmem:[%s666_s19] ss:$0 sm:$0xff] }
 0x202   : >> { %v582_v19 = vsub.f32 %v580_v63, %v581_v11  ;;  %v585_v20 = vsub.f32 %v583_v0, %v584_v12  ;;  %v588_v21 = vadd.f32 %v587_v1, %v586_v13  ;;  %v591_v22 = vadd.f32 %v590_v2, %v589_v14 }
 0x203   : >> { %v806_v23 = vsub.f32 %v804_v3, %v805_v15  ;;  %v809_v24 = vsub.f32 %v807_v4, %v808_v16  ;;  %v812_v25 = vadd.f32 %v811_v5, %v810_v17  ;;  %v815_v26 = vadd.f32 %v814_v8, %v813_v18 }
 0x204   : >> { %593 = vst [vmem:[%s1882_s22] sm:$0xf] %v585_v20  ;;  %595 = vst [vmem:[%s1886_s24] sm:$0xf] %v591_v22  ;;  %s625_s22 = smov [#allocation27]  ;;  %s639_s24 = smov [#allocation21] }
 0x205   : >> { %592 = vst [vmem:[%s1880_s20] sm:$0xf] %v582_v19  ;;  %594 = vst [vmem:[%s1884_s23] sm:$0xf] %v588_v21  ;;  %s652_s20 = smov [#allocation22]  ;;  %s624_s23 = smov [#allocation20]  ;;  %v632_v63 = vld [vmem:[%s625_s22] ss:$0 sm:$0xff] }
 0x206   : >> { %816 = vst [vmem:[%s1888_s25] sm:$0xf] %v806_v23  ;;  %817 = vst [vmem:[%s1890_s28] sm:$0xf] %v809_v24  ;;  %s1970_s25 = smov [#allocation22]  ;;  %s1770_s28 = smov 1  }
 0x207   : >> { %818 = vst [vmem:[%s1892_s29] sm:$0xf] %v812_v25  ;;  %819 = vst [vmem:[%s1896_s10] sm:$0xf] %v815_v26  ;;  %s680_s29 = smov [#allocation20]  ;;  %s1771_s10 = smov 127  }
 0x20b   : >> { %v607_v30 = vld [vmem:[%s1916_s0] sm:$0xf] }
 0x20c   : >> { %v606_v29 = vld [vmem:[%s1914_s16] sm:$0xf]  ;;  %v615_v36 = vmul.f32 %v607_v30, %v599_v28  ;;  %v618_v42 = vmul.f32 %v607_v30, %v597_v27 }
 0x20d   : >> { %v604_v31 = vld [vmem:[%s1918_s1] sm:$0xf]  ;;  %v614_v35 = vmul.f32 %v606_v29, %v597_v27  ;;  %v617_v37 = vmul.f32 %v606_v29, %v599_v28 }
 0x20e   : >> { %v822_v32 = vld [vmem:[%s1912_s15] ss:$0 sm:$0xff]  ;;  %v1693_v34 = vld [vmem:[%s1912_s15 + $0x3] ss:$0 sm:$0xff]  ;;  %v608_v48 = vmul.f32 %v604_v31, %v597_v27  ;;  %v611_v49 = vmul.f32 %v604_v31, %v599_v28 }
 0x20f   : >> { %v1692_v33 = vld [vmem:[%s1912_s15 - $0x1] sm:$0xe]  ;;  %v1697_v45 = vld [vmem:[%s1922_s3 + $0x3] ss:$0 sm:$0xff]  ;;  %v616_v47 = vsub.f32 %v614_v35, %v615_v36  ;;  %v619_v53 = vadd.f32 %v618_v42, %v617_v37 }
 0x210   : >> { %v829_v38 = vsel %vm752_vm14, %v822_v32, %v1692_v33  ;;  %v833_v39 = vld [vmem:[%s1920_s2] ss:$0 sm:$0xff]  ;;  %v1695_v40 = vld [vmem:[%s1920_s2 + $0x1] sm:$0x7] }
 0x211   : >> { %v846_v41 = vld [vmem:[%s1922_s3] ss:$0 sm:$0xff]  ;;  %832 = vst [vmem:[%s1912_s15] sm:$0xf] %v829_v38  ;;  %v841_v43 = vsel %vm764_vm15, %v1693_v34, %v1695_v40  ;;  %v1699_v51 = vld [vmem:[%s1926_s17 + $0x1] sm:$0x7]  ;;  %622 = vst [vmem:[%s1914_s16] sm:$0xf] %v616_v47 }
 0x212   : >> { %v1696_v44 = vld [vmem:[%s1922_s3 - $0x1] sm:$0xe]  ;;  %1694 = vst [vmem:[%s1912_s15 + $0x1] sm:$0x1] %v833_v39  ;;  %843 = vst [vmem:[%s1920_s2] sm:$0xf] %v841_v43  ;;  %v865_v54 = vsel %vm764_vm15, %v1697_v45, %v1699_v51  ;;  %s769_s15 = smov [#allocation23] }
 0x213   : >> { %v857_v46 = vld [vmem:[%s1926_s17] ss:$0 sm:$0xff]  ;;  %v853_v50 = vsel %vm752_vm14, %v846_v41, %v1696_v44  ;;  %623 = vst [vmem:[%s1916_s0] sm:$0xf] %v619_v53  ;;  %s868_s16 = sadd.s32 (%p425_p1), 1, %s1763_s26   ;;  %s333_s0 = smov (%p425_p1), [#allocation20] }
 0x214   : >> { %v605_v52 = vld [vmem:[%s1928_s18] sm:$0xf]  ;;  %856 = vst [vmem:[%s1922_s3] sm:$0xf] %v853_v50  ;;  %867 = vst [vmem:[%s1926_s17] sm:$0xf] %v865_v54  ;;  %s369_s2 = smov (%p425_p1), [#allocation22]  ;;  %p421_p2 = scmp.ge.s32.totalorder (%p425_p1), %s868_s16, 15 }
 0x215   : >> { %v609_v55 = vmul.f32 %v605_v52, %v599_v28  ;;  %v612_v56 = vmul.f32 %v605_v52, %v597_v27  ;;  %1698 = vst [vmem:[%s1922_s3 + $0x1] sm:$0x1] %v857_v46  ;;  %s386_s3 = smov (%p425_p1), [#allocation23]  ;;  %s2062_s26 = smov (%p425_p1), %s868_s16 }
 0x217   : >> { %v610_v57 = vsub.f32 %v608_v48, %v609_v55  ;;  %v613_v58 = vadd.f32 %v612_v56, %v611_v49 }
 0x218   : >> { %v659_v60 = vld [vmem:[%s652_s20] sm:$0xf] }
 0x219   : >> { %620 = vst [vmem:[%s1918_s1] sm:$0xf] %v610_v57  ;;  %621 = vst [vmem:[%s1928_s18] sm:$0xf] %v613_v58  ;;  %v663_v61 = vsel %vm662_vm0, 0.0, %v659_v60  ;;  %s352_s1 = smov (%p425_p1), [#allocation21] }
 0x21a   : >> { %v674_v62 = vld [vmem:[%s665_s21] sm:$0xf]  ;;  %664 = vst [vmem:[%s652_s20] sm:$0xf] %v663_v61 }
 0x21b   : >> { %v678_v0 = vsel %vm677_vm1, %v673_v59, %v674_v62 }
 0x21c   : >> { %679 = vst [vmem:[%s665_s21] sm:$0xf] %v678_v0 }
 0x220   : >> { %v633_v1 = vld [vmem:[%s624_s23] sm:$0xf] }
 0x221   : >> { %v646_v2 = vld [vmem:[%s639_s24] sm:$0xf]  ;;  %v637_v3 = vsel %vm636_vm3, %v632_v63, %v633_v1 }
 0x222   : >> { %v650_v4 = vsel %vm649_vm4, 0.0, %v646_v2  ;;  %638 = vst [vmem:[%s624_s23] sm:$0xf] %v637_v3  ;;  %v718_v5 = vld [vmem:[%s1970_s25] sm:$0xf] }
 0x223   : >> { %651 = vst [vmem:[%s639_s24] sm:$0xf] %v650_v4  ;;  %719 = vrot.lane.b32.xlu0 %v718_v5, %s1770_s28  ;;  %v714_v11 = vld [vmem:[%s1973_s11] sm:$0xf] }
 0x224   : >> { %v735_v12 = vld [vmem:[%s1973_s11] sm:$0xf] }
 0x225   : >> { %v717_v30 = vld [vmem:[%s1970_s25] sm:$0xf] }
 0x229   : >> { %v686_v8 = vld [vmem:[%s680_s29] sm:$0xf] }
 0x22a   : >> { %687 = vrot.lane.b32.xlu1 %v686_v8, %s1770_s28  ;;  %v682_v9 = vld [vmem:[%s681_s30] sm:$0xf] }
 0x22b   : >> { %v703_v10 = vld [vmem:[%s681_s30] sm:$0xf] }
 0x22c   : >> { %v685_v18 = vld [vmem:[%s680_s29] sm:$0xf] }
 0x22e   : >> { %683 = vrot.lane.b32.xlu1 %v682_v9, %s1770_s28 }
 0x232   : >> { %704 = vrot.lane.b32.xlu1 %v703_v10, %s1771_s10 }
 0x236   : >> { %715 = vrot.lane.b32.xlu1 %v714_v11, %s1770_s28 }
 0x23a   : >> { %736 = vrot.lane.b32.xlu1 %v735_v12, %s1771_s10 }
 0x295   : >> { %v720_v20 = vpop.permute.xlu0 %719 }
 0x296   : >> { %v724_v22 = vsel %vm691_vm5, %v718_v5, %v720_v20 }
 0x29c   : >> { %v688_v13 = vpop.permute.xlu1 %687 }
 0x29d   : >> { %v692_v14 = vsel %vm691_vm5, %v686_v8, %v688_v13 }
 0x2a0   : >> { %v684_v15 = vpop.permute.xlu1 %683 }
 0x2a1   : >> { %v696_v16 = vsel %vm695_vm6, %v684_v15, %v692_v14 }
 0x2a2   : >> { %v702_v17 = vsel %vm1471_vm2, %v696_v16, 0.0 }
 0x2a3   : >> { %710 = vst [vmem:[%s680_s29] sm:$0xf] %v702_v17 }
 0x2a4   : >> { %v705_v19 = vpop.permute.xlu1 %704 }
 0x2a5   : >> { %v709_v21 = vsel %vm708_vm7, %v685_v18, %v705_v19 }
 0x2a6   : >> { %711 = vst [vmem:[%s681_s30] sm:$0xf] %v709_v21 }
 0x2a8   : >> { %v716_v23 = vpop.permute.xlu1 %715 }
 0x2a9   : >> { %v728_v24 = vsel %vm695_vm6, %v716_v23, %v724_v22 }
 0x2aa   : >> { %v746_v25 = vld [vmem:[%s744_s12] ss:$0 sm:$0xff]  ;;  %v1685_v27 = vld [vmem:[%s744_s12 + $0x3] ss:$0 sm:$0xff]  ;;  %v734_v29 = vsel %vm1471_vm2, %v728_v24, 0.0 }
 0x2ab   : >> { %v1684_v26 = vld [vmem:[%s744_s12 - $0x1] sm:$0xe]  ;;  %742 = vst [vmem:[%s1970_s25] sm:$0xf] %v734_v29 }
 0x2ac   : >> { %v753_v28 = vsel %vm752_vm14, %v746_v25, %v1684_v26  ;;  %v737_v31 = vpop.permute.xlu1 %736 }
 0x2ad   : >> { %756 = vst [vmem:[%s744_s12] sm:$0xf] %v753_v28  ;;  %v770_v32 = vld [vmem:[%s768_s13] ss:$0 sm:$0xff]  ;;  %v1689_v34 = vld [vmem:[%s768_s13 + $0x3] ss:$0 sm:$0xff]  ;;  %v741_v35 = vsel %vm708_vm7, %v717_v30, %v737_v31 }
 0x2ae   : >> { %v1688_v33 = vld [vmem:[%s768_s13 - $0x1] sm:$0xe]  ;;  %743 = vst [vmem:[%s1973_s11] sm:$0xf] %v741_v35 }
 0x2af   : >> { %v777_v36 = vsel %vm752_vm14, %v770_v32, %v1688_v33 }
 0x2b0   : >> { %780 = vst [vmem:[%s768_s13] sm:$0xf] %v777_v36 }
 0x2b2   : >> { %v757_v37 = vld [vmem:[%s745_s14] ss:$0 sm:$0xff]  ;;  %v1687_v38 = vld [vmem:[%s745_s14 + $0x1] sm:$0x7] }
 0x2b3   : >> { %1686 = vst [vmem:[%s744_s12 + $0x1] sm:$0x1] %v757_v37  ;;  %v765_v39 = vsel %vm764_vm15, %v1685_v27, %v1687_v38 }
 0x2b4   : >> { %767 = vst [vmem:[%s745_s14] sm:$0xf] %v765_v39 }
 0x2b5   : >> { %v781_v40 = vld [vmem:[%s769_s15] ss:$0 sm:$0xff]  ;;  %v1691_v41 = vld [vmem:[%s769_s15 + $0x1] sm:$0x7] }
 0x2b6   : >> { %1690 = vst [vmem:[%s768_s13 + $0x1] sm:$0x1] %v781_v40  ;;  %v789_v42 = vsel %vm764_vm15, %v1689_v34, %v1691_v41 }
 0x2b7   : >> { %791 = vst [vmem:[%s769_s15] sm:$0xf] %v789_v42  ;;  %427 = sbr.rel (!%p425_p1) target bundleno = 251 (0xfb), region = 435 }
 0x2ba   : > { %v339_v43 = vld [vmem:[%s333_s0] sm:$0xf] (%p425_p1) }
 0x2bb   : > { %v340_v45 = vsel (%p425_p1), %vm1471_vm2, %v339_v43, 0.0  ;;  %v375_v47 = vld [vmem:[%s369_s2] sm:$0xf] (%p425_p1) }
 0x2bc   : > { %v341_v49 = vmul.f32 %v340_v45, %v340_v45  ;;  %v376_v51 = vsel %vm1471_vm2, %v375_v47, 0.0 }
 0x2bd   : > { %v358_v44 = vld [vmem:[%s352_s1] sm:$0xf]  ;;  %v377_v53 = vmul.f32 %v376_v51, %v376_v51 }
 0x2be   : > { %v359_v46 = vsel %vm1471_vm2, %v358_v44, 0.0  ;;  %v392_v48 = vld [vmem:[%s386_s3] sm:$0xf]  ;;  %v345_v56 = vsel %vm344_vm8, 0.0, %v341_v49 }
 0x2bf   : > { %v360_v50 = vmul.f32 %v359_v46, %v359_v46  ;;  %v393_v52 = vsel %vm1471_vm2, %v392_v48, 0.0 }
 0x2c0   : > { %v394_v55 = vmul.f32 %v393_v52, %v393_v52 }
 0x2c1   : > { %v362_v54 = vadd.f32 %v360_v50, %v341_v49  ;;  %v361_v57 = vadd.f32 %v360_v50, %v345_v56 }
 0x2c2   : > { %v398_v60 = vsel %vm397_vm9, 0.0, %v394_v55 }
 0x2c3   : > { %v379_v58 = vadd.f32 %v377_v53, %v362_v54  ;;  %v378_v59 = vadd.f32 %v377_v53, %v361_v57 }
 0x2c5   : > { %v400_v61 = vadd.f32 %v394_v55, %v379_v58  ;;  %v399_v62 = vadd.f32 %v398_v60, %v378_v59 }
 0x2c7   : > { %401 = vadd.xlane.f32.xlu0 %v400_v61 }
 0x2cb   : > { %409 = vadd.xlane.f32.xlu0 %v399_v62 }
 0x350   : > { %v402_v63 = vpop.xlane.xlu0 %401 }
 0x351   : > { %v403_v0 = vrot.slane %v402_v63, 4 }
 0x353   : > { %v404_v1 = vadd.f32 %v403_v0, %v402_v63 }
 0x354   : > { %v410_v2 = vpop.xlane.xlu0 %409 }
 0x355   : > { %v405_v3 = vrot.slane %v404_v1, 2  ;;  %v411_v4 = vrot.slane %v410_v2, 4 }
 0x357   : > { %v412_v5 = vadd.f32 %v411_v4, %v410_v2  ;;  %v406_v8 = vadd.f32 %v405_v3, %v404_v1 }
 0x359   : > { %v413_v9 = vrot.slane %v412_v5, 2  ;;  %v407_v11 = vrot.slane %v406_v8, 1 }
 0x35b   : > { %v414_v10 = vadd.f32 %v413_v9, %v412_v5  ;;  %v408_v14 = vadd.f32 %v407_v11, %v406_v8 }
 0x35d   : > { %v415_v12 = vrot.slane %v414_v10, 1 }
 0x35f   : > { %v416_v13 = vadd.f32 %v415_v12, %v414_v10 }
 0x361   : > { %1722 = vpush %v416_v13 }
 0x362   : > { %1724 = vpush %v408_v14 }
 0x392   : > { %s1723_s27 = spop %1722 }
 0x393   : > { %s1725_s17 = spop %1724 }
 0x394   : > { %s419_s18 = smul.f32 1e-10, %s1725_s17 }
 0x396   : > { %p420_p3 = scmp.le.f32.partialorder %s1723_s27, %s419_s18 }
 0x398   : > { %p422_p4 = por %p421_p2, %p420_p3 }
 0x39a   :  { %870 = sbr.rel (!%p422_p4) target bundleno = 250 (0xfa), region = 446 }
 0x39f PF:  { %s871_s19 = smov [#allocation20]  ;;  %v875_v6 = vmov %v1834_v6  ;;  %v878_v7 = vmov %v1836_v7  ;;  %v931_v15 = vld [vmem:[#allocation12] sm:$0xf]  ;;  %v939_v16 = vld [vmem:[#allocation14] sm:$0xf]  ;;  %s891_s20 = smov [#allocation23] }
 0x3a0   :  { %v895_v6 = vmov %v1834_v6  ;;  %v898_v7 = vmov %v1836_v7  ;;  %v879_v17 = vld [vmem:[%s871_s19] sm:$0xf]  ;;  %vm882_vm10 = vcmp.eq.s32.totalorder %v878_v7, %v875_v6  ;;  %934 = vst [vmem:[#allocation13] sm:$0xf] %v931_v15  ;;  %942 = vst [vmem:[#allocation15] sm:$0xf] %v939_v16 }
 0x3a1   :  { %vm902_vm11 = vcmp.eq.s32.totalorder %v898_v7, %v895_v6  ;;  %v947_v18 = vld [vmem:[#allocation16] sm:$0xf]  ;;  %v883_v19 = vsel %vm882_vm10, %v879_v17, 0.0  ;;  %v899_v20 = vld [vmem:[%s891_s20] sm:$0xf]  ;;  %s872_s30 = smov [#allocation8] }
 0x3a2   :  { %950 = vst [vmem:[#allocation17] sm:$0xf] %v947_v18  ;;  %v955_v21 = vld [vmem:[#allocation18] sm:$0xf]  ;;  %v884_v22 = vrot.slane %v883_v19, 4  ;;  %v903_v23 = vsel %vm902_vm11, %v899_v20, 0.0 }
 0x3a3   :  { %958 = vst [vmem:[#allocation19] sm:$0xf] %v955_v21  ;;  %v904_v24 = vrot.slane %v903_v23, 4 }
 0x3a4   :  { %v885_v25 = vadd.f32 %v884_v22, %v883_v19 }
 0x3a5   :  { %v905_v26 = vadd.f32 %v904_v24, %v903_v23 }
 0x3a6   :  { %v886_v27 = vrot.slane %v885_v25, 2 }
 0x3a7   :  { %v906_v28 = vrot.slane %v905_v26, 2  ;;  %v1150_v29 = vld [vmem:[#allocation13] sm:$0xf]  ;;  %v1213_v30 = vld [vmem:[#allocation15] sm:$0xf] }
 0x3a8   :  { %v887_v31 = vadd.f32 %v886_v27, %v885_v25  ;;  %1151 = vst [vmem:[%s2058_s6] sm:$0xf] %v1150_v29  ;;  %1214 = vst [vmem:[%s2059_s7] sm:$0xf] %v1213_v30  ;;  %s892_s6 = smov [#allocation10] }
 0x3a9   :  { %v1276_v6 = vld [vmem:[#allocation17] sm:$0xf]  ;;  %v907_v7 = vadd.f32 %v906_v28, %v905_v26 }
 0x3aa   :  { %1277 = vst [vmem:[%s2060_s8] sm:$0xf] %v1276_v6  ;;  %v1339_v32 = vld [vmem:[#allocation19] sm:$0xf]  ;;  %v888_v33 = vrot.slane %v887_v31, 1 }
 0x3ab   :  { %1340 = vst [vmem:[%s2061_s9] sm:$0xf] %v1339_v32  ;;  %v908_v34 = vrot.slane %v907_v7, 1 }
 0x3ac   :  { %v889_v35 = vadd.f32 %v888_v33, %v887_v31 }
 0x3ad   :  { %v909_v36 = vadd.f32 %v908_v34, %v907_v7 }
 0x3ae   :  { %890 = vst [vmem:[%s872_s30] sm:$0x1] %v889_v35 }
 0x3af   :  { %910 = vst [vmem:[%s892_s6] sm:$0x1] %v909_v36 }
 0x3b5   :  { %v915_v37 = vld [vmem:[#allocation8] sm:$0x1] }
 0x3b6   :  { %918 = vst [vmem:[#allocation9] sm:$0x1] %v915_v37  ;;  %v923_v38 = vld [vmem:[#allocation10] sm:$0x1] }
 0x3b7   :  { %926 = vst [vmem:[#allocation11] sm:$0x1] %v923_v38 }
 0x3bd   :  { %v1022_v39 = vld [vmem:[#allocation9] sm:$0x1] }
 0x3be   :  { %1023 = vst [vmem:[%s2056_s4] sm:$0x1] %v1022_v39  ;;  %v1087_v40 = vld [vmem:[#allocation11] sm:$0x1] }
 0x3bf   :  { %1088 = vst [vmem:[%s2057_s5] sm:$0x1] %v1087_v40 }

// kernel: custom_bert_layer.3
= control target key start
LH: loop header
LB: loop body
LE: loop exit
PB: predicated region body
PF: predicated region fallthrough
CT: control target
= control target key end

     0   :  { %12 = vsyncpa [#allocation3], 0  ;;  %s1304_s21 = smov [#allocation2]   ;;  %s1542_s0 = inlined_call_operand.vmem [shape: f32[16,32], index: 0, kind: input, shape index: {}]   ;;  %s1543_s1 = inlined_call_operand.hbm [shape: bf16[32,96], index: 1, kind: input, shape index: {}]   ;;  %s1544_s2 = inlined_call_operand.vmem [shape: f32[1,96], index: 2, kind: input, shape index: {}]   ;;  %s1545_s3 = inlined_call_operand.vmem [shape: f32[16,96], index: 3, kind: output, shape index: {0}]   ;;  %s1546_s4 = inlined_call_operand.vmem [shape: f32[8,8], index: 4, kind: output, shape index: {1}]   ;;  %s1547_s5 = inlined_call_operand.vmem [shape: f32[1,8], index: 5, kind: output, shape index: {2}]   ;;  %s1548_s6 = inlined_call_operand.vmem [shape: f32[1,8], index: 6, kind: output, shape index: {3}]  }
   0x1   :  { %s20_s22 = sshll.u32 %s1304_s21, 4  ;;  %s21_s22 = int_to_ptr.vmem [resolvable:$true] %s20_s22 }
   0x2   :  { %s1290_s23 = scalar_lea.vmem %s21_s22, 256  ;;  %p1295_p1 = scmp.lt.s32.totalorder %s21_s22, %s21_s22 }
   0x3   :  { %p1291_p0 = scmp.ne.s32.totalorder %s21_s22, %s1290_s23  ;;  %p1296_p2 = scmp.lt.s32.totalorder %s1290_s23, %s1290_s23 }
   0x5   :  { %p1297_p3 = por %p1296_p2, %p1295_p1 }
   0x7   :  { %p1298_p4 = pnand %p1297_p3, %p1291_p0 }
   0x9   :  { %1301 = shalt.err (!%p1298_p4)
}
   0xa   :  { %s1305_s24 = smov 64   ;;  %s1306_s25 = smov 4  }
   0xb   :  { %26 = dma.hbm_to_vmem [thread:$0]  %s1543_s1, 256, %s21_s22, [#allocation3], %s1305_s24, %s1305_s24, %s1306_s25  }
   0xc   :  { %1302 = dma.done.wait [#allocation3], 256  }
   0xd   :  { %1303 = vsyncadd [#allocation3], 4294967040  ;;  %v1307_v0 = vmov 0.0   ;;  %vm1308_vm0 = vmmov 0   ;;  %v1280_v1 = vld [vmem:[#allocation2 + $0x8] sm:$0xff]   ;;  %v1281_v2 = vld [vmem:[#allocation2] sm:$0xff]  }
   0xe   :  { %1203 = vmatprep.subr.bf16.mxu0 %v1307_v0  ;;  %1207 = vmatprep.mubr.msk.bf16.mxu0 %vm1308_vm0, %v1307_v0  ;;  %v42_v3 = vld [vmem:[%s1542_s0] sm:$0xff]  ;;  %v43_v4 = vld [vmem:[%s1542_s0 + $0x8] sm:$0xff]  ;;  %vm68_vm1 = vcmask 261120   ;;  %vm37_vm2 = vcmask 64512   ;;  %vm113_vm3 = vcmask 785408   ;;  %s1309_s12 = smov 120  }
   0xf   :  { %1211 = vmatprep.subr.mxu1 %v1307_v0  ;;  %1215 = vmatprep.mubr.msk.f32.mxu1 %vm1308_vm0, %v1307_v0  ;;  %v44_v5 = vpack.c.bf16 %v43_v4, %v42_v3  ;;  %38 = vst.msk [vmem:[%s1546_s4] sm:$0xff] %vm37_vm2, %v1307_v0  ;;  %v1164_v6 = vld [vmem:[%s1544_s2] ss:$0 sm:$0xff]  ;;  %s1310_s13 = smov 96   ;;  %s1311_s15 = smov 88   ;;  %vm581_vm4 = vcmask 130112  }
  0x10   :  { %1204 = vmatpush3.bf16.msra.mxu0 %v1280_v1  ;;  %s1312_s16 = smov 112   ;;  %s1313_s17 = smov 80   ;;  %vm596_vm5 = vcmask 392512   ;;  %vm835_vm6 = vcmask 195712   ;;  %vm1089_vm7 = vcmask 261312   ;;  %vm1104_vm8 = vcmask 523712  }
  0x11   :  { %1205 = vmatprep.subr.bf16.mxu0 %v1307_v0  ;;  %s1314_s18 = smov 104   ;;  %vm39_vm9 = vcmask 57344   ;;  %vm850_vm10 = vcmask 458112   ;;  %vm156_vm11 = vcmask 130048   ;;  %vm346_vm12 = vcmask 326912  }
  0x12   :  { %40 = vst.msk [vmem:[%s1547_s5] sm:$0x1] %vm39_vm9, %v1307_v0  ;;  %41 = vst.msk [vmem:[%s1548_s6] sm:$0x1] %vm39_vm9, %v1307_v0 }
  0x14   :  { %1206 = vmatpush3.bf16.msra.mxu0 %v1281_v2 }
  0x15   :  { %1232 = vmatprep.subr.mxu0 %v1307_v0 }
  0x17   :  { %1208 = vmatmul.mubr.msk.bf16.vlgmr.msra.gmra.mxu0 %vm68_vm1, %v44_v5 }
  0x18   :  { %1236 = vmatprep.mubr.msk.f32.mxu0 %vm1308_vm0, %v1307_v0 }
  0xd7   :  { %v106_v7 = vpop.f32.mrf.mxu0 }
  0xd8   :  { %v1379_v8 = vadd.f32 %v1164_v6, %v106_v7 }
  0xd9   :  { %v1209_v9 = vpop.f32.mrf.mxu0 }
  0xda   :  { %114 = vst.msk [vmem:[%s1545_s3] sm:$0xff] %vm113_vm3, %v1379_v8  ;;  %357 = vrot.lane.b32.xlu1 %v1379_v8, %s1309_s12  ;;  %118 = vrot.lane.b32.xlu0 %v1379_v8, %s1310_s13  ;;  %v582_v14 = vsel %vm581_vm4, %v1379_v8, 0.0  ;;  %v597_v17 = vsel %vm596_vm5, %v1379_v8, 0.0  ;;  %v836_v21 = vsel %vm835_vm6, %v1379_v8, 0.0  ;;  %v1090_v26 = vsel %vm1089_vm7, %v1379_v8, 0.0 }
  0xdb   :  { %v109_v10 = vpop.f32.mrf.mxu0  ;;  %v1105_v33 = vsel %vm1104_vm8, %v1379_v8, 0.0 }
  0xdc   :  { %v1389_v11 = vadd.f32 %v1164_v6, %v109_v10 }
  0xdd   :  { %v1210_v12 = vpop.f32.mrf.mxu0 }
  0xde   :  { %115 = vst.msk [vmem:[%s1545_s3 + $0x8] sm:$0xff] %vm113_vm3, %v1389_v11  ;;  %469 = vrot.lane.b32.xlu0 %v1379_v8, %s1311_s15  ;;  %359 = vrot.lane.b32.xlu1 %v1389_v11, %s1309_s12  ;;  %s1315_s3 = smov 72   ;;  %v583_v13 = vsel %vm581_vm4, %v1389_v11, 0.0  ;;  %v598_v16 = vsel %vm596_vm5, %v1389_v11, 0.0  ;;  %v837_v20 = vsel %vm835_vm6, %v1389_v11, 0.0  ;;  %v1091_v25 = vsel %vm1089_vm7, %v1389_v11, 0.0 }
  0xdf   :  { %v584_v15 = vadd.f32 %v583_v13, %v582_v14  ;;  %v599_v19 = vadd.f32 %v598_v16, %v597_v17  ;;  %v838_v24 = vadd.f32 %v837_v20, %v836_v21  ;;  %v1092_v27 = vadd.f32 %v1091_v25, %v1090_v26 }
  0xe0   :  { %v1106_v31 = vsel %vm1104_vm8, %v1389_v11, 0.0  ;;  %v337_v10 = vsel %vm37_vm2, %v1389_v11, 0.0  ;;  %v336_v12 = vsel %vm37_vm2, %v1379_v8, 0.0  ;;  %v852_v14 = vsel %vm850_vm10, %v1389_v11, 0.0 }
  0xe1   :  { %v585_v18 = vrot.slane %v584_v15, 4  ;;  %v600_v23 = vrot.slane %v599_v19, 4  ;;  %v839_v30 = vrot.slane %v838_v24, 4  ;;  %v1093_v32 = vrot.slane %v1092_v27, 4 }
  0xe2   :  { %611 = vrot.lane.b32.xlu0 %v1379_v8, %s1312_s16  ;;  %471 = vrot.lane.b32.xlu1 %v1389_v11, %s1311_s15  ;;  %v1107_v37 = vadd.f32 %v1106_v31, %v1105_v33  ;;  %v338_v13 = vadd.f32 %v337_v10, %v336_v12  ;;  %v851_v16 = vsel %vm850_vm10, %v1379_v8, 0.0 }
  0xe3   :  { %v586_v22 = vadd.f32 %v585_v18, %v584_v15  ;;  %v601_v29 = vadd.f32 %v600_v23, %v599_v19  ;;  %v840_v36 = vadd.f32 %v839_v30, %v838_v24  ;;  %v1094_v38 = vadd.f32 %v1093_v32, %v1092_v27 }
  0xe4   :  { %v1108_v42 = vrot.slane %v1107_v37, 4  ;;  %v339_v15 = vrot.slane %v338_v13, 4  ;;  %v853_v17 = vadd.f32 %v852_v14, %v851_v16 }
  0xe5   :  { %v587_v28 = vrot.slane %v586_v22, 2  ;;  %v602_v35 = vrot.slane %v601_v29, 2  ;;  %v841_v41 = vrot.slane %v840_v36, 2  ;;  %v1095_v43 = vrot.slane %v1094_v38, 2 }
  0xe6   :  { %723 = vrot.lane.b32.xlu0 %v1379_v8, %s1313_s17  ;;  %613 = vrot.lane.b32.xlu1 %v1389_v11, %s1312_s16  ;;  %v1109_v47 = vadd.f32 %v1108_v42, %v1107_v37  ;;  %v340_v18 = vadd.f32 %v339_v15, %v338_v13  ;;  %v854_v19 = vrot.slane %v853_v17, 4 }
  0xe7   :  { %v588_v34 = vadd.f32 %v587_v28, %v586_v22  ;;  %v603_v40 = vadd.f32 %v602_v35, %v601_v29  ;;  %v842_v46 = vadd.f32 %v841_v41, %v840_v36  ;;  %v1096_v50 = vadd.f32 %v1095_v43, %v1094_v38  ;;  %v1122_v35 = vld [vmem:[%s1547_s5] sm:$0x1] }
  0xe8   :  { %v1110_v51 = vrot.slane %v1109_v47, 2  ;;  %v341_v21 = vrot.slane %v340_v18, 2  ;;  %v855_v22 = vadd.f32 %v854_v19, %v853_v17 }
  0xe9   :  { %v589_v39 = vrot.slane %v588_v34, 1  ;;  %v604_v45 = vrot.slane %v603_v40, 1  ;;  %v843_v49 = vrot.slane %v842_v46, 1  ;;  %v1097_v53 = vrot.slane %v1096_v50, 1 }
  0xea   :  { %865 = vrot.lane.b32.xlu0 %v1379_v8, %s1314_s18  ;;  %725 = vrot.lane.b32.xlu1 %v1389_v11, %s1313_s17  ;;  %v1111_v54 = vadd.f32 %v1110_v51, %v1109_v47  ;;  %v342_v23 = vadd.f32 %v341_v21, %v340_v18  ;;  %v856_v25 = vrot.slane %v855_v22, 2  ;;  %v347_v47 = vsel %vm346_vm12, %v1379_v8, 0.0 }
  0xeb   :  { %v590_v44 = vadd.f32 %v589_v39, %v588_v34  ;;  %v605_v48 = vadd.f32 %v604_v45, %v603_v40  ;;  %v844_v52 = vadd.f32 %v843_v49, %v842_v46  ;;  %v1098_v55 = vadd.f32 %v1097_v53, %v1096_v50 }
  0xec   :  { %v1112_v56 = vrot.slane %v1111_v54, 1  ;;  %v343_v26 = vrot.slane %v342_v23, 1  ;;  %v857_v28 = vadd.f32 %v856_v25, %v855_v22  ;;  %v348_v46 = vsel %vm346_vm12, %v1389_v11, 0.0 }
  0xee   :  { %977 = vrot.lane.b32.xlu0 %v1379_v8, %s1315_s3  ;;  %867 = vrot.lane.b32.xlu1 %v1389_v11, %s1314_s18  ;;  %v1113_v57 = vadd.f32 %v1112_v56, %v1111_v54  ;;  %v344_v29 = vadd.f32 %v343_v26, %v342_v23  ;;  %v858_v32 = vrot.slane %v857_v28, 1 }
  0xf0   :  { %v859_v37 = vadd.f32 %v858_v32, %v857_v28  ;;  %v1119_v28 = vld [vmem:[%s1546_s4] sm:$0xff] }
  0xf2   :  { %979 = vrot.lane.b32.xlu1 %v1389_v11, %s1315_s3  ;;  %120 = vrot.lane.b32.xlu0 %v1389_v11, %s1310_s13 }
 0x11b   :  { %230 = vxpose.xlu1.b32.start [1/2] (short) (narrow) %v1379_v8, 8 }
 0x11f   :  { %231 = vxpose.xlu1.b32.end [2/2] (short) (narrow) %v1389_v11, 8 }
 0x13d   :  { %592 = vrot.lane.b32.xlu1 %v590_v44, %s1309_s12 }
 0x141   :  { %607 = vrot.lane.b32.xlu1 %v605_v48, %s1309_s12  ;;  %v349_v48 = vadd.f32 %v348_v46, %v347_v47 }
 0x143   :  { %v350_v49 = vrot.slane %v349_v48, 4 }
 0x145   :  { %846 = vrot.lane.b32.xlu1 %v844_v52, %s1312_s16  ;;  %v351_v50 = vadd.f32 %v350_v49, %v349_v48 }
 0x147   :  { %v352_v51 = vrot.slane %v351_v50, 2 }
 0x149   :  { %1100 = vrot.lane.b32.xlu1 %v1098_v55, %s1314_s18  ;;  %v353_v52 = vadd.f32 %v352_v51, %v351_v50  ;;  %v1131_v55 = vlaneseq }
 0x14b   :  { %v354_v53 = vrot.slane %v353_v52, 1 }
 0x14c   :  { %v1439_v58 = vpop.permute.xlu1 %357  ;;  %v119_v59 = vpop.permute.xlu0 %118 }
 0x14d   :  { %124 = vxpose.xlu0.b32.start [1/2] (short) (narrow) %v119_v59, 8  ;;  %1115 = vrot.lane.b32.xlu1 %v1113_v57, %s1314_s18  ;;  %v355_v56 = vadd.f32 %v354_v53, %v353_v52 }
 0x150   :  { %v470_v60 = vpop.permute.xlu0 %469  ;;  %v1442_v61 = vpop.permute.xlu1 %359 }
 0x154   :  { %v1444_v62 = vpop.permute.xlu0 %611  ;;  %v472_v63 = vpop.permute.xlu1 %471 }
 0x155   :  { %1233 = vmatpush3.msra.mxu0 %v472_v63 }
 0x156   :  { %1234 = vmatprep.subr.mxu0 %v1307_v0 }
 0x157   :  { %1235 = vmatpush3.msra.mxu0 %v470_v60 }
 0x158   :  { %v1447_v1 = vpop.permute.xlu0 %723  ;;  %1246 = vmatprep.subr.mxu0 %v1307_v0  ;;  %v614_v5 = vpop.permute.xlu1 %613 }
 0x15c   :  { %v1450_v2 = vpop.permute.xlu0 %865  ;;  %v726_v6 = vpop.permute.xlu1 %725 }
 0x160   :  { %v1452_v3 = vpop.permute.xlu0 %977  ;;  %v1461_v7 = vpop.permute.xlu1 %867 }
 0x164   :  { %v121_v4 = vpop.permute.xlu0 %120  ;;  %v1465_v9 = vpop.permute.xlu1 %979 }
 0x165   :  { %1212 = vmatpush3.msra.mxu1 %v121_v4  ;;  %125 = vxpose.xlu0.b32.end [2/2] (short) (narrow) %v121_v4, 8 }
 0x166   :  { %1213 = vmatprep.subr.mxu1 %v1307_v0 }
 0x167   :  { %1214 = vmatpush3.msra.mxu1 %v119_v59 }
 0x168   :  { %1218 = vmatprep.subr.mxu1 %v1307_v0 }
 0x169   :  { %363 = vxpose.xlu0.b32.start [1/2] (short) (narrow) %v1439_v58, 8 }
 0x16d   :  { %364 = vxpose.xlu0.b32.end [2/2] (short) (narrow) %v1442_v61, 8 }
 0x171   :  { %475 = vxpose.xlu0.b32.start [1/2] (short) (narrow) %v470_v60, 8 }
 0x175   :  { %476 = vxpose.xlu0.b32.end [2/2] (short) (narrow) %v472_v63, 8 }
 0x179   :  { %617 = vxpose.xlu0.b32.start [1/2] (short) (narrow) %v1444_v62, 8 }
 0x17d   :  { %618 = vxpose.xlu0.b32.end [2/2] (short) (narrow) %v614_v5, 8 }
 0x181   :  { %729 = vxpose.xlu0.b32.start [1/2] (short) (narrow) %v1447_v1, 8 }
 0x185   :  { %730 = vxpose.xlu0.b32.end [2/2] (short) (narrow) %v726_v6, 8 }
 0x189   :  { %871 = vxpose.xlu0.b32.start [1/2] (short) (narrow) %v1450_v2, 8 }
 0x18d   :  { %872 = vxpose.xlu0.b32.end [2/2] (short) (narrow) %v1461_v7, 8 }
 0x191   :  { %983 = vxpose.xlu0.b32.start [1/2] (short) (narrow) %v1452_v3, 8 }
 0x195   :  { %984 = vxpose.xlu0.b32.end [2/2] (short) (narrow) %v1465_v9, 8 }
 0x197   :  { %v246_v20 = vpop.trf.xlu1 }
 0x1af   :  { %v593_v24 = vpop.permute.xlu1 %592 }
 0x1b0   :  { %v595_v31 = vadd.f32 %v593_v24, %v344_v29 }
 0x1b3   :  { %v1474_v27 = vpop.permute.xlu1 %607 }
 0x1b4   :  { %v610_v59 = vadd.f32 %v1474_v27, %v355_v56 }
 0x1b7   :  { %v847_v30 = vpop.permute.xlu1 %846 }
 0x1b8   :  { %v849_v33 = vadd.f32 %v847_v30, %v595_v31 }
 0x1bb   :  { %v1101_v34 = vpop.permute.xlu1 %1100 }
 0x1bc   :  { %v1103_v36 = vadd.f32 %v1101_v34, %v849_v33 }
 0x1be   :  { %v1123_v38 = vadd.f32 %v1122_v35, %v1103_v36  ;;  %861 = vrot.lane.b32.xlu0 %v859_v37, %s1312_s16 }
 0x1c0   :  { %1125 = vst.msk [vmem:[%s1547_s5] sm:$0x1] %vm39_vm9, %v1123_v38 }
 0x1dd   :  { %v140_v39 = vpop.trf.xlu0 }
 0x1de   :  { %1216 = vmatmul.mubr.msk.f32.vlgmr.msra.gmra.mxu1 %vm156_vm11, %v140_v39 }
 0x1df   :  { %1219 = vmatpush3.msra.mxu1 %v1389_v11  ;;  %1222 = vmatprep.mubr.msk.f32.mxu1 %vm1308_vm0, %v1307_v0  ;;  %v1116_v11 = vpop.permute.xlu1 %1115 }
 0x1e0   :  { %1220 = vmatprep.subr.mxu1 %v1307_v0 }
 0x1e1   :  { %1221 = vmatpush3.msra.mxu1 %v1379_v8 }
 0x1e2   :  { %1225 = vmatprep.subr.mxu1 %v1307_v0  ;;  %1223 = vmatmul.mubr.msk.f32.vlgmr.msra.gmra.mxu1 %vm156_vm11, %v246_v20 }
 0x1e3   :  { %1226 = vmatpush3.msra.mxu1 %v1442_v61  ;;  %1229 = vmatprep.mubr.msk.f32.mxu1 %vm1308_vm0, %v1307_v0 }
 0x1e4   :  { %1227 = vmatprep.subr.mxu1 %v1307_v0 }
 0x1e5   :  { %1228 = vmatpush3.msra.mxu1 %v1439_v58  ;;  %v379_v40 = vpop.trf.xlu0  ;;  %v1132_v58 = vshrl.u32 %v1131_v55, 7 }
 0x1e6   :  { %1239 = vmatprep.subr.mxu1 %v1307_v0  ;;  %1230 = vmatmul.mubr.msk.f32.vlgmr.msra.gmra.mxu1 %vm156_vm11, %v379_v40 }
 0x1e7   :  { %1240 = vmatpush3.msra.mxu1 %v614_v5  ;;  %1243 = vmatprep.mubr.msk.f32.mxu1 %vm1308_vm0, %v1307_v0 }
 0x1e8   :  { %1241 = vmatprep.subr.mxu1 %v1307_v0 }
 0x1e9   :  { %1242 = vmatpush3.msra.mxu1 %v1444_v62 }
 0x1ea   :  { %1253 = vmatprep.subr.mxu1 %v1307_v0 }
 0x1ed   :  { %v491_v41 = vpop.trf.xlu0 }
 0x1ee   :  { %1237 = vmatmul.mubr.msk.f32.vlgmr.msra.gmra.mxu0 %vm156_vm11, %v491_v41 }
 0x1ef   :  { %1247 = vmatpush3.msra.mxu0 %v726_v6  ;;  %1250 = vmatprep.mubr.msk.f32.mxu0 %vm1308_vm0, %v1307_v0 }
 0x1f0   :  { %1248 = vmatprep.subr.mxu0 %v1307_v0 }
 0x1f1   :  { %1249 = vmatpush3.msra.mxu0 %v1447_v1 }
 0x1f2   :  { %1260 = vmatprep.subr.mxu0 %v1307_v0 }
 0x1f5   :  { %v633_v42 = vpop.trf.xlu0 }
 0x1f6   :  { %1244 = vmatmul.mubr.msk.f32.vlgmr.msra.gmra.mxu1 %vm156_vm11, %v633_v42 }
 0x1f7   :  { %1254 = vmatpush3.msra.mxu1 %v1461_v7  ;;  %1257 = vmatprep.mubr.msk.f32.mxu1 %vm1308_vm0, %v1307_v0 }
 0x1f8   :  { %1255 = vmatprep.subr.mxu1 %v1307_v0 }
 0x1f9   :  { %1256 = vmatpush3.msra.mxu1 %v1450_v2 }
 0x1fd   :  { %v745_v43 = vpop.trf.xlu0 }
 0x1fe   :  { %1251 = vmatmul.mubr.msk.f32.vlgmr.msra.gmra.mxu0 %vm156_vm11, %v745_v43 }
 0x1ff   :  { %1261 = vmatpush3.msra.mxu0 %v1465_v9  ;;  %1264 = vmatprep.mubr.msk.f32.mxu0 %vm1308_vm0, %v1307_v0  ;;  %v1126_v9 = vld [vmem:[%s1548_s6] sm:$0x1] }
 0x200   :  { %1262 = vmatprep.subr.mxu0 %v1307_v0  ;;  %v1316_v0 = vmov 1966171168  }
 0x201   :  { %1263 = vmatpush3.msra.mxu0 %v1452_v3  ;;  %v1129_v54 = vunpack.c.l.s4 %v1316_v0 }
 0x203   :  { %v1130_v57 = vunpack.c.0.s8 %v1129_v54 }
 0x205   :  { %v887_v44 = vpop.trf.xlu0  ;;  %v1133_v61 = vsub.s32 %v1130_v57, %v1132_v58 }
 0x206   :  { %1258 = vmatmul.mubr.msk.f32.vlgmr.msra.gmra.mxu1 %vm156_vm11, %v887_v44 }
 0x20d   :  { %v999_v45 = vpop.trf.xlu0 }
 0x20e   :  { %1265 = vmatmul.mubr.msk.f32.vlgmr.msra.gmra.mxu0 %vm156_vm11, %v999_v45 }
 0x230   :  { %v862_v60 = vpop.permute.xlu0 %861 }
 0x231   :  { %v864_v62 = vadd.f32 %v862_v60, %v610_v59 }
 0x233   :  { %v1118_v63 = vadd.f32 %v1116_v11, %v864_v62 }
 0x235   :  { %v1134_v8 = vrot.slane %v1118_v63, %v1133_v61 }
 0x237   :  { %v1141_v1 = vrot.slane %v1134_v8, %v1133_v61 }
 0x239   :  { %1142 = vrot.lane.b32.xlu1 %v1141_v1, %s1310_s13 }
 0x29e   :  { %v226_v2 = vpop.f32.mrf.mxu1 }
 0x2a0   :  { %v1217_v3 = vpop.f32.mrf.mxu1 }
 0x2a2   :  { %v331_v4 = vpop.f32.mrf.mxu1 }
 0x2a3   :  { %v332_v17 = vadd.f32 %v331_v4, %v226_v2 }
 0x2a4   :  { %v1224_v5 = vpop.f32.mrf.mxu1 }
 0x2a6   :  { %v464_v6 = vpop.f32.mrf.mxu1 }
 0x2a7   :  { %v468_v19 = vadd.f32 %v464_v6, %v332_v17 }
 0x2a8   :  { %v1231_v7 = vpop.f32.mrf.mxu1 }
 0x2ab   :  { %v1143_v10 = vpop.permute.xlu1 %1142 }
 0x2ac   :  { %v1145_v12 = vadd.f32 %v1143_v10, %v1126_v9 }
 0x2ae   :  { %1146 = vst.msk [vmem:[%s1548_s6] sm:$0x1] %vm39_vm9, %v1145_v12  ;;  %v576_v13 = vpop.f32.mrf.mxu0 }
 0x2af   :  { %v580_v21 = vadd.f32 %v576_v13, %v468_v19 }
 0x2b0   :  { %v1238_v14 = vpop.f32.mrf.mxu0 }
 0x2b6   :  { %v718_v15 = vpop.f32.mrf.mxu1 }
 0x2b7   :  { %v722_v23 = vadd.f32 %v718_v15, %v580_v21 }
 0x2b8   :  { %v1245_v16 = vpop.f32.mrf.mxu1 }
 0x2be   :  { %v830_v18 = vpop.f32.mrf.mxu0 }
 0x2bf   :  { %v834_v25 = vadd.f32 %v830_v18, %v722_v23 }
 0x2c0   :  { %v1252_v20 = vpop.f32.mrf.mxu0 }
 0x2c6   :  { %v972_v22 = vpop.f32.mrf.mxu1 }
 0x2c7   :  { %v976_v26 = vadd.f32 %v972_v22, %v834_v25 }
 0x2c8   :  { %v1259_v24 = vpop.f32.mrf.mxu1 }
 0x2ce   :  { %v1084_v27 = vpop.f32.mrf.mxu0 }
 0x2cf   :  { %v1088_v29 = vadd.f32 %v1084_v27, %v976_v26 }
 0x2d0   :  { %v1266_v30 = vpop.f32.mrf.mxu0 }
 0x2d1   :  { %v1120_v31 = vadd.f32 %v1119_v28, %v1088_v29 }
 0x2d3   :  { %1121 = vst.msk [vmem:[%s1546_s4] sm:$0xff] %vm37_vm2, %v1120_v31 }
 0x2d4   :  { %1163 = vsyncpa [#allocation3], 1 }

// kernel: reverse
= control target key start
LH: loop header
LB: loop body
LE: loop exit
PB: predicated region body
PF: predicated region fallthrough
CT: control target
= control target key end

     0   :  { %v2_v0 = vlaneseq  ;;  %s130_s0 = inlined_call_operand.vmem [shape: f32[8], index: 0, kind: input, shape index: {}]   ;;  %s131_s1 = inlined_call_operand.vmem [shape: f32[8], index: 1, kind: output, shape index: {}]  }
   0x2   :  { %v3_v1 = vsub.s32 7, %v2_v0 }
   0x4   :  { %4 = vset.pattern.permute.xlu0 %v3_v1 }
   0x5   :  { %v46_v2 = vld [vmem:[#allocation1] sm:$0x1]  ;;  %v22_v3 = vld [vmem:[%s130_s0] sm:$0x1]  ;;  %v61_v10 = vshrl.u32 %v2_v0, 7 }
   0x6   :  { %47 = vst [vmem:[#allocation0] sm:$0x1] %v46_v2  ;;  %23 = vst [vmem:[#allocation1 + $0x1] sm:$0x1] %v22_v3 }
   0x7   :  { %vm62_vm0 = vcmp.lt.s32.totalorder %v61_v10, 1 }
   0xd   :  { %v49_v4 = vld [vmem:[#allocation0 + $0x7] ss:$-1 sm:$0xff]  ;;  %v43_v5 = vld [vmem:[#allocation1 + $0x1] sm:$0x1] }
   0xe   :  { %v50_v6 = vrot.slane %v49_v4, 7  ;;  %45 = vst [vmem:[#allocation0 + $0x8] sm:$0x1] %v43_v5 }
  0x10   :  { %51 = vperm.xlu0 %4, %v50_v6  }
  0x15   :  { %v56_v7 = vld [vmem:[#allocation0 + $0xf] ss:$-1 sm:$0xff] }
  0x16   :  { %v57_v8 = vrot.slane %v56_v7, 7 }
  0x18   :  { %58 = vperm.xlu0 %4, %v57_v8  }
  0x8b   :  { %v52_v9 = vpop.permute.xlu0 %51 }
  0x8c   :  { %53 = vst [vmem:[#allocation2] sm:$0xff] %v52_v9 }
  0x93   :  { %v59_v11 = vpop.permute.xlu0 %58 }
  0x94   :  { %63 = vst.msk [vmem:[#allocation2] sm:$0xff] %vm62_vm0, %v59_v11 }
  0x9b   :  { %v68_v12 = vld [vmem:[#allocation2] sm:$0x1] }
  0x9c   :  { %71 = vst [vmem:[#allocation3] sm:$0x1] %v68_v12 }
  0xa3   :  { %v88_v13 = vld [vmem:[#allocation3] sm:$0x1] }
  0xa4   :  { %89 = vst [vmem:[%s131_s1] sm:$0x1] %v88_v13 }

// kernel: custom-call.16
= control target key start
LH: loop header
LB: loop body
LE: loop exit
PB: predicated region body
PF: predicated region fallthrough
CT: control target
= control target key end

     0   :  { %v327_v1 = vmov 0.0   ;;  %s347_s11 = smov 0   ;;  %s400_s0 = inlined_call_operand.vmem [shape: f32[8,8], index: 0, kind: input, shape index: {}]   ;;  %s401_s1 = inlined_call_operand.vmem [shape: f32[8,8], index: 1, kind: output, shape index: {0}]   ;;  %s402_s2 = inlined_call_operand.vmem [shape: f32[8], index: 2, kind: output, shape index: {1}]  }
   0x1   :  { %v32_v0 = vld [vmem:[%s400_s0] sm:$0xff]  ;;  %39 = vst [vmem:[#allocation2] sm:$0x1] %v327_v1 }
   0x2   :  { %38 = vst [vmem:[#allocation1] sm:$0xff] %v32_v0 }
   0x3 LB: > { %v47_v2 = vlaneseq  ;;  %v355_v5 = vstv %s325_s11  ;;  %s74_s0 = scalar_lea.vmem [#allocation1], %s325_s11  ;;  %s110_s12 = smov [#allocation1]  ;;  %v328_v58 = vmov 1.0   ;;  %s325_s11 = sphi %s347_s11, %s45_s11  }
   0x4   : > { %s132_s13 = scalar_lea.vmem [#allocation4], %s325_s11  ;;  %s148_s14 = smov [#allocation1] }
   0x5   : > { %v352_v4 = vshrl.u32 %v47_v2, 7  ;;  %v126_v47 = vand.u32 127, %v47_v2  ;;  %s149_s15 = smov [#allocation4] }
   0x7   : > { %vm51_vm0 = vcmp.gt.s32.totalorder %v352_v4, %v355_v5  ;;  %v113_v4 = vmov %v352_v4  ;;  %vm368_vm10 = vcmp.eq.s32.totalorder %v126_v47, %v355_v5  ;;  %vm178_vm13 = vcmp.gt.s32.totalorder %v126_v47, %v355_v5 }
   0x8   : > { %vm117_vm7 = vcmp.gt.s32.totalorder %v113_v4, %v355_v5  ;;  %vm118_vm8 = vcmp.lt.s32.totalorder %v113_v4, 8  ;;  %v145_v59 = vld [vmem:[#allocation2] ss:$0 sm:$0xff]  ;;  %v152_v4 = vmov %v352_v4 }
   0x9   : > { %v46_v3 = vld [vmem:[#allocation1] sm:$0xff]  ;;  %vm119_vm9 = vmand %vm117_vm7, %vm118_vm8  ;;  %vm157_vm11 = vcmp.lt.s32.totalorder %v152_v4, 8  ;;  %v169_v4 = vmov %v352_v4 }
   0xa   : > { %v54_v6 = vsel %vm51_vm0, %v46_v3, 0.0  ;;  %v75_v14 = vld [vmem:[%s74_s0] ss:$0 sm:$0xff]  ;;  %vm186_vm12 = vcmp.ge.s32.totalorder %v169_v4, %v355_v5 }
   0xb   : > { %v55_v7 = vmul.f32 %v54_v6, %v54_v6  ;;  %v76_v15 = vand.u32 2147483647, %v75_v14  ;;  %vm101_vm6 = vcmp.lt.f32.partialorder %v75_v14, 0.0  ;;  %v114_v44 = vld [vmem:[%s110_s12] sm:$0xff]  ;;  %vm187_vm14 = vmand %vm368_vm10, %vm186_vm12 }
   0xc   : > { %v120_v48 = vsel %vm119_vm9, %v114_v44, 0.0  ;;  %v155_v62 = vld [vmem:[%s148_s14] sm:$0xff]  ;;  %s165_s14 = smov %s148_s14 }
   0xd   : > { %v56_v8 = vrot.slane %v55_v7, 4  ;;  %v77_v20 = vmax.f32 %v76_v15, 0.0  ;;  %s190_s16 = scalar_lea.vmem %s165_s14, %s325_s11  ;;  %s45_s11 = sadd.s32 1, %s325_s11  }
   0xe   : > { %p42_p0 = scmp.ge.s32.totalorder %s45_s11, 8  }
   0xf   : > { %v57_v9 = vadd.f32 %v56_v8, %v55_v7 }
  0x11   : > { %v58_v10 = vrot.slane %v57_v9, 2 }
  0x13   : > { %v59_v11 = vadd.f32 %v58_v10, %v57_v9 }
  0x15   : > { %v60_v12 = vrot.slane %v59_v11, 1 }
  0x17   : > { %v61_v13 = vadd.f32 %v60_v12, %v59_v11  ;;  %v176_v12 = vld [vmem:[%s165_s14] sm:$0xff] }
  0x19   : > { %309 = vrsqrt.f32 %v61_v13  ;;  %vm64_vm1 = vcmp.eq.f32.partialorder %v61_v13, inf  ;;  %v67_v17 = vand.u32 2147483648, %v61_v13  ;;  %vm66_vm2 = vcmp.eq.f32.partialorder %v61_v13, 0.0 }
  0x26   : > { %v310_v16 = vpop.eup %309 }
  0x27   : > { %v63_v18 = vmul.f32 %v310_v16, %v61_v13 }
  0x29   : > { %v65_v19 = vsel %vm64_vm1, %v61_v13, %v63_v18 }
  0x2a   : > { %v68_v21 = vsel %vm66_vm2, %v67_v17, %v65_v19 }
  0x2b   : > { %v78_v22 = vand.u32 2147483647, %v68_v21 }
  0x2d   : > { %v79_v23 = vmax.f32 %v77_v20, %v78_v22 }
  0x2f   : > { %311 = vrcp.f32 %v79_v23  ;;  %vm91_vm5 = vcmp.eq.f32.partialorder %v79_v23, 0.0 }
  0x3c   : > { %v312_v24 = vpop.eup %311 }
  0x3d   : > { %v81_v25 = vmul.f32 %v312_v24, %v76_v15  ;;  %v84_v26 = vmul.f32 0.0, %v312_v24  ;;  %v88_v27 = vmul.f32 %v312_v24, %v78_v22 }
  0x3f   : > { %v82_v28 = vmul.f32 %v81_v25, %v81_v25  ;;  %v85_v29 = vmul.f32 %v84_v26, %v84_v26  ;;  %v89_v30 = vmul.f32 %v88_v27, %v88_v27 }
  0x41   : > { %v86_v31 = vadd.f32 %v85_v29, %v82_v28 }
  0x43   : > { %v90_v32 = vadd.f32 %v89_v30, %v86_v31 }
  0x45   : > { %313 = vrsqrt.f32 %v90_v32  ;;  %vm94_vm3 = vcmp.eq.f32.partialorder %v90_v32, inf  ;;  %v97_v34 = vand.u32 2147483648, %v90_v32  ;;  %vm96_vm4 = vcmp.eq.f32.partialorder %v90_v32, 0.0 }
  0x52   : > { %v314_v33 = vpop.eup %313 }
  0x53   : > { %v93_v35 = vmul.f32 %v314_v33, %v90_v32 }
  0x55   : > { %v95_v36 = vsel %vm94_vm3, %v90_v32, %v93_v35 }
  0x56   : > { %v98_v37 = vsel %vm96_vm4, %v97_v34, %v95_v36 }
  0x57   : > { %v99_v38 = vmul.f32 %v98_v37, %v79_v23 }
  0x59   : > { %v100_v39 = vsel %vm91_vm5, 0.0, %v99_v38 }
  0x5a   : > { %v102_v40 = vxor.u32 2147483648, %v100_v39 }
  0x5c   : > { %v103_v41 = vsel %vm101_vm6, %v100_v39, %v102_v40 }
  0x5d   : > { %v362_v42 = vsel %vm66_vm2, %v75_v14, %v103_v41  ;;  %315 = vrcp.f32 %v103_v41  ;;  %v104_v45 = vsub.f32 %v103_v41, %v75_v14 }
  0x5e   : > { %v109_v43 = vsub.f32 %v75_v14, %v362_v42 }
  0x60   : > { %317 = vrcp.f32 %v109_v43 }
  0x6a   : > { %v316_v46 = vpop.eup %315 }
  0x6b   : > { %v106_v49 = vmul.f32 %v316_v46, %v104_v45 }
  0x6d   : > { %v318_v50 = vpop.eup %317  ;;  %v108_v54 = vsel %vm66_vm2, 0.0, %v106_v49 }
  0x6e   : > { %v122_v51 = vmul.f32 %v318_v50, %v120_v48  ;;  %v138_v56 = vsel %vm368_vm10, %v108_v54, 0.0 }
  0x70   : > { %v123_v53 = vsel %vm66_vm2, 0.0, %v122_v51 }
  0x71   : > { %v128_v55 = vsel %vm368_vm10, %v123_v53, 0.0 }
  0x72   : > { %129 = vadd.xlane.f32.xlu0 %v128_v55 }
  0x76   : > { %139 = vadd.xlane.f32.xlu0 %v138_v56 }
  0xfb   : > { %v130_v57 = vpop.xlane.xlu0 %129 }
  0xfc   : > { %131 = vst [vmem:[#allocation4] sm:$0xff] %v130_v57 }
  0xfd   : > { %133 = vst [vmem:[%s132_s13] sm:$0x1] %v328_v58 }
  0xff   : > { %v140_v60 = vpop.xlane.xlu0 %139 }
 0x100   : > { %v146_v61 = vsel %vm368_vm10, %v140_v60, %v145_v59 }
 0x101   : > { %147 = vst [vmem:[#allocation2] sm:$0x1] %v146_v61 }
 0x104   : > { %v154_v63 = vld [vmem:[%s149_s15] sm:$0xff]  ;;  %s166_s15 = smov %s149_s15 }
 0x105   : > { %v156_v0 = vmul.f32 %v155_v62, %v154_v63  ;;  %v174_v11 = vld [vmem:[%s166_s15] sm:$0xff] }
 0x107   : > { %v158_v1 = vsel %vm157_vm11, %v156_v0, 0.0 }
 0x108   : > { %v159_v2 = vrot.slane %v158_v1, 4  ;;  %v202_v4 = vld [vmem:[#allocation2] sm:$0x1] (%p42_p0) }
 0x109   :  { %205 = vst [vmem:[#allocation3] sm:$0x1] (%p42_p0), %v202_v4 }
 0x10a   : > { %v160_v3 = vadd.f32 %v159_v2, %v158_v1 }
 0x10c   : > { %v161_v6 = vrot.slane %v160_v3, 2 }
 0x10e   : > { %v162_v7 = vadd.f32 %v161_v6, %v160_v3 }
 0x110   : > { %v163_v8 = vrot.slane %v162_v7, 1  ;;  %v257_v19 = vld [vmem:[#allocation3] sm:$0x1] (%p42_p0) }
 0x111   :  { %258 = vst [vmem:[%s402_s2] sm:$0x1] (%p42_p0), %v257_v19 }
 0x112   : > { %v164_v9 = vadd.f32 %v163_v8, %v162_v7 }
 0x114   : > { %v170_v10 = vmul.f32 %v164_v9, %v140_v60 }
 0x116   : > { %v175_v13 = vmul.f32 %v174_v11, %v170_v10 }
 0x118   : > { %v179_v14 = vsub.f32 %v176_v12, %v175_v13 }
 0x11a   : > { %v180_v15 = vsel %vm178_vm13, %v179_v14, %v176_v12 }
 0x11b   : > { %v188_v16 = vsel %vm187_vm14, %v174_v11, %v180_v15 }
 0x11c   : > { %189 = vst [vmem:[%s165_s14] sm:$0xff] %v188_v16 }
 0x121   :  { %44 = sbr.rel (!%p42_p0) target bundleno = 3 (0x3), region = 139 }
 0x123   : > { %v191_v17 = vld [vmem:[%s190_s16] ss:$0 sm:$0xff] }
 0x124   : > { %v196_v18 = vsel %vm368_vm10, %v362_v42, %v191_v17 }
 0x125   : > { %197 = vst [vmem:[%s190_s16] sm:$0x1] %v196_v18 }
 0x12c   :  { %v234_v5 = vld [vmem:[#allocation1] sm:$0xff] }
 0x12d   :  { %235 = vst [vmem:[%s401_s1] sm:$0xff] %v234_v5 }

// kernel: tile.8
= control target key start
LH: loop header
LB: loop body
LE: loop exit
PB: predicated region body
PF: predicated region fallthrough
CT: control target
= control target key end

     0   :  { %s22_s0 = inlined_call_operand.vmem [shape: f32[8], index: 0, kind: input, shape index: {}]   ;;  %s23_s1 = inlined_call_operand.vmem [shape: f32[4,8], index: 1, kind: output, shape index: {}]  }
   0x1   :  { %v4_v0 = vld [vmem:[%s22_s0] ss:$0 sm:$0xff] }
   0x2   :  { %5 = vst [vmem:[%s23_s1] sm:$0xf] %v4_v0 }

// kernel: tile.9
= control target key start
LH: loop header
LB: loop body
LE: loop exit
PB: predicated region body
PF: predicated region fallthrough
CT: control target
= control target key end

     0   :  { %vm8_vm0 = vcmask 64512   ;;  %s40_s8 = smov 8   ;;  %s41_s9 = smov 16   ;;  %vm14_vm1 = vcmask 261312   ;;  %vm20_vm2 = vcmask 195712   ;;  %vm26_vm3 = vcmask 130112   ;;  %s58_s0 = inlined_call_operand.vmem [shape: f32[4,8], index: 0, kind: input, shape index: {}]   ;;  %s59_s1 = inlined_call_operand.vmem [shape: f32[1,32], index: 1, kind: output, shape index: {}]  }
   0x1   :  { %v5_v0 = vld [vmem:[%s58_s0] sm:$0xf]  ;;  %s39_s0 = smov 24  }
   0x2   :  { %6 = vst [vmem:[#allocation1] sm:$0xf] %v5_v0 }
   0x9   :  { %v11_v1 = vld [vmem:[#allocation1 + $0x3] sm:$0x1]   ;;  %v23_v2 = vld [vmem:[#allocation1 + $0x1] sm:$0x1]   ;;  %v7_v3 = vld [vmem:[#allocation1] sm:$0x1]  }
   0xa   :  { %12 = vrot.lane.b32.xlu0 %v11_v1, %s39_s0  ;;  %24 = vrot.lane.b32.xlu1 %v23_v2, %s40_s8  ;;  %v17_v4 = vld [vmem:[#allocation1 + $0x2] sm:$0x1]   ;;  %9 = vst.msk [vmem:[#allocation0] sm:$0x1] %vm8_vm0, %v7_v3  }
   0xe   :  { %18 = vrot.lane.b32.xlu0 %v17_v4, %s41_s9 }
  0x7c   :  { %v13_v5 = vpop.permute.xlu0 %12   ;;  %v25_v6 = vpop.permute.xlu1 %24  }
  0x7d   :  { %15 = vst.msk [vmem:[#allocation0] sm:$0x1] %vm14_vm1, %v13_v5  }
  0x80   :  { %v19_v7 = vpop.permute.xlu0 %18  }
  0x81   :  { %21 = vst.msk [vmem:[#allocation0] sm:$0x1] %vm20_vm2, %v19_v7  }
  0x82   :  { %27 = vst.msk [vmem:[#allocation0] sm:$0x1] %vm26_vm3, %v25_v6  }
  0x89   :  { %v32_v8 = vld [vmem:[#allocation0] sm:$0x1] }
  0x8a   :  { %35 = vst [vmem:[%s59_s1] sm:$0x1] %v32_v8 }

// kernel: custom_bert_layer.5
= control target key start
LH: loop header
LB: loop body
LE: loop exit
PB: predicated region body
PF: predicated region fallthrough
CT: control target
= control target key end

     0   :  { %v458_v1 = vmov 0.0   ;;  %vm459_vm0 = vmmov 0   ;;  %vm63_vm1 = vcmask 261120   ;;  %s607_s0 = inlined_call_operand.vmem [shape: f32[16,32], index: 0, kind: input, shape index: {}]   ;;  %s608_s1 = inlined_call_operand.vmem [shape: f32[16,32], index: 1, kind: input, shape index: {}]   ;;  %s609_s2 = inlined_call_operand.vmem [shape: bf16[32,32], index: 2, kind: input, shape index: {}]   ;;  %s610_s3 = inlined_call_operand.vmem [shape: f32[1,32], index: 3, kind: input, shape index: {}]   ;;  %s611_s4 = inlined_call_operand.vmem [shape: bf16[32,64], index: 4, kind: input, shape index: {}]   ;;  %s612_s5 = inlined_call_operand.vmem [shape: f32[1,64], index: 5, kind: input, shape index: {}]   ;;  %s613_s6 = inlined_call_operand.vmem [shape: bf16[64,32], index: 6, kind: input, shape index: {}]   ;;  %s614_s7 = inlined_call_operand.vmem [shape: f32[1,32], index: 7, kind: input, shape index: {}]   ;;  %s615_s8 = inlined_call_operand.vmem [shape: f32[1,32], index: 8, kind: input, shape index: {}]   ;;  %s616_s9 = inlined_call_operand.vmem [shape: f32[1,32], index: 9, kind: input, shape index: {}]   ;;  %s617_s10 = inlined_call_operand.hbm [shape: f32[16,32], index: 10, kind: output, shape index: {}]  }
   0x1   :  { %v420_v0 = vld [vmem:[%s609_s2 + $0x8] sm:$0xff]   ;;  %387 = vmatprep.subr.bf16.mxu1 %v458_v1  ;;  %403 = vmatprep.subr.bf16.mxu0 %v458_v1  ;;  %v421_v2 = vld [vmem:[%s609_s2] sm:$0xff]  }
   0x2   :  { %388 = vmatpush3.bf16.msra.mxu1 %v420_v0  ;;  %391 = vmatprep.mubr.msk.bf16.mxu1 %vm459_vm0, %v458_v1  ;;  %v37_v3 = vld [vmem:[%s607_s0] sm:$0xff]  ;;  %v38_v4 = vld [vmem:[%s607_s0 + $0x8] sm:$0xff] }
   0x3   :  { %389 = vmatprep.subr.bf16.mxu1 %v458_v1  ;;  %411 = vmatprep.mubr.msk.bf16.mxu0 %vm459_vm0, %v458_v1  ;;  %v39_v5 = vpack.c.bf16 %v38_v4, %v37_v3 }
   0x6   :  { %390 = vmatpush3.bf16.msra.mxu1 %v421_v2 }
   0x7   :  { %395 = vmatprep.subr.bf16.mxu1 %v458_v1 }
   0x8   :  { %15 = vsyncpa [#allocation3], 0  ;;  %v360_v6 = vld [vmem:[%s610_s3] ss:$0 sm:$0xff]  ;;  %v109_v13 = vld [vmem:[%s608_s1 + $0x8] sm:$0xff]  ;;  %vm265_vm2 = vcmask 523264  }
   0x9   :  { %392 = vmatmul.mubr.msk.bf16.vlgmr.msra.gmra.mxu1 %vm63_vm1, %v39_v5  ;;  %v108_v8 = vld [vmem:[%s608_s1] sm:$0xff]  ;;  %v422_v29 = vld [vmem:[%s611_s4 + $0x8] sm:$0xff]   ;;  %v424_v31 = vld [vmem:[%s613_s6 + $0x18] sm:$0xff]  }
   0xa   :  { %399 = vmatprep.mubr.msk.bf16.mxu1 %vm459_vm0, %v458_v1  ;;  %396 = vmatpush3.bf16.msra.mxu1 %v422_v29  ;;  %v423_v30 = vld [vmem:[%s611_s4] sm:$0xff]   ;;  %v425_v32 = vld [vmem:[%s613_s6 + $0x10] sm:$0xff]   ;;  %v426_v50 = vld [vmem:[%s613_s6 + $0x8] sm:$0xff]  }
   0xb   :  { %397 = vmatprep.subr.bf16.mxu1 %v458_v1  ;;  %404 = vmatpush3.bf16.msra.mxu0 %v424_v31  ;;  %v569_v41 = vld [vmem:[%s615_s8] ss:$0 sm:$0xff] }
   0xc   :  { %405 = vmatprep.subr.bf16.mxu0 %v458_v1  ;;  %v575_v45 = vld [vmem:[%s616_s9] ss:$0 sm:$0xff] }
   0xd   :  { %v427_v51 = vld [vmem:[%s613_s6] sm:$0xff]  }
   0xe   :  { %398 = vmatpush3.bf16.msra.mxu1 %v423_v30  ;;  %v366_v53 = vld [vmem:[%s612_s5] ss:$0 sm:$0xff]  ;;  %s460_s5 = smov [#allocation2]  }
   0xf   :  { %406 = vmatpush3.bf16.msra.mxu0 %v425_v32  ;;  %v370_v60 = vld [vmem:[%s614_s7] ss:$0 sm:$0xff]  ;;  %s349_s6 = sshll.u32 %s460_s5, 4  ;;  %s350_s6 = int_to_ptr.vmem [resolvable:$true] %s349_s6 }
  0x10   :  { %407 = vmatprep.subr.bf16.mxu0 %v458_v1  ;;  %s436_s7 = scalar_lea.vmem %s350_s6, 256  ;;  %p441_p1 = scmp.lt.s32.totalorder %s350_s6, %s350_s6 }
  0x11   :  { %p437_p0 = scmp.ne.s32.totalorder %s350_s6, %s436_s7  ;;  %p442_p2 = scmp.lt.s32.totalorder %s436_s7, %s436_s7 }
  0x13   :  { %408 = vmatpush3.bf16.msra.mxu0 %v426_v50  ;;  %p443_p3 = por %p442_p2, %p441_p1 }
  0x14   :  { %409 = vmatprep.subr.bf16.mxu0 %v458_v1 }
  0x15   :  { %p444_p4 = pnand %p443_p3, %p437_p0 }
  0x17   :  { %410 = vmatpush3.bf16.msra.mxu0 %v427_v51 }
  0xc9   :  { %v101_v7 = vpop.f32.mrf.mxu1 }
  0xca   :  { %v102_v9 = vadd.f32 %v360_v6, %v101_v7 }
  0xcb   :  { %v393_v10 = vpop.f32.mrf.mxu1 }
  0xcc   :  { %v110_v11 = vadd.f32 %v108_v8, %v102_v9 }
  0xcd   :  { %v104_v12 = vpop.f32.mrf.mxu1 }
  0xce   :  { %v105_v14 = vadd.f32 %v360_v6, %v104_v12  ;;  %v112_v15 = vsel %vm63_vm1, %v110_v11, 0.0 }
  0xcf   :  { %113 = vadd.xlane.f32.xlu0 %v112_v15  ;;  %v394_v16 = vpop.f32.mrf.mxu1 }
  0xd0   :  { %v111_v17 = vadd.f32 %v109_v13, %v105_v14 }
  0xd2   :  { %v115_v18 = vsel %vm63_vm1, %v111_v17, 0.0 }
  0xd3   :  { %116 = vadd.xlane.f32.xlu0 %v115_v18 }
 0x158   :  { %v114_v19 = vpop.xlane.xlu0 %113 }
 0x159   :  { %v119_v20 = vmul.f32 0.03125, %v114_v19 }
 0x15b   :  { %v121_v21 = vsub.f32 %v110_v11, %v119_v20 }
 0x15c   :  { %v117_v22 = vpop.xlane.xlu0 %116 }
 0x15d   :  { %v120_v23 = vmul.f32 0.03125, %v117_v22  ;;  %v123_v24 = vmul.f32 %v121_v21, %v121_v21 }
 0x15f   :  { %v122_v25 = vsub.f32 %v111_v17, %v120_v23  ;;  %v125_v26 = vsel %vm63_vm1, %v123_v24, 0.0 }
 0x160   :  { %126 = vadd.xlane.f32.xlu1 %v125_v26 }
 0x161   :  { %v124_v27 = vmul.f32 %v122_v25, %v122_v25 }
 0x163   :  { %v128_v28 = vsel %vm63_vm1, %v124_v27, 0.0 }
 0x164   :  { %129 = vadd.xlane.f32.xlu1 %v128_v28 }
 0x1e9   :  { %v127_v33 = vpop.xlane.xlu1 %126 }
 0x1ea   :  { %v131_v34 = vmul.f32 0.03125, %v127_v33 }
 0x1ec   :  { %v133_v35 = vadd.f32 1e-12, %v131_v34 }
 0x1ed   :  { %v130_v36 = vpop.xlane.xlu1 %129 }
 0x1ee   :  { %428 = vrsqrt.f32 %v133_v35  ;;  %v132_v37 = vmul.f32 0.03125, %v130_v36 }
 0x1f0   :  { %v134_v38 = vadd.f32 1e-12, %v132_v37 }
 0x1f2   :  { %430 = vrsqrt.f32 %v134_v38 }
 0x1fb   :  { %v429_v39 = vpop.eup %428 }
 0x1fc   :  { %v137_v40 = vmul.f32 %v429_v39, %v121_v21 }
 0x1fe   :  { %v146_v44 = vmul.f32 %v569_v41, %v137_v40 }
 0x1ff   :  { %v431_v42 = vpop.eup %430 }
 0x200   :  { %v138_v43 = vmul.f32 %v431_v42, %v122_v25  ;;  %v155_v47 = vadd.f32 %v575_v45, %v146_v44 }
 0x202   :  { %v147_v46 = vmul.f32 %v569_v41, %v138_v43 }
 0x204   :  { %v156_v48 = vadd.f32 %v575_v45, %v147_v46 }
 0x206   :  { %v157_v49 = vpack.c.bf16 %v156_v48, %v155_v47 }
 0x208   :  { %400 = vmatmul.mubr.msk.bf16.vlgmr.msra.gmra.mxu1 %vm63_vm1, %v157_v49 }
 0x2c8   :  { %v218_v52 = vpop.f32.mrf.mxu1 }
 0x2c9   :  { %v219_v56 = vadd.f32 %v366_v53, %v218_v52 }
 0x2ca   :  { %v401_v54 = vpop.f32.mrf.mxu1 }
 0x2cc   :  { %v221_v55 = vpop.f32.mrf.mxu1 }
 0x2cd   :  { %v222_v57 = vadd.f32 %v366_v53, %v221_v55 }
 0x2ce   :  { %v402_v58 = vpop.f32.mrf.mxu1 }
 0x2cf   :  { %v225_v59 = vpack.c.bf16 %v222_v57, %v219_v56 }
 0x2d1   :  { %412 = vmatmul.mubr.msk.bf16.vlgmr.msra.gmra.mxu0 %vm265_vm2, %v225_v59 }
 0x391   :  { %v303_v61 = vpop.f32.mrf.mxu0 }
 0x392   :  { %v304_v62 = vadd.f32 %v370_v60, %v303_v61 }
 0x393   :  { %v413_v63 = vpop.f32.mrf.mxu0 }
 0x394   :  { %v310_v0 = vadd.f32 %v304_v62, %v155_v47 }
 0x395   :  { %v306_v1 = vpop.f32.mrf.mxu0 }
 0x396   :  { %v307_v2 = vadd.f32 %v370_v60, %v306_v1  ;;  %v312_v3 = vsel %vm63_vm1, %v310_v0, 0.0 }
 0x397   :  { %313 = vadd.xlane.f32.xlu0 %v312_v3  ;;  %v414_v4 = vpop.f32.mrf.mxu0 }
 0x398   :  { %v311_v5 = vadd.f32 %v307_v2, %v156_v48 }
 0x39a   :  { %v315_v6 = vsel %vm63_vm1, %v311_v5, 0.0 }
 0x39b   :  { %316 = vadd.xlane.f32.xlu1 %v315_v6 }
 0x420   :  { %v314_v7 = vpop.xlane.xlu0 %313 }
 0x421   :  { %v318_v8 = vmul.f32 0.03125, %v314_v7 }
 0x423   :  { %v320_v9 = vsub.f32 %v310_v0, %v318_v8 }
 0x424   :  { %v317_v10 = vpop.xlane.xlu1 %316 }
 0x425   :  { %v319_v11 = vmul.f32 0.03125, %v317_v10  ;;  %v322_v12 = vmul.f32 %v320_v9, %v320_v9 }
 0x427   :  { %v321_v13 = vsub.f32 %v311_v5, %v319_v11  ;;  %v324_v14 = vsel %vm63_vm1, %v322_v12, 0.0 }
 0x428   :  { %325 = vadd.xlane.f32.xlu0 %v324_v14 }
 0x429   :  { %v323_v15 = vmul.f32 %v321_v13, %v321_v13 }
 0x42b   :  { %v327_v16 = vsel %vm63_vm1, %v323_v15, 0.0 }
 0x42c   :  { %328 = vadd.xlane.f32.xlu1 %v327_v16 }
 0x4b1   :  { %v326_v17 = vpop.xlane.xlu0 %325 }
 0x4b2   :  { %v330_v18 = vmul.f32 0.03125, %v326_v17 }
 0x4b4   :  { %v332_v19 = vadd.f32 1e-12, %v330_v18 }
 0x4b5   :  { %v329_v20 = vpop.xlane.xlu1 %328 }
 0x4b6   :  { %432 = vrsqrt.f32 %v332_v19  ;;  %v331_v21 = vmul.f32 0.03125, %v329_v20 }
 0x4b8   :  { %v333_v22 = vadd.f32 1e-12, %v331_v21 }
 0x4ba   :  { %434 = vrsqrt.f32 %v333_v22 }
 0x4c3   :  { %v433_v23 = vpop.eup %432 }
 0x4c4   :  { %v336_v24 = vmul.f32 %v433_v23, %v320_v9 }
 0x4c6   :  { %v338_v25 = vmul.f32 %v569_v41, %v336_v24 }
 0x4c7   :  { %v435_v26 = vpop.eup %434 }
 0x4c8   :  { %v337_v27 = vmul.f32 %v435_v26, %v321_v13  ;;  %v340_v28 = vadd.f32 %v575_v45, %v338_v25 }
 0x4ca   :  { %v339_v29 = vmul.f32 %v569_v41, %v337_v27  ;;  %342 = vst.msk [vmem:[#allocation2] sm:$0xff] %vm63_vm1, %v340_v28 }
 0x4cc   :  { %v341_v30 = vadd.f32 %v575_v45, %v339_v29 }
 0x4ce   :  { %343 = vst.msk [vmem:[#allocation2 + $0x8] sm:$0xff] %vm63_vm1, %v341_v30 }
 0x4cf   :  { %447 = shalt.err (!%p444_p4)
}
 0x4d0   :  { %s461_s20 = smov 128   ;;  %s462_s2 = smov 8  }
 0x4d1   :  { %355 = dma.vmem_to_hbm [thread:$0]  %s350_s6, 256, %s617_s10, [#allocation3], %s461_s20, %s461_s20, %s462_s2  }
 0x4d2   :  { %456 = dma.done.wait [#allocation3], 256  }
 0x4d3   :  { %457 = vsyncadd [#allocation3], 4294967040 }
 0x4d4   :  { %359 = vsyncpa [#allocation3], 1 }

// kernel: custom_bert_layer.4
= control target key start
LH: loop header
LB: loop body
LE: loop exit
PB: predicated region body
PF: predicated region fallthrough
CT: control target
= control target key end

     0   :  { %s1046_s12 = smov 0   ;;  %s1048_s13 = smov 0   ;;  %s1210_s0 = inlined_call_operand.vmem [shape: f32[2,8,96], index: 0, kind: input, shape index: {}]   ;;  %s1211_s1 = inlined_call_operand.vmem [shape: f32[32,32], index: 1, kind: input, shape index: {}]   ;;  %s1212_s2 = inlined_call_operand.vmem [shape: f32[1,32], index: 2, kind: input, shape index: {}]   ;;  %s1213_s3 = inlined_call_operand.vmem [shape: f32[2,4,8,8], index: 3, kind: output, shape index: {}]  }
   0x1   :  { %s1050_s14 = smov 0  }
   0x2 LB: > { %s25_s15 = sadd.s32 1, %s1010_s13  ;;  %p853_p0 = scmp.ge.s32.totalorder %s1014_s14, 1  ;;  %s1014_s14 = sphi %s1050_s14, %s13_s14   ;;  %s1010_s13 = sphi %s1048_s13, %s1215_s13   ;;  %s1006_s12 = sphi %s1046_s12, %s1214_s12  }
   0x3   : > { %p27_p1 = scmp.ge.s32.totalorder %s25_s15, 2  ;;  %p155_p2 = scmp.lt.s32.totalorder %s1014_s14, 3 }
   0x5   : > { %s1217_s15 = smov (%p27_p1, %s25_s15), 0  ;;  %p156_p3 = pnand %p853_p0, %p155_p2 }
   0x6   : > { %p184_p4 = scmp.lt.s32.totalorder (!%p156_p3), %s1006_s12, 1  ;;  %s1018_s28 = smov (!%p156_p3), 96  }
   0x7   : > { %159 = sbr.rel (%p156_p3) target bundleno = 1316 (0x524), region = 32  ;;  %s1019_s4 = smov (!%p156_p3), 120  }
   0x8   : > { %s1020_s5 = smov (!%p156_p3), 112   ;;  %s1021_s6 = smov (!%p156_p3), 104  }
   0x9   : > { %s1022_s7 = smov (!%p156_p3), 16   ;;  %s1023_s8 = smov (!%p156_p3), 8  }
   0xa   : > { %s1024_s9 = smov (!%p156_p3), 24   ;;  %s1025_s10 = smov (!%p156_p3), 64  }
   0xc   : > { %v203_v0 = vld [vmem:[%s1211_s1 + $0x18] sm:$0xff]  ;;  %v1016_v1 = vmov 0.0   ;;  %v202_v2 = vld [vmem:[%s1211_s1 + $0x10] sm:$0xff]  ;;  %s1219_s12 = smov (!%p184_p4, %s1006_s12), 1  ;;  %vm1017_vm0 = vmmov 0   ;;  %v201_v3 = vld [vmem:[%s1211_s1 + $0x8] sm:$0xff] }
   0xd   : > { %876 = vmatprep.subr.mxu0 %v1016_v1  ;;  %887 = vmatprep.subr.mxu1 %v1016_v1  ;;  %s854_s22 = sshll.u32 %s1219_s12, 3  ;;  %v200_v4 = vld [vmem:[%s1211_s1] sm:$0xff]  ;;  %vm211_vm1 = vcmask 261120   ;;  %vm364_vm2 = vcmask 64512   ;;  %s865_s11 = sshll.u32 %s1219_s12, 5 }
   0xe   : > { %877 = vmatpush3.msra.mxu0 %v203_v0  ;;  %884 = vmatprep.mubr.msk.f32.mxu0 %vm1017_vm0, %v1016_v1  ;;  %s190_s25 = scalar_lea.vmem %s1210_s0, %s854_s22  ;;  %v857_v7 = vld [vmem:[%s1212_s2] ss:$0 sm:$0xff]  ;;  %s198_s18 = scalar_lea.vmem %s1213_s3, %s865_s11 }
   0xf   : > { %878 = vmatprep.subr.mxu0 %v1016_v1  ;;  %888 = vmatpush3.msra.mxu1 %v203_v0  ;;  %v1083_v5 = vld [vmem:[%s190_s25] sm:$0xff] }
  0x10   : > { %879 = vmatpush3.msra.mxu0 %v202_v2  ;;  %889 = vmatprep.subr.mxu1 %v1016_v1 }
  0x11   : > { %880 = vmatprep.subr.mxu0 %v1016_v1  ;;  %890 = vmatpush3.msra.mxu1 %v202_v2 }
  0x12   : > { %881 = vmatpush3.msra.mxu0 %v201_v3  ;;  %891 = vmatprep.subr.mxu1 %v1016_v1 }
  0x13   : > { %882 = vmatprep.subr.mxu0 %v1016_v1  ;;  %287 = vrot.lane.b32.xlu0 %v1083_v5, %s1018_s28 }
  0x14   : > { %883 = vmatpush3.msra.mxu0 %v200_v4  ;;  %892 = vmatpush3.msra.mxu1 %v201_v3 }
  0x15   : > { %885 = vmatmul.mubr.msk.f32.vlgmr.msra.gmra.mxu0 %vm211_vm1, %v1083_v5  ;;  %893 = vmatprep.subr.mxu1 %v1016_v1 }
  0x16   : > { %894 = vmatpush3.msra.mxu1 %v200_v4  ;;  %895 = vmatprep.mubr.msk.f32.mxu1 %vm1017_vm0, %v1016_v1 }
  0x85   : > { %v288_v6 = vpop.permute.xlu0 %287 }
  0x86   : > { %896 = vmatmul.mubr.msk.f32.vlgmr.msra.gmra.mxu1 %vm211_vm1, %v288_v6 }
  0xd5   : > { %v281_v8 = vpop.f32.mrf.mxu0 }
  0xd6   : > { %v282_v9 = vadd.f32 %v857_v7, %v281_v8 }
  0xd7   : > { %v886_v10 = vpop.f32.mrf.mxu0 }
  0xd8   : > { %v285_v11 = vmul.f32 1.442695, %v282_v9 }
  0xda   : > { %932 = vpow2.f32 %v285_v11 }
  0xe7   : > { %v1091_v12 = vpop.eup %932 }
  0xe8   : > { %v363_v13 = vmul.f32 %v1091_v12, %v1091_v12 }
  0xea   : > { %v365_v14 = vsel %vm364_vm2, %v363_v13, 0.0  ;;  %377 = vrot.lane.b32.xlu1 %v363_v13, %s1019_s4 }
  0xeb   : > { %366 = vadd.xlane.f32.xlu0 %v365_v14 }
  0xee   : > { %394 = vrot.lane.b32.xlu1 %v363_v13, %s1020_s5 }
  0xf2   : > { %410 = vrot.lane.b32.xlu1 %v363_v13, %s1021_s6 }
 0x146   : > { %v357_v15 = vpop.f32.mrf.mxu1 }
 0x147   : > { %v358_v16 = vadd.f32 %v857_v7, %v357_v15 }
 0x148   : > { %v897_v17 = vpop.f32.mrf.mxu1 }
 0x149   : > { %v361_v18 = vmul.f32 1.442695, %v358_v16 }
 0x14b   : > { %934 = vpow2.f32 %v361_v18 }
 0x158   : > { %v935_v19 = vpop.eup %934 }
 0x159   : > { %v370_v20 = vmul.f32 %v935_v19, %v935_v19 }
 0x15b   : > { %386 = vrot.lane.b32.xlu0 %v370_v20, %s1019_s4  ;;  %v371_v21 = vsel %vm364_vm2, %v370_v20, 0.0 }
 0x15c   : > { %372 = vadd.xlane.f32.xlu1 %v371_v21  ;;  %v378_v22 = vpop.permute.xlu1 %377 }
 0x15d   : > { %v380_v23 = vsel %vm364_vm2, %v378_v22, 0.0 }
 0x15f   : > { %402 = vrot.lane.b32.xlu0 %v370_v20, %s1020_s5 }
 0x160   : > { %381 = vadd.xlane.f32.xlu1 %v380_v23  ;;  %v395_v24 = vpop.permute.xlu1 %394 }
 0x161   : > { %v397_v25 = vsel %vm364_vm2, %v395_v24, 0.0 }
 0x163   : > { %418 = vrot.lane.b32.xlu0 %v370_v20, %s1021_s6 }
 0x164   : > { %398 = vadd.xlane.f32.xlu1 %v397_v25  ;;  %v411_v26 = vpop.permute.xlu1 %410 }
 0x165   : > { %v413_v27 = vsel %vm364_vm2, %v411_v26, 0.0 }
 0x168   : > { %414 = vadd.xlane.f32.xlu1 %v413_v27 }
 0x174   : > { %v367_v28 = vpop.xlane.xlu0 %366 }
 0x1cd   : > { %v387_v29 = vpop.permute.xlu0 %386 }
 0x1ce   : > { %v389_v30 = vsel %vm364_vm2, %v387_v29, 0.0 }
 0x1cf   : > { %390 = vadd.xlane.f32.xlu0 %v389_v30 }
 0x1d1   : > { %v403_v31 = vpop.permute.xlu0 %402 }
 0x1d2   : > { %v405_v32 = vsel %vm364_vm2, %v403_v31, 0.0 }
 0x1d3   : > { %406 = vadd.xlane.f32.xlu0 %v405_v32 }
 0x1d5   : > { %v419_v33 = vpop.permute.xlu0 %418 }
 0x1d6   : > { %v421_v34 = vsel %vm364_vm2, %v419_v33, 0.0 }
 0x1d7   : > { %422 = vadd.xlane.f32.xlu0 %v421_v34 }
 0x1e5   : > { %v373_v35 = vpop.xlane.xlu1 %372 }
 0x1e6   : > { %936 = vrsqrt.f32 %v373_v35 }
 0x1e7   : > { %938 = vrsqrt.f32 %v367_v28 }
 0x1e9   : > { %v382_v43 = vpop.xlane.xlu1 %381 }
 0x1ed   : > { %v399_v45 = vpop.xlane.xlu1 %398 }
 0x1f1   : > { %v415_v48 = vpop.xlane.xlu1 %414 }
 0x1f3   : > { %v937_v36 = vpop.eup %936 }
 0x1f4   : > { %v375_v37 = vmul.f32 %v937_v36, %v935_v19  ;;  %v939_v38 = vpop.eup %938 }
 0x1f5   : > { %v1112_v39 = vmul.f32 %v939_v38, %v1091_v12 }
 0x1f6   : > { %591 = vrot.lane.b32.xlu1 %v375_v37, %s1022_s7  ;;  %502 = vrot.lane.b32.xlu0 %v375_v37, %s1023_s8 }
 0x1f7   : > { %v426_v40 = vmul.f32 %v375_v37, %v1112_v39 }
 0x1f9   : > { %v427_v41 = vsel %vm364_vm2, %v426_v40, 0.0 }
 0x1fa   : > { %680 = vrot.lane.b32.xlu1 %v375_v37, %s1024_s9 }
 0x21e   : > { %428 = vadd.xlane.f32.xlu1 %v427_v41 }
 0x258   : > { %v391_v42 = vpop.xlane.xlu0 %390 }
 0x259   : > { %940 = vrsqrt.f32 %v391_v42 }
 0x25c   : > { %v407_v44 = vpop.xlane.xlu0 %406 }
 0x25d   : > { %942 = vrsqrt.f32 %v407_v44 }
 0x25e   : > { %944 = vrsqrt.f32 %v382_v43 }
 0x260   : > { %v423_v46 = vpop.xlane.xlu0 %422 }
 0x261   : > { %946 = vrsqrt.f32 %v423_v46 }
 0x262   : > { %948 = vrsqrt.f32 %v399_v45 }
 0x263   : > { %950 = vrsqrt.f32 %v415_v48 }
 0x266   : > { %v941_v47 = vpop.eup %940 }
 0x267   : > { %v393_v49 = vmul.f32 %v941_v47, %v935_v19 }
 0x268   : > { %v503_v55 = vpop.permute.xlu0 %502  ;;  %v592_v58 = vpop.permute.xlu1 %591 }
 0x269   : > { %431 = vrot.lane.b32.xlu1 %v393_v49, %s1019_s4 }
 0x26a   : > { %v943_v50 = vpop.eup %942 }
 0x26b   : > { %v409_v51 = vmul.f32 %v943_v50, %v935_v19  ;;  %v945_v52 = vpop.eup %944 }
 0x26c   : > { %v384_v56 = vmul.f32 %v945_v52, %v1091_v12  ;;  %v681_v63 = vpop.permute.xlu1 %680 }
 0x26d   : > { %439 = vrot.lane.b32.xlu0 %v409_v51, %s1020_s5 }
 0x26e   : > { %v947_v53 = vpop.eup %946  ;;  %v505_v59 = vmul.f32 %v503_v55, %v384_v56  ;;  %v513_v3 = vmul.f32 %v393_v49, %v384_v56 }
 0x26f   : > { %v425_v54 = vmul.f32 %v947_v53, %v935_v19  ;;  %v949_v57 = vpop.eup %948 }
 0x270   : > { %v401_v60 = vmul.f32 %v949_v57, %v1091_v12  ;;  %v951_v61 = vpop.eup %950 }
 0x271   : > { %621 = vrot.lane.b32.xlu0 %v425_v54, %s1019_s4  ;;  %447 = vrot.lane.b32.xlu1 %v425_v54, %s1021_s6  ;;  %v417_v0 = vmul.f32 %v951_v61, %v1091_v12 }
 0x272   : > { %v594_v62 = vmul.f32 %v592_v58, %v401_v60  ;;  %v613_v2 = vmul.f32 %v409_v51, %v401_v60 }
 0x273   : > { %v683_v1 = vmul.f32 %v681_v63, %v417_v0  ;;  %v713_v21 = vmul.f32 %v425_v54, %v417_v0 }
 0x275   : > { %602 = vrot.lane.b32.xlu1 %v393_v49, %s1023_s8  ;;  %507 = vrot.lane.b32.xlu0 %v505_v59, %s1019_s4 }
 0x279   : > { %691 = vrot.lane.b32.xlu1 %v393_v49, %s1022_s7  ;;  %596 = vrot.lane.b32.xlu0 %v594_v62, %s1020_s5 }
 0x27d   : > { %521 = vrot.lane.b32.xlu1 %v409_v51, %s1019_s4  ;;  %685 = vrot.lane.b32.xlu0 %v683_v1, %s1021_s6 }
 0x281   : > { %702 = vrot.lane.b32.xlu1 %v409_v51, %s1023_s8  ;;  %615 = vrot.lane.b32.xlu0 %v613_v2, %s1020_s5 }
 0x285   : > { %532 = vrot.lane.b32.xlu1 %v425_v54, %s1020_s5 }
 0x289   : > { %515 = vrot.lane.b32.xlu1 %v513_v3, %s1019_s4 }
 0x2a7   : > { %v1133_v4 = vpop.xlane.xlu1 %428 }
 0x2db   : > { %v432_v6 = vpop.permute.xlu1 %431 }
 0x2dc   : > { %v434_v23 = vmul.f32 %v432_v6, %v1112_v39 }
 0x2de   : > { %v435_v26 = vsel %vm364_vm2, %v434_v23, 0.0 }
 0x2df   : > { %v440_v15 = vpop.permute.xlu0 %439 }
 0x2e0   : > { %v442_v30 = vmul.f32 %v440_v15, %v1112_v39 }
 0x2e2   : > { %v443_v33 = vsel %vm364_vm2, %v442_v30, 0.0 }
 0x2e3   : > { %v448_v7 = vpop.permute.xlu1 %447  ;;  %v622_v19 = vpop.permute.xlu0 %621 }
 0x2e4   : > { %v624_v20 = vmul.f32 %v622_v19, %v401_v60  ;;  %v450_v25 = vmul.f32 %v448_v7, %v1112_v39 }
 0x2e6   : > { %v451_v28 = vsel %vm364_vm2, %v450_v25, 0.0 }
 0x2e7   : > { %v603_v8 = vpop.permute.xlu1 %602  ;;  %v508_v22 = vpop.permute.xlu0 %507 }
 0x2e8   : > { %v605_v13 = vmul.f32 %v603_v8, %v401_v60  ;;  %v510_v35 = vsel %vm364_vm2, %v508_v22, 0.0 }
 0x2eb   : > { %v692_v9 = vpop.permute.xlu1 %691  ;;  %v597_v24 = vpop.permute.xlu0 %596 }
 0x2ec   : > { %v694_v16 = vmul.f32 %v692_v9, %v417_v0  ;;  %v599_v36 = vsel %vm364_vm2, %v597_v24, 0.0 }
 0x2ef   : > { %v522_v10 = vpop.permute.xlu1 %521  ;;  %v686_v27 = vpop.permute.xlu0 %685 }
 0x2f0   : > { %v524_v11 = vmul.f32 %v522_v10, %v384_v56  ;;  %v688_v37 = vsel %vm364_vm2, %v686_v27, 0.0 }
 0x2f2   : > { %526 = vrot.lane.b32.xlu0 %v524_v11, %s1019_s4 }
 0x2f3   : > { %v703_v12 = vpop.permute.xlu1 %702  ;;  %v616_v32 = vpop.permute.xlu0 %615 }
 0x2f4   : > { %v705_v14 = vmul.f32 %v703_v12, %v417_v0  ;;  %v618_v34 = vsel %vm364_vm2, %v616_v32, 0.0 }
 0x2f6   : > { %707 = vrot.lane.b32.xlu1 %v705_v14, %s1021_s6  ;;  %607 = vrot.lane.b32.xlu0 %v605_v13, %s1020_s5 }
 0x2f7   : > { %v533_v17 = vpop.permute.xlu1 %532 }
 0x2f8   : > { %v535_v18 = vmul.f32 %v533_v17, %v384_v56 }
 0x2fa   : > { %696 = vrot.lane.b32.xlu0 %v694_v16, %s1021_s6 }
 0x2fb   : > { %v516_v29 = vpop.permute.xlu1 %515 }
 0x2fc   : > { %v518_v31 = vsel %vm364_vm2, %v516_v29, 0.0 }
 0x2fe   : > { %537 = vrot.lane.b32.xlu0 %v535_v18, %s1019_s4 }
 0x302   : > { %626 = vrot.lane.b32.xlu0 %v624_v20, %s1020_s5 }
 0x306   : > { %715 = vrot.lane.b32.xlu0 %v713_v21, %s1021_s6 }
 0x31a   : > { %436 = vadd.xlane.f32.xlu1 %v435_v26 }
 0x31e   : > { %452 = vadd.xlane.f32.xlu1 %v451_v28 }
 0x322   : > { %519 = vadd.xlane.f32.xlu1 %v518_v31 }
 0x325   : > { %444 = vadd.xlane.f32.xlu0 %v443_v33 }
 0x326   : > { %619 = vadd.xlane.f32.xlu1 %v618_v34 }
 0x329   : > { %511 = vadd.xlane.f32.xlu0 %v510_v35 }
 0x32d   : > { %600 = vadd.xlane.f32.xlu0 %v599_v36 }
 0x331   : > { %689 = vadd.xlane.f32.xlu0 %v688_v37 }
 0x364   : > { %v527_v38 = vpop.permute.xlu0 %526 }
 0x365   : > { %v529_v39 = vsel %vm364_vm2, %v527_v38, 0.0 }
 0x366   : > { %530 = vadd.xlane.f32.xlu0 %v529_v39 }
 0x368   : > { %v608_v40 = vpop.permute.xlu0 %607  ;;  %v708_v43 = vpop.permute.xlu1 %707 }
 0x369   : > { %v710_v45 = vsel %vm364_vm2, %v708_v43, 0.0  ;;  %v610_v48 = vsel %vm364_vm2, %v608_v40, 0.0 }
 0x36c   : > { %v697_v41 = vpop.permute.xlu0 %696 }
 0x36d   : > { %v699_v42 = vsel %vm364_vm2, %v697_v41, 0.0 }
 0x36e   : > { %700 = vadd.xlane.f32.xlu0 %v699_v42 }
 0x370   : > { %v538_v44 = vpop.permute.xlu0 %537 }
 0x371   : > { %v540_v46 = vsel %vm364_vm2, %v538_v44, 0.0 }
 0x372   : > { %711 = vadd.xlane.f32.xlu0 %v710_v45  ;;  %541 = vadd.xlane.f32.xlu1 %v540_v46 }
 0x374   : > { %v627_v47 = vpop.permute.xlu0 %626 }
 0x375   : > { %v629_v50 = vsel %vm364_vm2, %v627_v47, 0.0 }
 0x376   : > { %611 = vadd.xlane.f32.xlu1 %v610_v48 }
 0x378   : > { %v716_v49 = vpop.permute.xlu0 %715 }
 0x379   : > { %v718_v51 = vsel %vm364_vm2, %v716_v49, 0.0 }
 0x37a   : > { %630 = vadd.xlane.f32.xlu1 %v629_v50  ;;  %719 = vadd.xlane.f32.xlu0 %v718_v51 }
 0x3a3   : > { %v437_v52 = vpop.xlane.xlu1 %436 }
 0x3a4   : > { %v454_v53 = vmax.f32 %v1133_v4, %v437_v52 }
 0x3a7   : > { %v453_v56 = vpop.xlane.xlu1 %452 }
 0x3ab   : > { %v520_v20 = vpop.xlane.xlu1 %519 }
 0x3ae   : > { %v445_v54 = vpop.xlane.xlu0 %444 }
 0x3af   : > { %v455_v55 = vmax.f32 %v454_v53, %v445_v54  ;;  %v620_v23 = vpop.xlane.xlu1 %619 }
 0x3b1   : > { %v456_v57 = vmax.f32 %v455_v55, %v453_v56 }
 0x3b2   : > { %v512_v18 = vpop.xlane.xlu0 %511 }
 0x3b3   : > { %v457_v58 = vsub.f32 %v1133_v4, %v456_v57  ;;  %v460_v59 = vsub.f32 %v437_v52, %v456_v57  ;;  %v463_v60 = vsub.f32 %v445_v54, %v456_v57  ;;  %v466_v61 = vsub.f32 %v453_v56, %v456_v57 }
 0x3b4   : > { %v543_v24 = vmax.f32 %v512_v18, %v520_v20 }
 0x3b5   : > { %v458_v62 = vmul.f32 1.442695, %v457_v58  ;;  %v461_v63 = vmul.f32 1.442695, %v460_v59  ;;  %v464_v0 = vmul.f32 1.442695, %v463_v60 }
 0x3b6   : > { %v467_v1 = vmul.f32 1.442695, %v466_v61  ;;  %v601_v19 = vpop.xlane.xlu0 %600 }
 0x3b7   : > { %952 = vpow2.f32 %v458_v62 }
 0x3b8   : > { %954 = vpow2.f32 %v461_v63 }
 0x3b9   : > { %956 = vpow2.f32 %v464_v0 }
 0x3ba   : > { %958 = vpow2.f32 %v467_v1  ;;  %v690_v21 = vpop.xlane.xlu0 %689 }
 0x3c4   : > { %v953_v2 = vpop.eup %952 }
 0x3c5   : > { %v955_v3 = vpop.eup %954 }
 0x3c6   : > { %v469_v6 = vadd.f32 %v955_v3, %v953_v2  ;;  %v957_v7 = vpop.eup %956 }
 0x3c7   : > { %v959_v9 = vpop.eup %958 }
 0x3c8   : > { %v470_v8 = vadd.f32 %v957_v7, %v469_v6 }
 0x3ca   : > { %v471_v10 = vadd.f32 %v959_v9, %v470_v8 }
 0x3cc   : > { %960 = vrcp.f32 %v471_v10 }
 0x3d9   : > { %v961_v4 = vpop.eup %960 }
 0x3da   : > { %v475_v11 = vmul.f32 %v961_v4, %v955_v3  ;;  %v1162_v12 = vmul.f32 %v961_v4, %v953_v2  ;;  %v482_v14 = vmul.f32 %v961_v4, %v957_v7  ;;  %v489_v16 = vmul.f32 %v961_v4, %v959_v9 }
 0x3dc   : > { %v476_v13 = vmul.f32 %v475_v11, %v1083_v5  ;;  %v483_v15 = vmul.f32 %v482_v14, %v1083_v5  ;;  %v490_v17 = vmul.f32 %v489_v16, %v1083_v5 }
 0x3de   : > { %478 = vrot.lane.b32.xlu0 %v476_v13, %s1019_s4 }
 0x3e2   : > { %485 = vrot.lane.b32.xlu0 %v483_v15, %s1020_s5 }
 0x3e6   : > { %492 = vrot.lane.b32.xlu0 %v490_v17, %s1021_s6 }
 0x3ef   : > { %v531_v22 = vpop.xlane.xlu0 %530 }
 0x3f0   : > { %v544_v26 = vmax.f32 %v543_v24, %v531_v22 }
 0x3f7   : > { %v701_v25 = vpop.xlane.xlu0 %700 }
 0x3f8   : > { %v721_v35 = vmax.f32 %v690_v21, %v701_v25 }
 0x3fb   : > { %v542_v27 = vpop.xlane.xlu1 %541  ;;  %v712_v33 = vpop.xlane.xlu0 %711 }
 0x3fc   : > { %v545_v28 = vmax.f32 %v544_v26, %v542_v27  ;;  %v722_v40 = vmax.f32 %v721_v35, %v712_v33 }
 0x3fe   : > { %v546_v29 = vsub.f32 %v512_v18, %v545_v28  ;;  %v549_v30 = vsub.f32 %v520_v20, %v545_v28  ;;  %v552_v31 = vsub.f32 %v531_v22, %v545_v28  ;;  %v555_v32 = vsub.f32 %v542_v27, %v545_v28 }
 0x3ff   : > { %v612_v34 = vpop.xlane.xlu1 %611 }
 0x400   : > { %v547_v36 = vmul.f32 1.442695, %v546_v29  ;;  %v550_v37 = vmul.f32 1.442695, %v549_v30  ;;  %v632_v38 = vmax.f32 %v601_v19, %v612_v34  ;;  %v553_v39 = vmul.f32 1.442695, %v552_v31 }
 0x401   : > { %v556_v42 = vmul.f32 1.442695, %v555_v32 }
 0x402   : > { %962 = vpow2.f32 %v547_v36  ;;  %v633_v41 = vmax.f32 %v632_v38, %v620_v23 }
 0x403   : > { %964 = vpow2.f32 %v550_v37  ;;  %v631_v43 = vpop.xlane.xlu1 %630  ;;  %v720_v44 = vpop.xlane.xlu0 %719 }
 0x404   : > { %v634_v45 = vmax.f32 %v633_v41, %v631_v43  ;;  %v723_v46 = vmax.f32 %v722_v40, %v720_v44  ;;  %966 = vpow2.f32 %v553_v39 }
 0x405   : > { %968 = vpow2.f32 %v556_v42 }
 0x406   : > { %v635_v47 = vsub.f32 %v601_v19, %v634_v45  ;;  %v638_v48 = vsub.f32 %v612_v34, %v634_v45  ;;  %v641_v49 = vsub.f32 %v620_v23, %v634_v45  ;;  %v644_v50 = vsub.f32 %v631_v43, %v634_v45 }
 0x407   : > { %v724_v51 = vsub.f32 %v690_v21, %v723_v46  ;;  %v727_v52 = vsub.f32 %v701_v25, %v723_v46  ;;  %v730_v57 = vsub.f32 %v712_v33, %v723_v46  ;;  %v733_v60 = vsub.f32 %v720_v44, %v723_v46 }
 0x408   : > { %v636_v53 = vmul.f32 1.442695, %v635_v47  ;;  %v639_v54 = vmul.f32 1.442695, %v638_v48  ;;  %v642_v55 = vmul.f32 1.442695, %v641_v49  ;;  %v474_v47 = vmul.f32 %v1162_v12, %v1083_v5 }
 0x409   : > { %v645_v56 = vmul.f32 1.442695, %v644_v50  ;;  %v725_v58 = vmul.f32 1.442695, %v724_v51  ;;  %v728_v59 = vmul.f32 1.442695, %v727_v52 }
 0x40a   : > { %970 = vpow2.f32 %v636_v53  ;;  %v731_v61 = vmul.f32 1.442695, %v730_v57  ;;  %v734_v63 = vmul.f32 1.442695, %v733_v60 }
 0x40b   : > { %972 = vpow2.f32 %v639_v54 }
 0x40c   : > { %974 = vpow2.f32 %v642_v55 }
 0x40d   : > { %976 = vpow2.f32 %v645_v56 }
 0x40e   : > { %978 = vpow2.f32 %v725_v58 }
 0x40f   : > { %v963_v62 = vpop.eup %962  ;;  %980 = vpow2.f32 %v728_v59 }
 0x410   : > { %v965_v0 = vpop.eup %964  ;;  %982 = vpow2.f32 %v731_v61 }
 0x411   : > { %v558_v1 = vadd.f32 %v965_v0, %v963_v62  ;;  %v967_v2 = vpop.eup %966  ;;  %984 = vpow2.f32 %v734_v63 }
 0x412   : > { %v969_v6 = vpop.eup %968 }
 0x413   : > { %v559_v3 = vadd.f32 %v967_v2, %v558_v1 }
 0x415   : > { %v560_v7 = vadd.f32 %v969_v6, %v559_v3 }
 0x417   : > { %v971_v8 = vpop.eup %970  ;;  %986 = vrcp.f32 %v560_v7 }
 0x418   : > { %v973_v9 = vpop.eup %972 }
 0x419   : > { %v975_v10 = vpop.eup %974  ;;  %v647_v4 = vadd.f32 %v973_v9, %v971_v8 }
 0x41a   : > { %v977_v11 = vpop.eup %976 }
 0x41b   : > { %v979_v13 = vpop.eup %978  ;;  %v648_v14 = vadd.f32 %v975_v10, %v647_v4 }
 0x41c   : > { %v981_v15 = vpop.eup %980 }
 0x41d   : > { %v649_v16 = vadd.f32 %v977_v11, %v648_v14  ;;  %v736_v17 = vadd.f32 %v981_v15, %v979_v13  ;;  %v983_v18 = vpop.eup %982 }
 0x41e   : > { %v985_v20 = vpop.eup %984 }
 0x41f   : > { %988 = vrcp.f32 %v649_v16  ;;  %v737_v19 = vadd.f32 %v983_v18, %v736_v17 }
 0x421   : > { %v738_v21 = vadd.f32 %v985_v20, %v737_v19 }
 0x423   : > { %990 = vrcp.f32 %v738_v21 }
 0x424   : > { %v987_v22 = vpop.eup %986 }
 0x425   : > { %v571_v23 = vmul.f32 %v987_v22, %v967_v2  ;;  %v564_v24 = vmul.f32 %v987_v22, %v965_v0  ;;  %v562_v25 = vmul.f32 %v987_v22, %v963_v62  ;;  %v578_v28 = vmul.f32 %v987_v22, %v969_v6 }
 0x427   : > { %v572_v26 = vmul.f32 %v571_v23, %v1083_v5  ;;  %v565_v27 = vmul.f32 %v564_v24, %v1083_v5  ;;  %v579_v29 = vmul.f32 %v578_v28, %v1083_v5  ;;  %v563_v53 = vmul.f32 %v562_v25, %v1083_v5 }
 0x429   : > { %574 = vrot.lane.b32.xlu1 %v572_v26, %s1020_s5  ;;  %567 = vrot.lane.b32.xlu0 %v565_v27, %s1019_s4 }
 0x42c   : > { %v989_v30 = vpop.eup %988 }
 0x42d   : > { %581 = vrot.lane.b32.xlu0 %v579_v29, %s1021_s6  ;;  %v653_v31 = vmul.f32 %v989_v30, %v973_v9  ;;  %v660_v32 = vmul.f32 %v989_v30, %v975_v10  ;;  %v651_v33 = vmul.f32 %v989_v30, %v971_v8  ;;  %v667_v36 = vmul.f32 %v989_v30, %v977_v11 }
 0x42f   : > { %v654_v34 = vmul.f32 %v653_v31, %v1083_v5  ;;  %v661_v35 = vmul.f32 %v660_v32, %v1083_v5  ;;  %v668_v40 = vmul.f32 %v667_v36, %v1083_v5  ;;  %v652_v60 = vmul.f32 %v651_v33, %v1083_v5 }
 0x430   : > { %v991_v37 = vpop.eup %990 }
 0x431   : > { %656 = vrot.lane.b32.xlu1 %v654_v34, %s1019_s4  ;;  %663 = vrot.lane.b32.xlu0 %v661_v35, %s1020_s5  ;;  %v742_v38 = vmul.f32 %v991_v37, %v981_v15  ;;  %v740_v39 = vmul.f32 %v991_v37, %v979_v13  ;;  %v749_v42 = vmul.f32 %v991_v37, %v983_v18 }
 0x432   : > { %v756_v43 = vmul.f32 %v991_v37, %v985_v20 }
 0x433   : > { %v743_v41 = vmul.f32 %v742_v38, %v1083_v5  ;;  %v750_v44 = vmul.f32 %v749_v42, %v1083_v5  ;;  %v741_v3 = vmul.f32 %v740_v39, %v1083_v5 }
 0x434   : > { %v757_v45 = vmul.f32 %v756_v43, %v1083_v5 }
 0x435   : > { %670 = vrot.lane.b32.xlu1 %v668_v40, %s1021_s6  ;;  %745 = vrot.lane.b32.xlu0 %v743_v41, %s1019_s4 }
 0x439   : > { %752 = vrot.lane.b32.xlu1 %v750_v44, %s1020_s5  ;;  %759 = vrot.lane.b32.xlu0 %v757_v45, %s1021_s6 }
 0x450   : > { %v479_v46 = vpop.permute.xlu0 %478 }
 0x451   : > { %v481_v49 = vadd.f32 %v479_v46, %v474_v47 }
 0x454   : > { %v486_v48 = vpop.permute.xlu0 %485 }
 0x455   : > { %v488_v50 = vadd.f32 %v486_v48, %v481_v49 }
 0x458   : > { %v493_v51 = vpop.permute.xlu0 %492 }
 0x459   : > { %v495_v52 = vadd.f32 %v493_v51, %v488_v50 }
 0x45b   : > { %497 = vrot.lane.b32.xlu1 %v495_v52, %s1025_s10 }
 0x49b   : > { %v568_v54 = vpop.permute.xlu0 %567  ;;  %v575_v56 = vpop.permute.xlu1 %574 }
 0x49c   : > { %v570_v55 = vadd.f32 %v568_v54, %v563_v53 }
 0x49e   : > { %v577_v57 = vadd.f32 %v575_v56, %v570_v55 }
 0x49f   : > { %v582_v58 = vpop.permute.xlu0 %581 }
 0x4a0   : > { %v584_v59 = vadd.f32 %v582_v58, %v577_v57 }
 0x4a2   : > { %586 = vrot.lane.b32.xlu1 %v584_v59, %s1025_s10 }
 0x4a3   : > { %v657_v12 = vpop.permute.xlu1 %656  ;;  %v664_v61 = vpop.permute.xlu0 %663 }
 0x4a4   : > { %v659_v62 = vadd.f32 %v657_v12, %v652_v60 }
 0x4a6   : > { %v666_v63 = vadd.f32 %v664_v61, %v659_v62 }
 0x4a7   : > { %v671_v0 = vpop.permute.xlu1 %670  ;;  %v746_v1 = vpop.permute.xlu0 %745 }
 0x4a8   : > { %v673_v2 = vadd.f32 %v671_v0, %v666_v63  ;;  %v748_v6 = vadd.f32 %v746_v1, %v741_v3 }
 0x4aa   : > { %675 = vrot.lane.b32.xlu1 %v673_v2, %s1025_s10 }
 0x4ab   : > { %v753_v7 = vpop.permute.xlu1 %752  ;;  %v760_v9 = vpop.permute.xlu0 %759 }
 0x4ac   : > { %v755_v8 = vadd.f32 %v753_v7, %v748_v6 }
 0x4ae   : > { %v762_v10 = vadd.f32 %v760_v9, %v755_v8 }
 0x4b0   : > { %764 = vrot.lane.b32.xlu1 %v762_v10, %s1025_s10 }
 0x4cd   : > { %v498_v4 = vpop.permute.xlu1 %497 }
 0x4ce   : > { %500 = vst.msk [vmem:[%s198_s18] sm:$0xff] %vm364_vm2, %v498_v4 }
 0x514   : > { %v587_v11 = vpop.permute.xlu1 %586 }
 0x515   : > { %860 = vst.msk [vmem:[%s198_s18 + $0x8] sm:$0xff] %vm364_vm2, %v587_v11 }
 0x51c   : > { %v676_v13 = vpop.permute.xlu1 %675 }
 0x51d   : > { %861 = vst.msk [vmem:[%s198_s18 + $0x10] sm:$0xff] %vm364_vm2, %v676_v13 }
 0x522   : > { %v765_v5 = vpop.permute.xlu1 %764 }
 0x523   : > { %862 = vst.msk [vmem:[%s198_s18 + $0x18] sm:$0xff] %vm364_vm2, %v765_v5 }
 0x524 PF: > { %s13_s14 = sadd.s32 1, %s1014_s14   ;;  %s1214_s12 = smov %s1010_s13 }
 0x525   : > { %p10_p5 = scmp.ge.s32.totalorder %s13_s14, 4   ;;  %s1215_s13 = smov %s1217_s15 }
 0x527   :  { %12 = sbr.rel (!%p10_p5) target bundleno = 2 (0x2), region = 65 }

</bundles_post_ra>
